<compile_context>
chip_gen: v5e
topology: v5e:2x2
jax: 0.10.0
libtpu: 0.0.40
codegen_flags: <defaults>
</compile_context>

<pallas_src>
import functools

import jax
import jax.numpy as jnp
from jax.experimental import pallas as pl
from jax.experimental.pallas import tpu as pltpu


# ---------------------------------------------------------------------------
# Shared math helpers (used by both the kernel and the pure-JAX reference).
# ---------------------------------------------------------------------------
def _layer_norm(x, gamma, beta, eps=1e-5):
    mean = jnp.mean(x, axis=-1, keepdims=True)
    xc = x - mean
    var = jnp.mean(xc * xc, axis=-1, keepdims=True)
    inv = jax.lax.rsqrt(var + eps)
    return xc * inv * gamma + beta


def _gelu_tanh(x):
    # tanh-approximate GELU (rides the EUP tanh slot inside the kernel).
    c = 0.7978845608028654  # sqrt(2 / pi)
    return 0.5 * x * (1.0 + jnp.tanh(c * (x + 0.044715 * x * x * x)))


# ---------------------------------------------------------------------------
# Fused M2Block kernel: one grid step == one batch element.
# ---------------------------------------------------------------------------
def _m2block_kernel(x_ref,
                    ln1_w_ref, ln1_b_ref,
                    wq_ref, wk_ref, wv_ref,          # (H, D, dh) bf16 each
                    wproj_ref, bproj_ref,            # (H, dh, D) bf16, (1, D) f32
                    ln2_w_ref, ln2_b_ref,
                    w1_ref, b1_ref,                  # (D, HID) bf16, (1, HID) f32
                    w2_ref, b2_ref,                  # (HID, D) bf16, (1, D) f32
                    o_ref,
                    *, num_heads, scale):
    f32 = jnp.float32
    bf16 = jnp.bfloat16
    n, d = x_ref.shape[1], x_ref.shape[2]

    # ---------------- MHA branch ----------------
    # LayerNorm statistics in f32; cast the normed activations to bf16 once
    # and reuse them for all 3*H per-head matmuls.
    xn = _layer_norm(x_ref[0], ln1_w_ref[...], ln1_b_ref[...])
    xn_bf = xn.astype(bf16)

    acc = jnp.zeros((n, d), dtype=f32)               # projected-attention accum
    for h in range(num_heads):                       # static unroll over heads
        # Per-head q/k/v straight from matmuls (no lane slicing of activations).
        qh = jnp.dot(xn_bf, wq_ref[h], preferred_element_type=f32) * scale
        kh = jnp.dot(xn_bf, wk_ref[h], preferred_element_type=f32)
        vh = jnp.dot(xn_bf, wv_ref[h], preferred_element_type=f32)

        # scores = q @ k^T (contract last dims, no explicit transpose), bf16 in.
        s = jax.lax.dot_general(
            qh.astype(bf16), kh.astype(bf16),
            (((1,), (1,)), ((), ())),
            preferred_element_type=f32)              # (N, N) f32

        # Softmax stats in f32; normalization deferred past the PV matmul.
        m = jnp.max(s, axis=-1, keepdims=True)
        p = jnp.exp(s - m)
        l = jnp.sum(p, axis=-1, keepdims=True)
        oh = jnp.dot(p.astype(bf16), vh.astype(bf16),
                     preferred_element_type=f32)     # (N, dh) f32
        oh = oh * pl.reciprocal(l, approx=True)      # EUP reciprocal, N*dh muls

        # Fold this head's slice of the output projection into the accumulator
        # (replaces the lane-axis concatenate + one big proj matmul).
        acc = acc + jnp.dot(oh.astype(bf16), wproj_ref[h],
                            preferred_element_type=f32)

    x1 = x_ref[0] + acc + bproj_ref[...]             # residual 1 (f32)

    # ---------------- MLP branch ----------------
    xn2 = _layer_norm(x1, ln2_w_ref[...], ln2_b_ref[...])
    hmid = jnp.dot(xn2.astype(bf16), w1_ref[...],
                   preferred_element_type=f32) + b1_ref[...]
    hmid = _gelu_tanh(hmid)                          # f32 (VPU/EUP)
    out2 = jnp.dot(hmid.astype(bf16), w2_ref[...],
                   preferred_element_type=f32) + b2_ref[...]

    o_ref[0] = (x1 + out2).astype(o_ref.dtype)       # residual 2


def m2block(x, params, *, num_heads):
    """Fused Pallas implementation of M2Block.forward.

    Args:
      x: (B, N, D) float32.
      params: dict (torch-layout, all float32) with
        ln1_w, ln1_b, ln2_w, ln2_b : (D,)
        wqkv  : (D, 3D)    (x @ wqkv == torch Linear(D, 3D, bias=False))
        wproj : (D, D),  bproj : (D,)
        w1    : (D, H),  b1    : (H,)
        w2    : (H, D),  b2    : (D,)
      num_heads: number of attention heads (D % num_heads == 0).
    Returns:
      (B, N, D) float32.
    """
    b, n, d = x.shape
    assert d % num_heads == 0
    dh = d // num_heads
    hidden = params["w1"].shape[1]
    scale = float(dh ** (-0.5))
    bf16 = jnp.bfloat16

    # Torch layout -> per-head, MXU-friendly bf16 weight tiles (tiny one-time
    # reshapes on weights, done outside the kernel).
    wqkv = params["wqkv"].reshape(d, 3, num_heads, dh)             # (D,3,H,dh)
    wq = jnp.transpose(wqkv[:, 0], (1, 0, 2)).astype(bf16)         # (H,D,dh)
    wk = jnp.transpose(wqkv[:, 1], (1, 0, 2)).astype(bf16)
    wv = jnp.transpose(wqkv[:, 2], (1, 0, 2)).astype(bf16)
    wproj = params["wproj"].reshape(num_heads, dh, d).astype(bf16)  # (H,dh,D)
    w1 = params["w1"].astype(bf16)
    w2 = params["w2"].astype(bf16)

    # 1-D params -> (1, D) rows so everything in-kernel is a clean 2-D tile.
    row = lambda v: v.reshape(1, -1)

    def const_spec(shape):
        # Constant index_map: the HBM->VMEM DMA happens once (block index is
        # unchanged across grid steps), skipped on subsequent iterations.
        return pl.BlockSpec(shape, lambda i: (0,) * len(shape))

    kernel = functools.partial(_m2block_kernel, num_heads=num_heads, scale=scale)

    return pl.pallas_call(
        kernel,
        out_shape=jax.ShapeDtypeStruct((b, n, d), x.dtype),
        grid_spec=pltpu.PrefetchScalarGridSpec(
            num_scalar_prefetch=0,
            grid=(b,),
            in_specs=[
                pl.BlockSpec((1, n, d), lambda i: (i, 0, 0)),      # x (per batch)
                const_spec((1, d)), const_spec((1, d)),            # ln1 w, b
                const_spec((num_heads, d, dh)),                    # wq
                const_spec((num_heads, d, dh)),                    # wk
                const_spec((num_heads, d, dh)),                    # wv
                const_spec((num_heads, dh, d)), const_spec((1, d)),  # wproj, bproj
                const_spec((1, d)), const_spec((1, d)),            # ln2 w, b
                const_spec((d, hidden)), const_spec((1, hidden)),  # w1, b1
                const_spec((hidden, d)), const_spec((1, d)),       # w2, b2
            ],
            out_specs=pl.BlockSpec((1, n, d), lambda i: (i, 0, 0)),
        ),
        compiler_params=pltpu.CompilerParams(
            # B even keeps both v7x TensorCores busy; v5e/v6e are single-TC.
            dimension_semantics=("parallel",),
            vmem_limit_bytes=48 * 1024 * 1024,
        ),
    )(x,
      row(params["ln1_w"]), row(params["ln1_b"]),
      wq, wk, wv,
      wproj, row(params["bproj"]),
      row(params["ln2_w"]), row(params["ln2_b"]),
      w1, row(params["b1"]),
      w2, row(params["b2"]))


# ---------------------------------------------------------------------------
# Pure-JAX f32 reference (mirrors the PyTorch forward, tanh-GELU as noted).
# ---------------------------------------------------------------------------
def m2block_ref(x, p, *, num_heads):
    b, n, d = x.shape
    dh = d // num_heads
    xn = _layer_norm(x, p["ln1_w"], p["ln1_b"])
    qkv = xn @ p["wqkv"]                                    # (b, n, 3d)
    qkv = qkv.reshape(b, n, 3, num_heads, dh).transpose(2, 0, 3, 1, 4)
    q, k, v = qkv[0], qkv[1], qkv[2]                        # (b, h, n, dh)
    attn = jnp.einsum("bhqd,bhkd->bhqk", q, k) * (dh ** -0.5)
    attn = jax.nn.softmax(attn, axis=-1)
    o = jnp.einsum("bhqk,bhkd->bhqd", attn, v)
    o = o.transpose(0, 2, 1, 3).reshape(b, n, d)
    x1 = x + o @ p["wproj"] + p["bproj"]
    xn2 = _layer_norm(x1, p["ln2_w"], p["ln2_b"])
    h = _gelu_tanh(xn2 @ p["w1"] + p["b1"])
    return x1 + h @ p["w2"] + p["b2"]


if __name__ == "__main__":
    # Small config, lane-dense last dim: embed_dim=128, heads=4, hidden=256,
    # seq=128, batch=2 (scaled-down version of the module defaults 256/8/1024).
    B, N, D, H, HID = 2, 128, 128, 4, 256

    key = jax.random.PRNGKey(0)
    keys = jax.random.split(key, 12)
    x = jax.random.normal(keys[0], (B, N, D), dtype=jnp.float32)
    params = {
        "ln1_w": 1.0 + 0.1 * jax.random.normal(keys[1], (D,), jnp.float32),
        "ln1_b": 0.1 * jax.random.normal(keys[2], (D,), jnp.float32),
        "wqkv":  0.1 * jax.random.normal(keys[3], (D, 3 * D), jnp.float32),
        "wproj": 0.1 * jax.random.normal(keys[4], (D, D), jnp.float32),
        "bproj": 0.1 * jax.random.normal(keys[5], (D,), jnp.float32),
        "ln2_w": 1.0 + 0.1 * jax.random.normal(keys[6], (D,), jnp.float32),
        "ln2_b": 0.1 * jax.random.normal(keys[7], (D,), jnp.float32),
        "w1":    0.1 * jax.random.normal(keys[8], (D, HID), jnp.float32),
        "b1":    0.1 * jax.random.normal(keys[9], (HID,), jnp.float32),
        "w2":    0.1 * jax.random.normal(keys[10], (HID, D), jnp.float32),
        "b2":    0.1 * jax.random.normal(keys[11], (D,), jnp.float32),
    }

    out = m2block(x, params, num_heads=H)
    out = jax.block_until_ready(out)

    ref = m2block_ref(x, params, num_heads=H)

    assert out.shape == (B, N, D), out.shape
    # bf16 MXU operands + approx reciprocal => tolerance loosened vs the pure
    # f32 reference (structural bugs would show up as O(1) relative error).
    rel_err = float(jnp.max(jnp.abs(out - ref)) / jnp.max(jnp.abs(ref)))
    assert rel_err < 5e-2, rel_err
    print("KERNEL_OK")
</pallas_src>

<mosaic_0001>
module attributes {stable_mosaic.version = 11 : i64} {
  func.func @_m2block_kernel(%arg0: i32, %arg1: memref<1x128x128xf32, #tpu.memory_space<vmem>>, %arg2: memref<1x128xf32, #tpu.memory_space<vmem>>, %arg3: memref<1x128xf32, #tpu.memory_space<vmem>>, %arg4: memref<4x128x32xbf16, #tpu.memory_space<vmem>>, %arg5: memref<4x128x32xbf16, #tpu.memory_space<vmem>>, %arg6: memref<4x128x32xbf16, #tpu.memory_space<vmem>>, %arg7: memref<4x32x128xbf16, #tpu.memory_space<vmem>>, %arg8: memref<1x128xf32, #tpu.memory_space<vmem>>, %arg9: memref<1x128xf32, #tpu.memory_space<vmem>>, %arg10: memref<1x128xf32, #tpu.memory_space<vmem>>, %arg11: memref<128x256xbf16, #tpu.memory_space<vmem>>, %arg12: memref<1x256xf32, #tpu.memory_space<vmem>>, %arg13: memref<256x128xbf16, #tpu.memory_space<vmem>>, %arg14: memref<1x128xf32, #tpu.memory_space<vmem>>, %arg15: memref<1x128x128xf32, #tpu.memory_space<vmem>>) attributes {dimension_semantics = [#tpu.dimension_semantics<parallel>], iteration_bounds = array<i64: 2>, scalar_prefetch = 0 : i64, scratch_operands = 0 : i64, tpu.core_type = #tpu.core_type<tc>, window_params = [{transform_indices = @transform_0, window_bounds = array<i64: 1, 128, 128>}, {pipeline_mode = #tpu.pipeline_mode<synchronous>, transform_indices = @transform_1, window_bounds = array<i64: 1, 128>}, {pipeline_mode = #tpu.pipeline_mode<synchronous>, transform_indices = @transform_2, window_bounds = array<i64: 1, 128>}, {pipeline_mode = #tpu.pipeline_mode<synchronous>, transform_indices = @transform_3, window_bounds = array<i64: 4, 128, 32>}, {pipeline_mode = #tpu.pipeline_mode<synchronous>, transform_indices = @transform_4, window_bounds = array<i64: 4, 128, 32>}, {pipeline_mode = #tpu.pipeline_mode<synchronous>, transform_indices = @transform_5, window_bounds = array<i64: 4, 128, 32>}, {pipeline_mode = #tpu.pipeline_mode<synchronous>, transform_indices = @transform_6, window_bounds = array<i64: 4, 32, 128>}, {pipeline_mode = #tpu.pipeline_mode<synchronous>, transform_indices = @transform_7, window_bounds = array<i64: 1, 128>}, {pipeline_mode = #tpu.pipeline_mode<synchronous>, transform_indices = @transform_8, window_bounds = array<i64: 1, 128>}, {pipeline_mode = #tpu.pipeline_mode<synchronous>, transform_indices = @transform_9, window_bounds = array<i64: 1, 128>}, {pipeline_mode = #tpu.pipeline_mode<synchronous>, transform_indices = @transform_10, window_bounds = array<i64: 128, 256>}, {pipeline_mode = #tpu.pipeline_mode<synchronous>, transform_indices = @transform_11, window_bounds = array<i64: 1, 256>}, {pipeline_mode = #tpu.pipeline_mode<synchronous>, transform_indices = @transform_12, window_bounds = array<i64: 256, 128>}, {pipeline_mode = #tpu.pipeline_mode<synchronous>, transform_indices = @transform_13, window_bounds = array<i64: 1, 128>}, {transform_indices = @transform_14, window_bounds = array<i64: 1, 128, 128>}]} {
    %c0 = arith.constant 0 : index
    %c0_0 = arith.constant 0 : index
    %c0_1 = arith.constant 0 : index
    %0 = vector.load %arg1[%c0, %c0_0, %c0_1] : memref<1x128x128xf32, #tpu.memory_space<vmem>>, vector<1x128x128xf32>
    %1 = vector.shape_cast %0 : vector<1x128x128xf32> to vector<128x128xf32>
    %c0_2 = arith.constant 0 : index
    %c0_3 = arith.constant 0 : index
    %2 = vector.load %arg2[%c0_2, %c0_3] : memref<1x128xf32, #tpu.memory_space<vmem>>, vector<1x128xf32>
    %c0_4 = arith.constant 0 : index
    %c0_5 = arith.constant 0 : index
    %3 = vector.load %arg3[%c0_4, %c0_5] : memref<1x128xf32, #tpu.memory_space<vmem>>, vector<1x128xf32>
    %cst = arith.constant dense<0.000000e+00> : vector<128xf32>
    %4 = vector.multi_reduction <add>, %1, %cst [1] : vector<128x128xf32> to vector<128xf32>
    %5 = vector.shape_cast %4 : vector<128xf32> to vector<128x1xf32>
    %cst_6 = arith.constant 1.280000e+02 : f32
    %6 = vector.broadcast %cst_6 : f32 to vector<128x1xf32>
    %7 = arith.divf %5, %6 : vector<128x1xf32>
    %8 = vector.broadcast %7 : vector<128x1xf32> to vector<128x128xf32>
    %9 = arith.subf %1, %8 : vector<128x128xf32>
    %10 = arith.mulf %9, %9 : vector<128x128xf32>
    %cst_7 = arith.constant dense<0.000000e+00> : vector<128xf32>
    %11 = vector.multi_reduction <add>, %10, %cst_7 [1] : vector<128x128xf32> to vector<128xf32>
    %12 = vector.shape_cast %11 : vector<128xf32> to vector<128x1xf32>
    %cst_8 = arith.constant 1.280000e+02 : f32
    %13 = vector.broadcast %cst_8 : f32 to vector<128x1xf32>
    %14 = arith.divf %12, %13 : vector<128x1xf32>
    %cst_9 = arith.constant 9.99999974E-6 : f32
    %15 = vector.broadcast %cst_9 : f32 to vector<128x1xf32>
    %16 = arith.addf %14, %15 : vector<128x1xf32>
    %17 = math.rsqrt %16 : vector<128x1xf32>
    %18 = vector.broadcast %17 : vector<128x1xf32> to vector<128x128xf32>
    %19 = arith.mulf %9, %18 : vector<128x128xf32>
    %20 = vector.broadcast %2 : vector<1x128xf32> to vector<128x128xf32>
    %21 = arith.mulf %19, %20 : vector<128x128xf32>
    %22 = vector.broadcast %3 : vector<1x128xf32> to vector<128x128xf32>
    %23 = arith.addf %21, %22 : vector<128x128xf32>
    %24 = arith.truncf %23 : vector<128x128xf32> to vector<128x128xbf16>
    %cst_10 = arith.constant 0.000000e+00 : f32
    %25 = vector.broadcast %cst_10 : f32 to vector<128x128xf32>
    %c0_11 = arith.constant 0 : index
    %c0_12 = arith.constant 0 : index
    %c0_13 = arith.constant 0 : index
    %26 = vector.load %arg4[%c0_11, %c0_12, %c0_13] : memref<4x128x32xbf16, #tpu.memory_space<vmem>>, vector<1x128x32xbf16>
    %27 = vector.shape_cast %26 : vector<1x128x32xbf16> to vector<128x32xbf16>
    %cst_14 = arith.constant dense<0.000000e+00> : vector<128x32xf32>
    %28 = tpu.matmul %24, %27, %cst_14 {dimension_numbers = #tpu.dot_dimension_numbers<[1], [0], [0], [1], [0, 0, 1, 1], [], []>} : vector<128x128xbf16>, vector<128x32xbf16>, vector<128x32xf32> -> vector<128x32xf32>
    %cst_15 = arith.constant 0.176776692 : f32
    %29 = vector.broadcast %cst_15 : f32 to vector<128x32xf32>
    %30 = arith.mulf %28, %29 : vector<128x32xf32>
    %c0_16 = arith.constant 0 : index
    %c0_17 = arith.constant 0 : index
    %c0_18 = arith.constant 0 : index
    %31 = vector.load %arg5[%c0_16, %c0_17, %c0_18] : memref<4x128x32xbf16, #tpu.memory_space<vmem>>, vector<1x128x32xbf16>
    %32 = vector.shape_cast %31 : vector<1x128x32xbf16> to vector<128x32xbf16>
    %cst_19 = arith.constant dense<0.000000e+00> : vector<128x32xf32>
    %33 = tpu.matmul %24, %32, %cst_19 {dimension_numbers = #tpu.dot_dimension_numbers<[1], [0], [0], [1], [0, 0, 1, 1], [], []>} : vector<128x128xbf16>, vector<128x32xbf16>, vector<128x32xf32> -> vector<128x32xf32>
    %c0_20 = arith.constant 0 : index
    %c0_21 = arith.constant 0 : index
    %c0_22 = arith.constant 0 : index
    %34 = vector.load %arg6[%c0_20, %c0_21, %c0_22] : memref<4x128x32xbf16, #tpu.memory_space<vmem>>, vector<1x128x32xbf16>
    %35 = vector.shape_cast %34 : vector<1x128x32xbf16> to vector<128x32xbf16>
    %cst_23 = arith.constant dense<0.000000e+00> : vector<128x32xf32>
    %36 = tpu.matmul %24, %35, %cst_23 {dimension_numbers = #tpu.dot_dimension_numbers<[1], [0], [0], [1], [0, 0, 1, 1], [], []>} : vector<128x128xbf16>, vector<128x32xbf16>, vector<128x32xf32> -> vector<128x32xf32>
    %37 = arith.truncf %30 : vector<128x32xf32> to vector<128x32xbf16>
    %38 = arith.truncf %33 : vector<128x32xf32> to vector<128x32xbf16>
    %cst_24 = arith.constant dense<0.000000e+00> : vector<128x128xf32>
    %39 = tpu.matmul %37, %38, %cst_24 {dimension_numbers = #tpu.dot_dimension_numbers<[1], [1], [0], [0], [0, 0, 1, 0], [], []>} : vector<128x32xbf16>, vector<128x32xbf16>, vector<128x128xf32> -> vector<128x128xf32>
    %cst_25 = arith.constant dense<0xFF800000> : vector<128xf32>
    %40 = vector.multi_reduction <maximumf>, %39, %cst_25 [1] : vector<128x128xf32> to vector<128xf32>
    %41 = vector.shape_cast %40 : vector<128xf32> to vector<128x1xf32>
    %42 = vector.broadcast %41 : vector<128x1xf32> to vector<128x128xf32>
    %43 = arith.subf %39, %42 : vector<128x128xf32>
    %44 = math.exp %43 : vector<128x128xf32>
    %cst_26 = arith.constant dense<0.000000e+00> : vector<128xf32>
    %45 = vector.multi_reduction <add>, %44, %cst_26 [1] : vector<128x128xf32> to vector<128xf32>
    %46 = vector.shape_cast %45 : vector<128xf32> to vector<128x1xf32>
    %47 = arith.truncf %44 : vector<128x128xf32> to vector<128x128xbf16>
    %48 = arith.truncf %36 : vector<128x32xf32> to vector<128x32xbf16>
    %cst_27 = arith.constant dense<0.000000e+00> : vector<128x32xf32>
    %49 = tpu.matmul %47, %48, %cst_27 {dimension_numbers = #tpu.dot_dimension_numbers<[1], [0], [0], [1], [0, 0, 1, 1], [], []>} : vector<128x128xbf16>, vector<128x32xbf16>, vector<128x32xf32> -> vector<128x32xf32>
    %50 = tpu.reciprocal %46 {approx = true} : vector<128x1xf32> -> vector<128x1xf32>
    %51 = vector.broadcast %50 : vector<128x1xf32> to vector<128x32xf32>
    %52 = arith.mulf %49, %51 : vector<128x32xf32>
    %53 = arith.truncf %52 : vector<128x32xf32> to vector<128x32xbf16>
    %c0_28 = arith.constant 0 : index
    %c0_29 = arith.constant 0 : index
    %c0_30 = arith.constant 0 : index
    %54 = vector.load %arg7[%c0_28, %c0_29, %c0_30] : memref<4x32x128xbf16, #tpu.memory_space<vmem>>, vector<1x32x128xbf16>
    %55 = vector.shape_cast %54 : vector<1x32x128xbf16> to vector<32x128xbf16>
    %cst_31 = arith.constant dense<0.000000e+00> : vector<128x128xf32>
    %56 = tpu.matmul %53, %55, %cst_31 {dimension_numbers = #tpu.dot_dimension_numbers<[1], [0], [0], [1], [0, 0, 1, 1], [], []>} : vector<128x32xbf16>, vector<32x128xbf16>, vector<128x128xf32> -> vector<128x128xf32>
    %57 = arith.addf %25, %56 : vector<128x128xf32>
    %c1 = arith.constant 1 : index
    %c0_32 = arith.constant 0 : index
    %c0_33 = arith.constant 0 : index
    %58 = vector.load %arg4[%c1, %c0_32, %c0_33] : memref<4x128x32xbf16, #tpu.memory_space<vmem>>, vector<1x128x32xbf16>
    %59 = vector.shape_cast %58 : vector<1x128x32xbf16> to vector<128x32xbf16>
    %cst_34 = arith.constant dense<0.000000e+00> : vector<128x32xf32>
    %60 = tpu.matmul %24, %59, %cst_34 {dimension_numbers = #tpu.dot_dimension_numbers<[1], [0], [0], [1], [0, 0, 1, 1], [], []>} : vector<128x128xbf16>, vector<128x32xbf16>, vector<128x32xf32> -> vector<128x32xf32>
    %cst_35 = arith.constant 0.176776692 : f32
    %61 = vector.broadcast %cst_35 : f32 to vector<128x32xf32>
    %62 = arith.mulf %60, %61 : vector<128x32xf32>
    %c1_36 = arith.constant 1 : index
    %c0_37 = arith.constant 0 : index
    %c0_38 = arith.constant 0 : index
    %63 = vector.load %arg5[%c1_36, %c0_37, %c0_38] : memref<4x128x32xbf16, #tpu.memory_space<vmem>>, vector<1x128x32xbf16>
    %64 = vector.shape_cast %63 : vector<1x128x32xbf16> to vector<128x32xbf16>
    %cst_39 = arith.constant dense<0.000000e+00> : vector<128x32xf32>
    %65 = tpu.matmul %24, %64, %cst_39 {dimension_numbers = #tpu.dot_dimension_numbers<[1], [0], [0], [1], [0, 0, 1, 1], [], []>} : vector<128x128xbf16>, vector<128x32xbf16>, vector<128x32xf32> -> vector<128x32xf32>
    %c1_40 = arith.constant 1 : index
    %c0_41 = arith.constant 0 : index
    %c0_42 = arith.constant 0 : index
    %66 = vector.load %arg6[%c1_40, %c0_41, %c0_42] : memref<4x128x32xbf16, #tpu.memory_space<vmem>>, vector<1x128x32xbf16>
    %67 = vector.shape_cast %66 : vector<1x128x32xbf16> to vector<128x32xbf16>
    %cst_43 = arith.constant dense<0.000000e+00> : vector<128x32xf32>
    %68 = tpu.matmul %24, %67, %cst_43 {dimension_numbers = #tpu.dot_dimension_numbers<[1], [0], [0], [1], [0, 0, 1, 1], [], []>} : vector<128x128xbf16>, vector<128x32xbf16>, vector<128x32xf32> -> vector<128x32xf32>
    %69 = arith.truncf %62 : vector<128x32xf32> to vector<128x32xbf16>
    %70 = arith.truncf %65 : vector<128x32xf32> to vector<128x32xbf16>
    %cst_44 = arith.constant dense<0.000000e+00> : vector<128x128xf32>
    %71 = tpu.matmul %69, %70, %cst_44 {dimension_numbers = #tpu.dot_dimension_numbers<[1], [1], [0], [0], [0, 0, 1, 0], [], []>} : vector<128x32xbf16>, vector<128x32xbf16>, vector<128x128xf32> -> vector<128x128xf32>
    %cst_45 = arith.constant dense<0xFF800000> : vector<128xf32>
    %72 = vector.multi_reduction <maximumf>, %71, %cst_45 [1] : vector<128x128xf32> to vector<128xf32>
    %73 = vector.shape_cast %72 : vector<128xf32> to vector<128x1xf32>
    %74 = vector.broadcast %73 : vector<128x1xf32> to vector<128x128xf32>
    %75 = arith.subf %71, %74 : vector<128x128xf32>
    %76 = math.exp %75 : vector<128x128xf32>
    %cst_46 = arith.constant dense<0.000000e+00> : vector<128xf32>
    %77 = vector.multi_reduction <add>, %76, %cst_46 [1] : vector<128x128xf32> to vector<128xf32>
    %78 = vector.shape_cast %77 : vector<128xf32> to vector<128x1xf32>
    %79 = arith.truncf %76 : vector<128x128xf32> to vector<128x128xbf16>
    %80 = arith.truncf %68 : vector<128x32xf32> to vector<128x32xbf16>
    %cst_47 = arith.constant dense<0.000000e+00> : vector<128x32xf32>
    %81 = tpu.matmul %79, %80, %cst_47 {dimension_numbers = #tpu.dot_dimension_numbers<[1], [0], [0], [1], [0, 0, 1, 1], [], []>} : vector<128x128xbf16>, vector<128x32xbf16>, vector<128x32xf32> -> vector<128x32xf32>
    %82 = tpu.reciprocal %78 {approx = true} : vector<128x1xf32> -> vector<128x1xf32>
    %83 = vector.broadcast %82 : vector<128x1xf32> to vector<128x32xf32>
    %84 = arith.mulf %81, %83 : vector<128x32xf32>
    %85 = arith.truncf %84 : vector<128x32xf32> to vector<128x32xbf16>
    %c1_48 = arith.constant 1 : index
    %c0_49 = arith.constant 0 : index
    %c0_50 = arith.constant 0 : index
    %86 = vector.load %arg7[%c1_48, %c0_49, %c0_50] : memref<4x32x128xbf16, #tpu.memory_space<vmem>>, vector<1x32x128xbf16>
    %87 = vector.shape_cast %86 : vector<1x32x128xbf16> to vector<32x128xbf16>
    %cst_51 = arith.constant dense<0.000000e+00> : vector<128x128xf32>
    %88 = tpu.matmul %85, %87, %cst_51 {dimension_numbers = #tpu.dot_dimension_numbers<[1], [0], [0], [1], [0, 0, 1, 1], [], []>} : vector<128x32xbf16>, vector<32x128xbf16>, vector<128x128xf32> -> vector<128x128xf32>
    %89 = arith.addf %57, %88 : vector<128x128xf32>
    %c2 = arith.constant 2 : index
    %c0_52 = arith.constant 0 : index
    %c0_53 = arith.constant 0 : index
    %90 = vector.load %arg4[%c2, %c0_52, %c0_53] : memref<4x128x32xbf16, #tpu.memory_space<vmem>>, vector<1x128x32xbf16>
    %91 = vector.shape_cast %90 : vector<1x128x32xbf16> to vector<128x32xbf16>
    %cst_54 = arith.constant dense<0.000000e+00> : vector<128x32xf32>
    %92 = tpu.matmul %24, %91, %cst_54 {dimension_numbers = #tpu.dot_dimension_numbers<[1], [0], [0], [1], [0, 0, 1, 1], [], []>} : vector<128x128xbf16>, vector<128x32xbf16>, vector<128x32xf32> -> vector<128x32xf32>
    %cst_55 = arith.constant 0.176776692 : f32
    %93 = vector.broadcast %cst_55 : f32 to vector<128x32xf32>
    %94 = arith.mulf %92, %93 : vector<128x32xf32>
    %c2_56 = arith.constant 2 : index
    %c0_57 = arith.constant 0 : index
    %c0_58 = arith.constant 0 : index
    %95 = vector.load %arg5[%c2_56, %c0_57, %c0_58] : memref<4x128x32xbf16, #tpu.memory_space<vmem>>, vector<1x128x32xbf16>
    %96 = vector.shape_cast %95 : vector<1x128x32xbf16> to vector<128x32xbf16>
    %cst_59 = arith.constant dense<0.000000e+00> : vector<128x32xf32>
    %97 = tpu.matmul %24, %96, %cst_59 {dimension_numbers = #tpu.dot_dimension_numbers<[1], [0], [0], [1], [0, 0, 1, 1], [], []>} : vector<128x128xbf16>, vector<128x32xbf16>, vector<128x32xf32> -> vector<128x32xf32>
    %c2_60 = arith.constant 2 : index
    %c0_61 = arith.constant 0 : index
    %c0_62 = arith.constant 0 : index
    %98 = vector.load %arg6[%c2_60, %c0_61, %c0_62] : memref<4x128x32xbf16, #tpu.memory_space<vmem>>, vector<1x128x32xbf16>
    %99 = vector.shape_cast %98 : vector<1x128x32xbf16> to vector<128x32xbf16>
    %cst_63 = arith.constant dense<0.000000e+00> : vector<128x32xf32>
    %100 = tpu.matmul %24, %99, %cst_63 {dimension_numbers = #tpu.dot_dimension_numbers<[1], [0], [0], [1], [0, 0, 1, 1], [], []>} : vector<128x128xbf16>, vector<128x32xbf16>, vector<128x32xf32> -> vector<128x32xf32>
    %101 = arith.truncf %94 : vector<128x32xf32> to vector<128x32xbf16>
    %102 = arith.truncf %97 : vector<128x32xf32> to vector<128x32xbf16>
    %cst_64 = arith.constant dense<0.000000e+00> : vector<128x128xf32>
    %103 = tpu.matmul %101, %102, %cst_64 {dimension_numbers = #tpu.dot_dimension_numbers<[1], [1], [0], [0], [0, 0, 1, 0], [], []>} : vector<128x32xbf16>, vector<128x32xbf16>, vector<128x128xf32> -> vector<128x128xf32>
    %cst_65 = arith.constant dense<0xFF800000> : vector<128xf32>
    %104 = vector.multi_reduction <maximumf>, %103, %cst_65 [1] : vector<128x128xf32> to vector<128xf32>
    %105 = vector.shape_cast %104 : vector<128xf32> to vector<128x1xf32>
    %106 = vector.broadcast %105 : vector<128x1xf32> to vector<128x128xf32>
    %107 = arith.subf %103, %106 : vector<128x128xf32>
    %108 = math.exp %107 : vector<128x128xf32>
    %cst_66 = arith.constant dense<0.000000e+00> : vector<128xf32>
    %109 = vector.multi_reduction <add>, %108, %cst_66 [1] : vector<128x128xf32> to vector<128xf32>
    %110 = vector.shape_cast %109 : vector<128xf32> to vector<128x1xf32>
    %111 = arith.truncf %108 : vector<128x128xf32> to vector<128x128xbf16>
    %112 = arith.truncf %100 : vector<128x32xf32> to vector<128x32xbf16>
    %cst_67 = arith.constant dense<0.000000e+00> : vector<128x32xf32>
    %113 = tpu.matmul %111, %112, %cst_67 {dimension_numbers = #tpu.dot_dimension_numbers<[1], [0], [0], [1], [0, 0, 1, 1], [], []>} : vector<128x128xbf16>, vector<128x32xbf16>, vector<128x32xf32> -> vector<128x32xf32>
    %114 = tpu.reciprocal %110 {approx = true} : vector<128x1xf32> -> vector<128x1xf32>
    %115 = vector.broadcast %114 : vector<128x1xf32> to vector<128x32xf32>
    %116 = arith.mulf %113, %115 : vector<128x32xf32>
    %117 = arith.truncf %116 : vector<128x32xf32> to vector<128x32xbf16>
    %c2_68 = arith.constant 2 : index
    %c0_69 = arith.constant 0 : index
    %c0_70 = arith.constant 0 : index
    %118 = vector.load %arg7[%c2_68, %c0_69, %c0_70] : memref<4x32x128xbf16, #tpu.memory_space<vmem>>, vector<1x32x128xbf16>
    %119 = vector.shape_cast %118 : vector<1x32x128xbf16> to vector<32x128xbf16>
    %cst_71 = arith.constant dense<0.000000e+00> : vector<128x128xf32>
    %120 = tpu.matmul %117, %119, %cst_71 {dimension_numbers = #tpu.dot_dimension_numbers<[1], [0], [0], [1], [0, 0, 1, 1], [], []>} : vector<128x32xbf16>, vector<32x128xbf16>, vector<128x128xf32> -> vector<128x128xf32>
    %121 = arith.addf %89, %120 : vector<128x128xf32>
    %c3 = arith.constant 3 : index
    %c0_72 = arith.constant 0 : index
    %c0_73 = arith.constant 0 : index
    %122 = vector.load %arg4[%c3, %c0_72, %c0_73] : memref<4x128x32xbf16, #tpu.memory_space<vmem>>, vector<1x128x32xbf16>
    %123 = vector.shape_cast %122 : vector<1x128x32xbf16> to vector<128x32xbf16>
    %cst_74 = arith.constant dense<0.000000e+00> : vector<128x32xf32>
    %124 = tpu.matmul %24, %123, %cst_74 {dimension_numbers = #tpu.dot_dimension_numbers<[1], [0], [0], [1], [0, 0, 1, 1], [], []>} : vector<128x128xbf16>, vector<128x32xbf16>, vector<128x32xf32> -> vector<128x32xf32>
    %cst_75 = arith.constant 0.176776692 : f32
    %125 = vector.broadcast %cst_75 : f32 to vector<128x32xf32>
    %126 = arith.mulf %124, %125 : vector<128x32xf32>
    %c3_76 = arith.constant 3 : index
    %c0_77 = arith.constant 0 : index
    %c0_78 = arith.constant 0 : index
    %127 = vector.load %arg5[%c3_76, %c0_77, %c0_78] : memref<4x128x32xbf16, #tpu.memory_space<vmem>>, vector<1x128x32xbf16>
    %128 = vector.shape_cast %127 : vector<1x128x32xbf16> to vector<128x32xbf16>
    %cst_79 = arith.constant dense<0.000000e+00> : vector<128x32xf32>
    %129 = tpu.matmul %24, %128, %cst_79 {dimension_numbers = #tpu.dot_dimension_numbers<[1], [0], [0], [1], [0, 0, 1, 1], [], []>} : vector<128x128xbf16>, vector<128x32xbf16>, vector<128x32xf32> -> vector<128x32xf32>
    %c3_80 = arith.constant 3 : index
    %c0_81 = arith.constant 0 : index
    %c0_82 = arith.constant 0 : index
    %130 = vector.load %arg6[%c3_80, %c0_81, %c0_82] : memref<4x128x32xbf16, #tpu.memory_space<vmem>>, vector<1x128x32xbf16>
    %131 = vector.shape_cast %130 : vector<1x128x32xbf16> to vector<128x32xbf16>
    %cst_83 = arith.constant dense<0.000000e+00> : vector<128x32xf32>
    %132 = tpu.matmul %24, %131, %cst_83 {dimension_numbers = #tpu.dot_dimension_numbers<[1], [0], [0], [1], [0, 0, 1, 1], [], []>} : vector<128x128xbf16>, vector<128x32xbf16>, vector<128x32xf32> -> vector<128x32xf32>
    %133 = arith.truncf %126 : vector<128x32xf32> to vector<128x32xbf16>
    %134 = arith.truncf %129 : vector<128x32xf32> to vector<128x32xbf16>
    %cst_84 = arith.constant dense<0.000000e+00> : vector<128x128xf32>
    %135 = tpu.matmul %133, %134, %cst_84 {dimension_numbers = #tpu.dot_dimension_numbers<[1], [1], [0], [0], [0, 0, 1, 0], [], []>} : vector<128x32xbf16>, vector<128x32xbf16>, vector<128x128xf32> -> vector<128x128xf32>
    %cst_85 = arith.constant dense<0xFF800000> : vector<128xf32>
    %136 = vector.multi_reduction <maximumf>, %135, %cst_85 [1] : vector<128x128xf32> to vector<128xf32>
    %137 = vector.shape_cast %136 : vector<128xf32> to vector<128x1xf32>
    %138 = vector.broadcast %137 : vector<128x1xf32> to vector<128x128xf32>
    %139 = arith.subf %135, %138 : vector<128x128xf32>
    %140 = math.exp %139 : vector<128x128xf32>
    %cst_86 = arith.constant dense<0.000000e+00> : vector<128xf32>
    %141 = vector.multi_reduction <add>, %140, %cst_86 [1] : vector<128x128xf32> to vector<128xf32>
    %142 = vector.shape_cast %141 : vector<128xf32> to vector<128x1xf32>
    %143 = arith.truncf %140 : vector<128x128xf32> to vector<128x128xbf16>
    %144 = arith.truncf %132 : vector<128x32xf32> to vector<128x32xbf16>
    %cst_87 = arith.constant dense<0.000000e+00> : vector<128x32xf32>
    %145 = tpu.matmul %143, %144, %cst_87 {dimension_numbers = #tpu.dot_dimension_numbers<[1], [0], [0], [1], [0, 0, 1, 1], [], []>} : vector<128x128xbf16>, vector<128x32xbf16>, vector<128x32xf32> -> vector<128x32xf32>
    %146 = tpu.reciprocal %142 {approx = true} : vector<128x1xf32> -> vector<128x1xf32>
    %147 = vector.broadcast %146 : vector<128x1xf32> to vector<128x32xf32>
    %148 = arith.mulf %145, %147 : vector<128x32xf32>
    %149 = arith.truncf %148 : vector<128x32xf32> to vector<128x32xbf16>
    %c3_88 = arith.constant 3 : index
    %c0_89 = arith.constant 0 : index
    %c0_90 = arith.constant 0 : index
    %150 = vector.load %arg7[%c3_88, %c0_89, %c0_90] : memref<4x32x128xbf16, #tpu.memory_space<vmem>>, vector<1x32x128xbf16>
    %151 = vector.shape_cast %150 : vector<1x32x128xbf16> to vector<32x128xbf16>
    %cst_91 = arith.constant dense<0.000000e+00> : vector<128x128xf32>
    %152 = tpu.matmul %149, %151, %cst_91 {dimension_numbers = #tpu.dot_dimension_numbers<[1], [0], [0], [1], [0, 0, 1, 1], [], []>} : vector<128x32xbf16>, vector<32x128xbf16>, vector<128x128xf32> -> vector<128x128xf32>
    %153 = arith.addf %121, %152 : vector<128x128xf32>
    %c0_92 = arith.constant 0 : index
    %c0_93 = arith.constant 0 : index
    %c0_94 = arith.constant 0 : index
    %154 = vector.load %arg1[%c0_92, %c0_93, %c0_94] : memref<1x128x128xf32, #tpu.memory_space<vmem>>, vector<1x128x128xf32>
    %155 = vector.shape_cast %154 : vector<1x128x128xf32> to vector<128x128xf32>
    %156 = arith.addf %155, %153 : vector<128x128xf32>
    %c0_95 = arith.constant 0 : index
    %c0_96 = arith.constant 0 : index
    %157 = vector.load %arg8[%c0_95, %c0_96] : memref<1x128xf32, #tpu.memory_space<vmem>>, vector<1x128xf32>
    %158 = vector.broadcast %157 : vector<1x128xf32> to vector<128x128xf32>
    %159 = arith.addf %156, %158 : vector<128x128xf32>
    %c0_97 = arith.constant 0 : index
    %c0_98 = arith.constant 0 : index
    %160 = vector.load %arg9[%c0_97, %c0_98] : memref<1x128xf32, #tpu.memory_space<vmem>>, vector<1x128xf32>
    %c0_99 = arith.constant 0 : index
    %c0_100 = arith.constant 0 : index
    %161 = vector.load %arg10[%c0_99, %c0_100] : memref<1x128xf32, #tpu.memory_space<vmem>>, vector<1x128xf32>
    %cst_101 = arith.constant dense<0.000000e+00> : vector<128xf32>
    %162 = vector.multi_reduction <add>, %159, %cst_101 [1] : vector<128x128xf32> to vector<128xf32>
    %163 = vector.shape_cast %162 : vector<128xf32> to vector<128x1xf32>
    %cst_102 = arith.constant 1.280000e+02 : f32
    %164 = vector.broadcast %cst_102 : f32 to vector<128x1xf32>
    %165 = arith.divf %163, %164 : vector<128x1xf32>
    %166 = vector.broadcast %165 : vector<128x1xf32> to vector<128x128xf32>
    %167 = arith.subf %159, %166 : vector<128x128xf32>
    %168 = arith.mulf %167, %167 : vector<128x128xf32>
    %cst_103 = arith.constant dense<0.000000e+00> : vector<128xf32>
    %169 = vector.multi_reduction <add>, %168, %cst_103 [1] : vector<128x128xf32> to vector<128xf32>
    %170 = vector.shape_cast %169 : vector<128xf32> to vector<128x1xf32>
    %cst_104 = arith.constant 1.280000e+02 : f32
    %171 = vector.broadcast %cst_104 : f32 to vector<128x1xf32>
    %172 = arith.divf %170, %171 : vector<128x1xf32>
    %cst_105 = arith.constant 9.99999974E-6 : f32
    %173 = vector.broadcast %cst_105 : f32 to vector<128x1xf32>
    %174 = arith.addf %172, %173 : vector<128x1xf32>
    %175 = math.rsqrt %174 : vector<128x1xf32>
    %176 = vector.broadcast %175 : vector<128x1xf32> to vector<128x128xf32>
    %177 = arith.mulf %167, %176 : vector<128x128xf32>
    %178 = vector.broadcast %160 : vector<1x128xf32> to vector<128x128xf32>
    %179 = arith.mulf %177, %178 : vector<128x128xf32>
    %180 = vector.broadcast %161 : vector<1x128xf32> to vector<128x128xf32>
    %181 = arith.addf %179, %180 : vector<128x128xf32>
    %182 = arith.truncf %181 : vector<128x128xf32> to vector<128x128xbf16>
    %c0_106 = arith.constant 0 : index
    %c0_107 = arith.constant 0 : index
    %183 = vector.load %arg11[%c0_106, %c0_107] : memref<128x256xbf16, #tpu.memory_space<vmem>>, vector<128x256xbf16>
    %cst_108 = arith.constant dense<0.000000e+00> : vector<128x256xf32>
    %184 = tpu.matmul %182, %183, %cst_108 {dimension_numbers = #tpu.dot_dimension_numbers<[1], [0], [0], [1], [0, 0, 1, 1], [], []>} : vector<128x128xbf16>, vector<128x256xbf16>, vector<128x256xf32> -> vector<128x256xf32>
    %c0_109 = arith.constant 0 : index
    %c0_110 = arith.constant 0 : index
    %185 = vector.load %arg12[%c0_109, %c0_110] : memref<1x256xf32, #tpu.memory_space<vmem>>, vector<1x256xf32>
    %186 = vector.broadcast %185 : vector<1x256xf32> to vector<128x256xf32>
    %187 = arith.addf %184, %186 : vector<128x256xf32>
    %cst_111 = arith.constant 5.000000e-01 : f32
    %188 = vector.broadcast %cst_111 : f32 to vector<128x256xf32>
    %189 = arith.mulf %188, %187 : vector<128x256xf32>
    %cst_112 = arith.constant 4.471500e-02 : f32
    %190 = vector.broadcast %cst_112 : f32 to vector<128x256xf32>
    %191 = arith.mulf %190, %187 : vector<128x256xf32>
    %192 = arith.mulf %191, %187 : vector<128x256xf32>
    %193 = arith.mulf %192, %187 : vector<128x256xf32>
    %194 = arith.addf %187, %193 : vector<128x256xf32>
    %cst_113 = arith.constant 0.797884583 : f32
    %195 = vector.broadcast %cst_113 : f32 to vector<128x256xf32>
    %196 = arith.mulf %195, %194 : vector<128x256xf32>
    %197 = math.tanh %196 : vector<128x256xf32>
    %cst_114 = arith.constant 1.000000e+00 : f32
    %198 = vector.broadcast %cst_114 : f32 to vector<128x256xf32>
    %199 = arith.addf %198, %197 : vector<128x256xf32>
    %200 = arith.mulf %189, %199 : vector<128x256xf32>
    %201 = arith.truncf %200 : vector<128x256xf32> to vector<128x256xbf16>
    %c0_115 = arith.constant 0 : index
    %c0_116 = arith.constant 0 : index
    %202 = vector.load %arg13[%c0_115, %c0_116] : memref<256x128xbf16, #tpu.memory_space<vmem>>, vector<256x128xbf16>
    %cst_117 = arith.constant dense<0.000000e+00> : vector<128x128xf32>
    %203 = tpu.matmul %201, %202, %cst_117 {dimension_numbers = #tpu.dot_dimension_numbers<[1], [0], [0], [1], [0, 0, 1, 1], [], []>} : vector<128x256xbf16>, vector<256x128xbf16>, vector<128x128xf32> -> vector<128x128xf32>
    %c0_118 = arith.constant 0 : index
    %c0_119 = arith.constant 0 : index
    %204 = vector.load %arg14[%c0_118, %c0_119] : memref<1x128xf32, #tpu.memory_space<vmem>>, vector<1x128xf32>
    %205 = vector.broadcast %204 : vector<1x128xf32> to vector<128x128xf32>
    %206 = arith.addf %203, %205 : vector<128x128xf32>
    %207 = arith.addf %159, %206 : vector<128x128xf32>
    %c0_120 = arith.constant 0 : index
    %c0_121 = arith.constant 0 : index
    %c0_122 = arith.constant 0 : index
    %208 = vector.load %arg15[%c0_120, %c0_121, %c0_122] : memref<1x128x128xf32, #tpu.memory_space<vmem>>, vector<1x128x128xf32>
    %209 = vector.shape_cast %208 : vector<1x128x128xf32> to vector<128x128xf32>
    %210 = vector.shape_cast %207 : vector<128x128xf32> to vector<1x128x128xf32>
    tpu.vector_store %arg15[%c0_120, %c0_121, %c0_122], %210 {strides = array<i32>} : memref<1x128x128xf32, #tpu.memory_space<vmem>>, vector<1x128x128xf32>,
    return
  }
  func.func @transform_0(%arg0: i32) -> (i32, i32, i32) {
    %c0_i32 = arith.constant 0 : i32
    %c0_i32_0 = arith.constant 0 : i32
    %c0_i32_1 = arith.constant 0 : i32
    return %arg0, %c0_i32, %c0_i32_0 : i32, i32, i32
  }
  func.func @transform_1(%arg0: i32) -> (i32, i32) {
    %c0_i32 = arith.constant 0 : i32
    %c0_i32_0 = arith.constant 0 : i32
    %c0_i32_1 = arith.constant 0 : i32
    return %c0_i32, %c0_i32_0 : i32, i32
  }
  func.func @transform_2(%arg0: i32) -> (i32, i32) {
    %c0_i32 = arith.constant 0 : i32
    %c0_i32_0 = arith.constant 0 : i32
    %c0_i32_1 = arith.constant 0 : i32
    return %c0_i32, %c0_i32_0 : i32, i32
  }
  func.func @transform_3(%arg0: i32) -> (i32, i32, i32) {
    %c0_i32 = arith.constant 0 : i32
    %c0_i32_0 = arith.constant 0 : i32
    %c0_i32_1 = arith.constant 0 : i32
    %c0_i32_2 = arith.constant 0 : i32
    return %c0_i32, %c0_i32_0, %c0_i32_1 : i32, i32, i32
  }
  func.func @transform_4(%arg0: i32) -> (i32, i32, i32) {
    %c0_i32 = arith.constant 0 : i32
    %c0_i32_0 = arith.constant 0 : i32
    %c0_i32_1 = arith.constant 0 : i32
    %c0_i32_2 = arith.constant 0 : i32
    return %c0_i32, %c0_i32_0, %c0_i32_1 : i32, i32, i32
  }
  func.func @transform_5(%arg0: i32) -> (i32, i32, i32) {
    %c0_i32 = arith.constant 0 : i32
    %c0_i32_0 = arith.constant 0 : i32
    %c0_i32_1 = arith.constant 0 : i32
    %c0_i32_2 = arith.constant 0 : i32
    return %c0_i32, %c0_i32_0, %c0_i32_1 : i32, i32, i32
  }
  func.func @transform_6(%arg0: i32) -> (i32, i32, i32) {
    %c0_i32 = arith.constant 0 : i32
    %c0_i32_0 = arith.constant 0 : i32
    %c0_i32_1 = arith.constant 0 : i32
    %c0_i32_2 = arith.constant 0 : i32
    return %c0_i32, %c0_i32_0, %c0_i32_1 : i32, i32, i32
  }
  func.func @transform_7(%arg0: i32) -> (i32, i32) {
    %c0_i32 = arith.constant 0 : i32
    %c0_i32_0 = arith.constant 0 : i32
    %c0_i32_1 = arith.constant 0 : i32
    return %c0_i32, %c0_i32_0 : i32, i32
  }
  func.func @transform_8(%arg0: i32) -> (i32, i32) {
    %c0_i32 = arith.constant 0 : i32
    %c0_i32_0 = arith.constant 0 : i32
    %c0_i32_1 = arith.constant 0 : i32
    return %c0_i32, %c0_i32_0 : i32, i32
  }
  func.func @transform_9(%arg0: i32) -> (i32, i32) {
    %c0_i32 = arith.constant 0 : i32
    %c0_i32_0 = arith.constant 0 : i32
    %c0_i32_1 = arith.constant 0 : i32
    return %c0_i32, %c0_i32_0 : i32, i32
  }
  func.func @transform_10(%arg0: i32) -> (i32, i32) {
    %c0_i32 = arith.constant 0 : i32
    %c0_i32_0 = arith.constant 0 : i32
    %c0_i32_1 = arith.constant 0 : i32
    return %c0_i32, %c0_i32_0 : i32, i32
  }
  func.func @transform_11(%arg0: i32) -> (i32, i32) {
    %c0_i32 = arith.constant 0 : i32
    %c0_i32_0 = arith.constant 0 : i32
    %c0_i32_1 = arith.constant 0 : i32
    return %c0_i32, %c0_i32_0 : i32, i32
  }
  func.func @transform_12(%arg0: i32) -> (i32, i32) {
    %c0_i32 = arith.constant 0 : i32
    %c0_i32_0 = arith.constant 0 : i32
    %c0_i32_1 = arith.constant 0 : i32
    return %c0_i32, %c0_i32_0 : i32, i32
  }
  func.func @transform_13(%arg0: i32) -> (i32, i32) {
    %c0_i32 = arith.constant 0 : i32
    %c0_i32_0 = arith.constant 0 : i32
    %c0_i32_1 = arith.constant 0 : i32
    return %c0_i32, %c0_i32_0 : i32, i32
  }
  func.func @transform_14(%arg0: i32) -> (i32, i32, i32) {
    %c0_i32 = arith.constant 0 : i32
    %c0_i32_0 = arith.constant 0 : i32
    %c0_i32_1 = arith.constant 0 : i32
    return %arg0, %c0_i32, %c0_i32_0 : i32, i32, i32
  }
}

</mosaic_0001>

<bundles_post_ra>
// kernel: tpu_custom_call.1
= control target key start
LH: loop header
LB: loop body
LE: loop exit
PB: predicated region body
PF: predicated region fallthrough
CT: control target
= control target key end

     0   :  { %s8971_s0 = inlined_call_operand.vmem [shape: f32[2,128,128], index: 0, kind: input, shape index: {}]   ;;  %s8972_s1 = inlined_call_operand.vmem [shape: f32[1,128], index: 1, kind: input, shape index: {}]   ;;  %s8973_s2 = inlined_call_operand.vmem [shape: f32[1,128], index: 2, kind: input, shape index: {}]   ;;  %s8974_s3 = inlined_call_operand.vmem [shape: bf16[4,128,32], index: 3, kind: input, shape index: {}]   ;;  %s8975_s4 = inlined_call_operand.vmem [shape: bf16[4,128,32], index: 4, kind: input, shape index: {}]   ;;  %s8976_s5 = inlined_call_operand.vmem [shape: bf16[4,128,32], index: 5, kind: input, shape index: {}]   ;;  %s8977_s6 = inlined_call_operand.vmem [shape: bf16[4,32,128], index: 6, kind: input, shape index: {}]   ;;  %s8978_s7 = inlined_call_operand.vmem [shape: f32[1,128], index: 7, kind: input, shape index: {}]   ;;  %s8979_s8 = inlined_call_operand.vmem [shape: f32[1,128], index: 8, kind: input, shape index: {}]   ;;  %s8980_s9 = inlined_call_operand.vmem [shape: f32[1,128], index: 9, kind: input, shape index: {}]   ;;  %s8981_s10 = inlined_call_operand.vmem [shape: bf16[128,256], index: 10, kind: input, shape index: {}]   ;;  %s8982_s11 = inlined_call_operand.vmem [shape: f32[1,256], index: 11, kind: input, shape index: {}]   ;;  %s8983_s12 = inlined_call_operand.vmem [shape: bf16[256,128], index: 12, kind: input, shape index: {}]   ;;  %s8984_s13 = inlined_call_operand.vmem [shape: f32[1,128], index: 13, kind: input, shape index: {}]   ;;  %s8985_s14 = inlined_call_operand.hbm [shape: f32[2,128,128], index: 14, kind: output, shape index: {}]  }
   0x1   :  { %8991 = sst [smem:[#allocation14_spill]] %s8971_s0 }
   0x2   :  { %19 = vsyncpa [#allocation3], 0 }
   0x3   :  { %21 = vsyncpa [#allocation3 + $0x1], 0  ;;  %s6761_s29 = smov 0   ;;  %s6763_s30 = smov 0  }
   0x4   :  { %s6765_s15 = smov 0   ;;  %s6767_s16 = smov 0  }
   0x5 LB: > { %8992 = sst [smem:[#allocation5_spill]] %s6677_s15  ;;  %s6782_s17 = sadd.s32 4294967295, %s6681_s16   ;;  %s6681_s16 = sphi %s6767_s16, %s9022_s16   ;;  %s6677_s15 = sphi %s6765_s15, %s9024_s15   ;;  %s6673_s30 = sphi %s6763_s30, %s9026_s30   ;;  %s6669_s29 = sphi %s6761_s29, %s9025_s29  }
   0x6   : > { %s5247_s18 = sadd.s32 4294967294, %s6681_s16   ;;  %s6786_s19 = sadd.s32 1, %s6681_s16  }
   0x7   : > { %8993 = sst [smem:[#allocation6_spill]] %s6786_s19  ;;  %s333_s20 = sadd.s32 1, %s6677_s15 }
   0x8   : > { %s330_s21 = ssub.s32 %s6681_s16, %s6786_s19  ;;  %p343_p0 = scmp.ne.s32.totalorder %s6677_s15, %s6673_s30 }
   0x9   : > { %p331_p1 = scmp.eq.s32.totalorder %s330_s21, 0  ;;  %p344_p2 = scmp.eq.s32.totalorder %s6782_s17, 1 }
   0xa   : > { %p349_p3 = scmp.ne.s32.totalorder %s6673_s30, %s6669_s29  ;;  %p350_p4 = scmp.eq.s32.totalorder %s5247_s18, 1 }
   0xb   : > { %s6797_s22 = scalar_select %p331_p1, %s6677_s15, %s333_s20  }
   0xc   : > { %p6799_p5 = por %p344_p2, %p343_p0  ;;  %p6803_p6 = por %p350_p4, %p349_p3 }
   0xd   : > { %8994 = sst [smem:[#allocation7_spill]] %s6797_s22  ;;  %p5250_p7 = scmp.ge.s32.totalorder %s6681_s16, 1 }
   0xe   : > { %p415_p8 = scmp.lt.s32.totalorder %s6681_s16, 3 }
  0x10   : > { %p416_p9 = pnand %p5250_p7, %p415_p8 }
  0x12   : > { %419 = sbr.rel (%p416_p9) target bundleno = 3792 (0xed0), region = 76 }
  0x17   : > { %p461_p10 = scmp.lt.s32.totalorder %s6782_s17, 1  ;;  %s8997_s0 = sld [smem:[#allocation14_spill]]  ;;  %v6683_v7 = vmov 128.0   ;;  %v6031_v50 = vld [vmem:[%s8974_s3 + $0x38] sm:$0xff]  ;;  %v6030_v53 = vld [vmem:[%s8974_s3 + $0x30] sm:$0xff]  ;;  %v6029_v56 = vld [vmem:[%s8974_s3 + $0x28] sm:$0xff] }
  0x18   : > { %6217 = vrcp.f32 %v6683_v7  ;;  %v6039_v51 = vld [vmem:[%s8975_s4 + $0x38] sm:$0xff]  ;;  %922 = vmatpush.bf16.msra.mxu0 %v6031_v50  ;;  %v6038_v54 = vld [vmem:[%s8975_s4 + $0x30] sm:$0xff]  ;;  %v6037_v57 = vld [vmem:[%s8975_s4 + $0x28] sm:$0xff]  ;;  %s6160_s22 = sshll.u32 %s6782_s17, 7  ;;  %s6639_s15 = scalar_lea.hbm %s8985_s14, 256 }
  0x19   : > { %s462_s25 = scalar_select %p461_p10, %s6782_s17, 1  ;;  %v6047_v52 = vld [vmem:[%s8976_s5 + $0x38] sm:$0xff]  ;;  %1051 = vmatpush.bf16.msra.mxu1 %v6039_v51  ;;  %v6046_v55 = vld [vmem:[%s8976_s5 + $0x30] sm:$0xff]  ;;  %v6045_v58 = vld [vmem:[%s8976_s5 + $0x28] sm:$0xff] }
  0x1a   : > { %1164 = vmatpush.bf16.msra.mxu2 %v6047_v52  ;;  %v6028_v59 = vld [vmem:[%s8974_s3 + $0x20] sm:$0xff]  ;;  %v6027_v62 = vld [vmem:[%s8974_s3 + $0x18] sm:$0xff] }
  0x1b   : > { %s6023_s26 = sshll.u32 %s462_s25, 7  ;;  %v6036_v60 = vld [vmem:[%s8975_s4 + $0x20] sm:$0xff]  ;;  %v6035_v63 = vld [vmem:[%s8975_s4 + $0x18] sm:$0xff]  ;;  %s458_s25 = sand.u32 1, %s6673_s30  }
  0x1c   : > { %923 = vmatpush.bf16.msra.mxu0 %v6030_v53  ;;  %v6044_v61 = vld [vmem:[%s8976_s5 + $0x20] sm:$0xff]  ;;  %s5251_s28 = sshll.u32 %s458_s25, 7  ;;  %s5170_s17 = scalar_lea.sflag [#allocation3], %s458_s25 }
  0x1d   : > { %s6814_s18 = scalar_lea.vmem %s8997_s0, %s6023_s26  ;;  %1052 = vmatpush.bf16.msra.mxu1 %v6038_v54  ;;  %s8879_s0 = scalar_lea.vmem [#allocation2], %s5251_s28 }
  0x1e   : > { %v469_v0 = vld [vmem:[%s6814_s18 + $0x10] sm:$0xff]  ;;  %v467_v1 = vld [vmem:[%s6814_s18] sm:$0xff]  ;;  %v470_v3 = vld [vmem:[%s6814_s18 + $0x18] sm:$0xff]  ;;  %v6218_v8 = vpop.eup %6217  ;;  %1165 = vmatpush.bf16.msra.mxu2 %v6046_v55  ;;  %s5182_s20 = sshll.u32 %s8879_s0, 4  ;;  %s5183_s20 = int_to_ptr.vmem [resolvable:$true] %s5182_s20 }
  0x1f   : > { %489 = vadd.xlane.f32.xlu1 %v469_v0  ;;  %485 = vadd.xlane.f32.xlu0 %v467_v1  ;;  %v471_v2 = vld [vmem:[%s6814_s18 + $0x20] sm:$0xff]  ;;  %v468_v4 = vld [vmem:[%s6814_s18 + $0x8] sm:$0xff]  ;;  %v473_v6 = vld [vmem:[%s6814_s18 + $0x30] sm:$0xff]  ;;  %v518_v9 = vmul.f32 128.0, %v6218_v8  ;;  %vm522_vm0 = vweird.f32 %v6218_v8 }
  0x20   : > { %493 = vadd.xlane.f32.xlu2 %v471_v2  ;;  %v472_v5 = vld [vmem:[%s6814_s18 + $0x28] sm:$0xff]  ;;  %v6839_v28 = vld [vmem:[%s6814_s18 + $0x38] sm:$0xff]  ;;  %v6854_v36 = vld [vmem:[%s6814_s18 + $0x40] sm:$0xff]  ;;  %924 = vmatpush.bf16.msra.mxu0 %v6029_v56 }
  0x21   : > { %v519_v10 = vsub.f32 1.0, %v518_v9  ;;  %v6865_v42 = vld [vmem:[%s6814_s18 + $0x58] sm:$0xff]  ;;  %v6868_v43 = vld [vmem:[%s6814_s18 + $0x48] sm:$0xff]  ;;  %v6877_v46 = vld [vmem:[%s6814_s18 + $0x60] sm:$0xff]  ;;  %1053 = vmatpush.bf16.msra.mxu1 %v6037_v57 }
  0x22   : > { %v6880_v47 = vld [vmem:[%s6814_s18 + $0x50] sm:$0xff]  ;;  %v6885_v48 = vld [vmem:[%s6814_s18 + $0x68] sm:$0xff]  ;;  %1166 = vmatpush.bf16.msra.mxu2 %v6045_v58 }
  0x23   : > { %v520_v11 = vmul.f32 %v6218_v8, %v519_v10  ;;  %v6889_v49 = vld [vmem:[%s6814_s18 + $0x70] sm:$0xff]  ;;  %v6024_v10 = vld [vmem:[%s8974_s3] sm:$0xff] }
  0x24   : > { %925 = vmatpush.bf16.msra.mxu0 %v6028_v59 }
  0x25   : > { %v521_v12 = vadd.f32 %v6218_v8, %v520_v11  ;;  %1054 = vmatpush.bf16.msra.mxu1 %v6036_v60  ;;  %v6032_v11 = vld [vmem:[%s8975_s4] sm:$0xff] }
  0x26   : > { %1167 = vmatpush.bf16.msra.mxu2 %v6044_v61 }
  0x27   : > { %491 = vadd.xlane.f32.xlu1 %v470_v3  ;;  %487 = vadd.xlane.f32.xlu0 %v468_v4  ;;  %v6823_v13 = vsel %vm522_vm0, %v6218_v8, %v521_v12  ;;  %v6041_v8 = vld [vmem:[%s8976_s5 + $0x8] sm:$0xff]  ;;  %v6040_v12 = vld [vmem:[%s8976_s5] sm:$0xff] }
  0x28   : > { %495 = vadd.xlane.f32.xlu2 %v472_v5  ;;  %8998 = vst [vmem:[#allocation8_spill] sm:$0xff] %v6823_v13  ;;  %926 = vmatpush.bf16.msra.mxu0 %v6027_v62 }
  0x29   : > { %1055 = vmatpush.bf16.msra.mxu1 %v6035_v63 }
  0x30   : > { %497 = vadd.xlane.f32.xlu2 %v473_v6 }
  0x92   : > { %v490_v14 = vpop.xlane.xlu1 %489  ;;  %v486_v15 = vpop.xlane.xlu0 %485 }
  0x93   : > { %v524_v16 = vmul.f32 %v6823_v13, %v486_v15  ;;  %v494_v18 = vpop.xlane.xlu2 %493  ;;  %v526_v27 = vmul.f32 %v6823_v13, %v490_v14 }
  0x94   : > { %v528_v26 = vmul.f32 %v6823_v13, %v494_v18 }
  0x95   : > { %v6826_v17 = vsub.f32 %v467_v1, %v524_v16  ;;  %v6848_v33 = vsub.f32 %v469_v0, %v526_v27  ;;  %v6043_v0 = vld [vmem:[%s8976_s5 + $0x18] sm:$0xff]  ;;  %v6026_v1 = vld [vmem:[%s8974_s3 + $0x10] sm:$0xff] }
  0x96   : > { %v6846_v32 = vsub.f32 %v471_v2, %v528_v26  ;;  %1168 = vmatpush.bf16.msra.mxu2 %v6043_v0  ;;  %v6034_v2 = vld [vmem:[%s8975_s4 + $0x10] sm:$0xff]  ;;  %927 = vmatpush.bf16.msra.mxu0 %v6026_v1 }
  0x97   : > { %v556_v19 = vmul.f32 %v6826_v17, %v6826_v17  ;;  %v558_v37 = vmul.f32 %v6848_v33, %v6848_v33  ;;  %1056 = vmatpush.bf16.msra.mxu1 %v6034_v2 }
  0x98   : > { %v560_v34 = vmul.f32 %v6846_v32, %v6846_v32 }
  0x99   : > { %572 = vadd.xlane.f32.xlu0 %v556_v19 }
  0x9a   : > { %v492_v20 = vpop.xlane.xlu1 %491  ;;  %v488_v21 = vpop.xlane.xlu0 %487 }
  0x9b   : > { %v527_v22 = vmul.f32 %v6823_v13, %v492_v20  ;;  %v525_v23 = vmul.f32 %v6823_v13, %v488_v21  ;;  %v496_v31 = vpop.xlane.xlu2 %495 }
  0x9c   : > { %v529_v35 = vmul.f32 %v6823_v13, %v496_v31 }
  0x9d   : > { %v6832_v24 = vsub.f32 %v470_v3, %v527_v22  ;;  %v6834_v25 = vsub.f32 %v468_v4, %v525_v23  ;;  %v6042_v3 = vld [vmem:[%s8976_s5 + $0x10] sm:$0xff] }
  0x9e   : > { %v6859_v38 = vsub.f32 %v472_v5, %v529_v35  ;;  %1169 = vmatpush.bf16.msra.mxu2 %v6042_v3  ;;  %v6025_v5 = vld [vmem:[%s8974_s3 + $0x8] sm:$0xff] }
  0x9f   : > { %v559_v29 = vmul.f32 %v6832_v24, %v6832_v24  ;;  %v557_v30 = vmul.f32 %v6834_v25, %v6834_v25  ;;  %928 = vmatpush.bf16.msra.mxu0 %v6025_v5 }
  0xa0   : > { %v561_v40 = vmul.f32 %v6859_v38, %v6859_v38 }
  0xa1   : > { %578 = vadd.xlane.f32.xlu2 %v559_v29  ;;  %499 = vadd.xlane.f32.xlu0 %v6839_v28 }
  0xa2   : > { %574 = vadd.xlane.f32.xlu1 %v557_v30  ;;  %1170 = vmatpush.bf16.msra.mxu2 %v6041_v8  ;;  %v7011_v8 = vld [vmem:[%s8972_s1] ss:$0 sm:$0xff] }
  0xa3   : > { %v498_v39 = vpop.xlane.xlu2 %497  ;;  %929 = vmatpush.bf16.msra.mxu0 %v6024_v10 }
  0xa4   : > { %v530_v41 = vmul.f32 %v6823_v13, %v498_v39 }
  0xa6   : > { %v6871_v44 = vsub.f32 %v473_v6, %v530_v41  ;;  %v6033_v6 = vld [vmem:[%s8975_s4 + $0x8] sm:$0xff]  ;;  %1171 = vmatpush.bf16.msra.mxu2 %v6040_v12 }
  0xa7   : > { %1057 = vmatpush.bf16.msra.mxu1 %v6033_v6 }
  0xa8   : > { %v562_v45 = vmul.f32 %v6871_v44, %v6871_v44 }
  0xa9   : > { %580 = vadd.xlane.f32.xlu2 %v560_v34  ;;  %501 = vadd.xlane.f32.xlu0 %v6854_v36 }
  0xaa   : > { %576 = vadd.xlane.f32.xlu1 %v558_v37 }
  0xab   : > { %1058 = vmatpush.bf16.msra.mxu1 %v6032_v11 }
  0xb1   : > { %507 = vadd.xlane.f32.xlu2 %v6865_v42  ;;  %582 = vadd.xlane.f32.xlu0 %v561_v40 }
  0xb2   : > { %503 = vadd.xlane.f32.xlu1 %v6868_v43 }
  0xb9   : > { %509 = vadd.xlane.f32.xlu2 %v6877_v46  ;;  %584 = vadd.xlane.f32.xlu0 %v562_v45 }
  0xba   : > { %505 = vadd.xlane.f32.xlu1 %v6880_v47 }
  0xc1   : > { %511 = vadd.xlane.f32.xlu0 %v6885_v48 }
  0xc9   : > { %513 = vadd.xlane.f32.xlu0 %v6889_v49 }
 0x10c   : > { %v573_v4 = vpop.xlane.xlu0 %572 }
 0x10d   : > { %v604_v7 = vmul.f32 %v573_v4, %v6823_v13 }
 0x10f   : > { %v620_v9 = vadd.f32 1e-05, %v604_v7 }
 0x111   : > { %6219 = vrsqrt.f32 %v620_v9  ;;  %vm642_vm2 = vweird.f32 %v620_v9 }
 0x114   : > { %v579_v14 = vpop.xlane.xlu2 %578  ;;  %v500_v15 = vpop.xlane.xlu0 %499 }
 0x115   : > { %v607_v16 = vmul.f32 %v579_v14, %v6823_v13  ;;  %v575_v18 = vpop.xlane.xlu1 %574  ;;  %v531_v19 = vmul.f32 %v6823_v13, %v500_v15  ;;  %v7025_v15 = vld [vmem:[%s6814_s18 + $0x78] sm:$0xff] }
 0x116   : > { %v605_v20 = vmul.f32 %v575_v18, %v6823_v13 }
 0x117   : > { %v6220_v21 = vpop.eup %6219  ;;  %v6968_v22 = vadd.f32 1e-05, %v607_v16  ;;  %v6971_v23 = vsub.f32 %v6839_v28, %v531_v19 }
 0x118   : > { %v637_v26 = vmul.f32 %v6220_v21, %v620_v9  ;;  %v621_v27 = vadd.f32 1e-05, %v605_v20  ;;  %vm643_vm1 = vweird.f32 %v6220_v21 }
 0x119   : > { %6221 = vrsqrt.f32 %v6968_v22  ;;  %v563_v29 = vmul.f32 %v6971_v23, %v6971_v23  ;;  %vm6989_vm3 = vmor %vm642_vm2, %vm643_vm1  ;;  %vm672_vm9 = vweird.f32 %v6968_v22 }
 0x11a   : > { %v638_v30 = vmul.f32 %v6220_v21, %v637_v26  ;;  %6223 = vrsqrt.f32 %v621_v27  ;;  %vm652_vm4 = vweird.f32 %v621_v27 }
 0x11b   : > { %586 = vadd.xlane.f32.xlu1 %v563_v29 }
 0x11c   : > { %v639_v31 = vmul.f32 0.5, %v638_v30  ;;  %v581_v34 = vpop.xlane.xlu2 %580  ;;  %v502_v35 = vpop.xlane.xlu0 %501 }
 0x11d   : > { %v577_v37 = vpop.xlane.xlu1 %576  ;;  %v532_v39 = vmul.f32 %v6823_v13, %v502_v35  ;;  %v608_v52 = vmul.f32 %v581_v34, %v6823_v13 }
 0x11e   : > { %v640_v40 = vsub.f32 1.5, %v639_v31  ;;  %v606_v28 = vmul.f32 %v577_v37, %v6823_v13 }
 0x11f   : > { %v6978_v41 = vpop.eup %6221  ;;  %v6981_v45 = vsub.f32 %v6854_v36, %v532_v39  ;;  %v6997_v59 = vadd.f32 1e-05, %v608_v52 }
 0x120   : > { %v6224_v50 = vpop.eup %6223  ;;  %v641_v51 = vmul.f32 %v6220_v21, %v640_v40  ;;  %v6984_v53 = vadd.f32 1e-05, %v606_v28  ;;  %v667_v54 = vmul.f32 %v6978_v41, %v6968_v22  ;;  %vm673_vm10 = vweird.f32 %v6978_v41 }
 0x121   : > { %v647_v55 = vmul.f32 %v6224_v50, %v621_v27  ;;  %v564_v57 = vmul.f32 %v6981_v45, %v6981_v45  ;;  %vm653_vm5 = vweird.f32 %v6224_v50  ;;  %vm7066_vm12 = vmor %vm672_vm9, %vm673_vm10  ;;  %vm682_vm15 = vweird.f32 %v6997_v59 }
 0x122   : > { %6225 = vrsqrt.f32 %v6984_v53  ;;  %v645_v58 = vsel %vm6989_vm3, %v6220_v21, %v641_v51  ;;  %v668_v62 = vmul.f32 %v6978_v41, %v667_v54  ;;  %vm654_vm6 = vmor %vm652_vm4, %vm653_vm5  ;;  %vm662_vm7 = vweird.f32 %v6984_v53 }
 0x123   : > { %v648_v36 = vmul.f32 %v6224_v50, %v647_v55  ;;  %588 = vadd.xlane.f32.xlu1 %v564_v57  ;;  %v796_v9 = vmul.f32 %v645_v58, %v6826_v17  ;;  %6227 = vrsqrt.f32 %v6997_v59 }
 0x124   : > { %v508_v60 = vpop.xlane.xlu2 %507  ;;  %v583_v61 = vpop.xlane.xlu0 %582  ;;  %v669_v11 = vmul.f32 0.5, %v668_v62 }
 0x125   : > { %v649_v63 = vmul.f32 0.5, %v648_v36  ;;  %v535_v0 = vmul.f32 %v6823_v13, %v508_v60  ;;  %v504_v1 = vpop.xlane.xlu1 %503  ;;  %v609_v2 = vmul.f32 %v583_v61, %v6823_v13  ;;  %v815_v19 = vmul.f32 %v7011_v8, %v796_v9 }
 0x126   : > { %v533_v3 = vmul.f32 %v6823_v13, %v504_v1  ;;  %v670_v27 = vsub.f32 1.5, %v669_v11 }
 0x127   : > { %v650_v4 = vsub.f32 1.5, %v649_v63  ;;  %v7003_v5 = vadd.f32 1e-05, %v609_v2  ;;  %v7006_v6 = vsub.f32 %v6865_v42, %v535_v0 }
 0x128   : > { %v6226_v7 = vpop.eup %6225  ;;  %v7018_v10 = vsub.f32 %v6868_v43, %v533_v3  ;;  %v7032_v43 = vld [vmem:[%s8973_s2] ss:$0 sm:$0xff]  ;;  %v671_v22 = vmul.f32 %v6978_v41, %v670_v27 }
 0x129   : > { %v651_v12 = vmul.f32 %v6224_v50, %v650_v4  ;;  %v657_v42 = vmul.f32 %v6226_v7, %v6984_v53  ;;  %6229 = vrsqrt.f32 %v7003_v5  ;;  %v567_v14 = vmul.f32 %v7006_v6, %v7006_v6  ;;  %v7041_v34 = vpop.eup %6227 }
 0x12a   : > { %v565_v18 = vmul.f32 %v7018_v10, %v7018_v10  ;;  %vm663_vm8 = vweird.f32 %v6226_v7  ;;  %v834_v28 = vadd.f32 %v7032_v43, %v815_v19  ;;  %v677_v54 = vmul.f32 %v7041_v34, %v6997_v59 }
 0x12b   : > { %v655_v17 = vsel %vm654_vm6, %v6224_v50, %v651_v12  ;;  %v658_v16 = vmul.f32 %v6226_v7, %v657_v42  ;;  %594 = vadd.xlane.f32.xlu0 %v567_v14  ;;  %515 = vadd.xlane.f32.xlu1 %v7025_v15  ;;  %vm7055_vm11 = vmor %vm662_vm7, %vm663_vm8  ;;  %v675_v61 = vsel %vm7066_vm12, %v6978_v41, %v671_v22  ;;  %vm692_vm13 = vweird.f32 %v7003_v5 }
 0x12c   : > { %v797_v20 = vmul.f32 %v655_v17, %v6834_v25  ;;  %v510_v21 = vpop.xlane.xlu2 %509  ;;  %v7037_v26 = vpop.xlane.xlu0 %584  ;;  %590 = vadd.xlane.f32.xlu2 %v565_v18  ;;  %v678_v62 = vmul.f32 %v7041_v34, %v677_v54  ;;  %v799_v3 = vmul.f32 %v675_v61, %v6832_v24  ;;  %vm683_vm0 = vweird.f32 %v7041_v34 }
 0x12d   : > { %v659_v29 = vmul.f32 0.5, %v658_v16  ;;  %v536_v30 = vmul.f32 %v6823_v13, %v510_v21  ;;  %v506_v31 = vpop.xlane.xlu1 %505  ;;  %vm684_vm2 = vmor %vm682_vm15, %vm683_vm0 }
 0x12e   : > { %v816_v35 = vmul.f32 %v7011_v8, %v797_v20  ;;  %v534_v25 = vmul.f32 %v6823_v13, %v506_v31  ;;  %v679_v4 = vmul.f32 0.5, %v678_v62  ;;  %v818_v11 = vmul.f32 %v7011_v8, %v799_v3 }
 0x12f   : > { %v6230_v37 = vpop.eup %6229  ;;  %v660_v39 = vsub.f32 1.5, %v659_v29  ;;  %v7048_v40 = vsub.f32 %v6877_v46, %v536_v30 }
 0x130   : > { %v835_v50 = vadd.f32 %v7032_v43, %v816_v35  ;;  %v687_v52 = vmul.f32 %v6230_v37, %v7003_v5  ;;  %v7064_v55 = vsub.f32 %v6880_v47, %v534_v25  ;;  %v680_v42 = vsub.f32 1.5, %v679_v4 }
 0x131   : > { %v661_v46 = vmul.f32 %v6226_v7, %v660_v39  ;;  %v568_v36 = vmul.f32 %v7048_v40, %v7048_v40  ;;  %vm693_vm14 = vweird.f32 %v6230_v37  ;;  %v837_v17 = vadd.f32 %v7032_v43, %v818_v11 }
 0x132   : > { %v7070_v53 = vpack.c.bf16 %v835_v50, %v834_v28  ;;  %v688_v58 = vmul.f32 %v6230_v37, %v687_v52  ;;  %v566_v60 = vmul.f32 %v7064_v55, %v7064_v55  ;;  %vm694_vm1 = vmor %vm692_vm13, %vm693_vm14  ;;  %v681_v16 = vmul.f32 %v7041_v34, %v680_v42 }
 0x133   : > { %v665_v57 = vsel %vm7055_vm11, %v6226_v7, %v661_v46  ;;  %596 = vadd.xlane.f32.xlu1 %v568_v36 }
 0x134   : > { %930 = vmatmul.bf16.vlgmr.msra.gmra.mxu0 %v7070_v53  ;;  %1059 = vmatmul.bf16.vlgmr.msra.gmra.mxu1 %v7070_v53  ;;  %v512_v47 = vpop.xlane.xlu0 %511  ;;  %v798_v0 = vmul.f32 %v665_v57, %v6848_v33  ;;  %v689_v1 = vmul.f32 0.5, %v688_v58 }
 0x135   : > { %592 = vadd.xlane.f32.xlu2 %v566_v60  ;;  %1172 = vmatmul.bf16.vlgmr.msra.gmra.mxu2 %v7070_v53  ;;  %v537_v63 = vmul.f32 %v6823_v13, %v512_v47 }
 0x136   : > { %v817_v7 = vmul.f32 %v7011_v8, %v798_v0  ;;  %v690_v9 = vsub.f32 1.5, %v689_v1 }
 0x137   : > { %v7088_v2 = vsub.f32 %v6885_v48, %v537_v63 }
 0x138   : > { %v836_v48 = vadd.f32 %v7032_v43, %v817_v7  ;;  %v691_v24 = vmul.f32 %v6230_v37, %v690_v9 }
 0x139   : > { %v569_v41 = vmul.f32 %v7088_v2, %v7088_v2 }
 0x13a   : > { %v7107_v18 = vpack.c.bf16 %v837_v17, %v836_v48  ;;  %v695_v19 = vsel %vm694_vm1, %v6230_v37, %v691_v24 }
 0x13b   : > { %v801_v59 = vmul.f32 %v695_v19, %v6859_v38  ;;  %v610_v38 = vmul.f32 %v7037_v26, %v6823_v13 }
 0x13c   : > { %v514_v12 = vpop.xlane.xlu0 %513 }
 0x13d   : > { %598 = vadd.xlane.f32.xlu2 %v569_v41  ;;  %v538_v33 = vmul.f32 %v6823_v13, %v514_v12  ;;  %v820_v21 = vmul.f32 %v7011_v8, %v801_v59 }
 0x13f   : > { %v7101_v14 = vsub.f32 %v6889_v49, %v538_v33  ;;  %v685_v49 = vsel %vm684_vm2, %v7041_v34, %v681_v16  ;;  %v839_v29 = vadd.f32 %v7032_v43, %v820_v21 }
 0x140   : > { %v800_v20 = vmul.f32 %v685_v49, %v6846_v32  ;;  %v626_v32 = vadd.f32 1e-05, %v610_v38 }
 0x141   : > { %v570_v5 = vmul.f32 %v7101_v14, %v7101_v14 }
 0x142   : > { %v819_v27 = vmul.f32 %v7011_v8, %v800_v20  ;;  %6231 = vrsqrt.f32 %v626_v32  ;;  %vm702_vm3 = vweird.f32 %v626_v32 }
 0x143   : > { %600 = vadd.xlane.f32.xlu0 %v570_v5 }
 0x144   : > { %935 = vmatmul.bf16.gmra.mxu0 %v7107_v18  ;;  %1064 = vmatmul.bf16.gmra.mxu1 %v7107_v18  ;;  %v838_v30 = vadd.f32 %v7032_v43, %v819_v27 }
 0x145   : > { %1177 = vmatmul.bf16.gmra.mxu2 %v7107_v18 }
 0x146   : > { %v7119_v31 = vpack.c.bf16 %v839_v29, %v838_v30 }
 0x148   : > { %v6232_v34 = vpop.eup %6231 }
 0x149   : > { %v697_v35 = vmul.f32 %v6232_v34, %v626_v32  ;;  %vm703_vm4 = vweird.f32 %v6232_v34 }
 0x14a   : > { %vm704_vm5 = vmor %vm702_vm3, %vm703_vm4 }
 0x14b   : > { %v698_v25 = vmul.f32 %v6232_v34, %v697_v35 }
 0x14d   : > { %v699_v50 = vmul.f32 0.5, %v698_v25 }
 0x14f   : > { %v700_v51 = vsub.f32 1.5, %v699_v50 }
 0x151   : > { %v701_v46 = vmul.f32 %v6232_v34, %v700_v51 }
 0x153   : > { %v705_v57 = vsel %vm704_vm5, %v6232_v34, %v701_v46 }
 0x154   : > { %940 = vmatmul.bf16.gmra.mxu0 %v7119_v31  ;;  %1069 = vmatmul.bf16.gmra.mxu1 %v7119_v31  ;;  %v802_v0 = vmul.f32 %v705_v57, %v6871_v44 }
 0x155   : > { %1182 = vmatmul.bf16.gmra.mxu2 %v7119_v31 }
 0x156   : > { %v821_v44 = vmul.f32 %v7011_v8, %v802_v0 }
 0x18e   : > { %v587_v37 = vpop.xlane.xlu1 %586 }
 0x18f   : > { %v611_v39 = vmul.f32 %v587_v37, %v6823_v13 }
 0x191   : > { %v627_v28 = vadd.f32 1e-05, %v611_v39 }
 0x193   : > { %6233 = vrsqrt.f32 %v627_v28  ;;  %vm712_vm7 = vweird.f32 %v627_v28 }
 0x196   : > { %v589_v52 = vpop.xlane.xlu1 %588 }
 0x197   : > { %v612_v54 = vmul.f32 %v589_v52, %v6823_v13 }
 0x199   : > { %v6234_v22 = vpop.eup %6233  ;;  %v628_v56 = vadd.f32 1e-05, %v612_v54 }
 0x19a   : > { %v707_v26 = vmul.f32 %v6234_v22, %v627_v28  ;;  %vm713_vm6 = vweird.f32 %v6234_v22 }
 0x19b   : > { %6235 = vrsqrt.f32 %v628_v56  ;;  %vm714_vm8 = vmor %vm712_vm7, %vm713_vm6  ;;  %vm722_vm10 = vweird.f32 %v628_v56 }
 0x19c   : > { %v708_v36 = vmul.f32 %v6234_v22, %v707_v26 }
 0x19e   : > { %v709_v58 = vmul.f32 0.5, %v708_v36  ;;  %v595_v60 = vpop.xlane.xlu0 %594  ;;  %v516_v62 = vpop.xlane.xlu1 %515 }
 0x19f   : > { %v591_v61 = vpop.xlane.xlu2 %590  ;;  %v615_v63 = vmul.f32 %v595_v60, %v6823_v13  ;;  %v539_v3 = vmul.f32 %v6823_v13, %v516_v62 }
 0x1a0   : > { %v710_v47 = vsub.f32 1.5, %v709_v58  ;;  %v613_v1 = vmul.f32 %v591_v61, %v6823_v13 }
 0x1a1   : > { %v7132_v41 = vadd.f32 1e-05, %v615_v63  ;;  %v6236_v7 = vpop.eup %6235  ;;  %v7135_v11 = vsub.f32 %v7025_v15, %v539_v3  ;;  %v840_v15 = vadd.f32 %v7032_v43, %v821_v44 }
 0x1a2   : > { %v711_v4 = vmul.f32 %v6234_v22, %v710_v47  ;;  %v629_v9 = vadd.f32 1e-05, %v613_v1  ;;  %v717_v42 = vmul.f32 %v6236_v7, %v628_v56  ;;  %vm723_vm9 = vweird.f32 %v6236_v7 }
 0x1a3   : > { %6237 = vrsqrt.f32 %v7132_v41  ;;  %v571_v24 = vmul.f32 %v7135_v11, %v7135_v11  ;;  %vm724_vm11 = vmor %vm722_vm10, %vm723_vm9  ;;  %vm752_vm1 = vweird.f32 %v7132_v41 }
 0x1a4   : > { %v715_v12 = vsel %vm714_vm8, %v6234_v22, %v711_v4  ;;  %6239 = vrsqrt.f32 %v629_v9  ;;  %v718_v48 = vmul.f32 %v6236_v7, %v717_v42  ;;  %vm732_vm12 = vweird.f32 %v629_v9 }
 0x1a5   : > { %v803_v33 = vmul.f32 %v715_v12, %v6971_v23  ;;  %602 = vadd.xlane.f32.xlu1 %v571_v24 }
 0x1a6   : > { %v719_v16 = vmul.f32 0.5, %v718_v48  ;;  %v597_v59 = vpop.xlane.xlu1 %596 }
 0x1a7   : > { %v822_v17 = vmul.f32 %v7011_v8, %v803_v33  ;;  %v616_v30 = vmul.f32 %v597_v59, %v6823_v13 }
 0x1a8   : > { %v593_v5 = vpop.xlane.xlu2 %592  ;;  %v720_v23 = vsub.f32 1.5, %v719_v16 }
 0x1a9   : > { %v841_v19 = vadd.f32 %v7032_v43, %v822_v17  ;;  %v614_v49 = vmul.f32 %v593_v5, %v6823_v13  ;;  %v7146_v20 = vpop.eup %6237  ;;  %v7156_v25 = vadd.f32 1e-05, %v616_v30 }
 0x1aa   : > { %v6240_v21 = vpop.eup %6239  ;;  %v721_v38 = vmul.f32 %v6236_v7, %v720_v23  ;;  %v747_v34 = vmul.f32 %v7146_v20, %v7132_v41  ;;  %vm753_vm2 = vweird.f32 %v7146_v20 }
 0x1ab   : > { %v7148_v27 = vpack.c.bf16 %v841_v19, %v840_v15  ;;  %v630_v29 = vadd.f32 1e-05, %v614_v49  ;;  %v727_v32 = vmul.f32 %v6240_v21, %v629_v9  ;;  %vm733_vm13 = vweird.f32 %v6240_v21  ;;  %vm754_vm4 = vmor %vm752_vm1, %vm753_vm2 }
 0x1ac   : > { %v725_v37 = vsel %vm724_vm11, %v6236_v7, %v721_v38  ;;  %v748_v28 = vmul.f32 %v7146_v20, %v747_v34  ;;  %vm734_vm14 = vmor %vm732_vm12, %vm733_vm13  ;;  %vm762_vm7 = vweird.f32 %v7156_v25  ;;  %vm1229_vm1 = vcmask 261120  }
 0x1ad   : > { %6241 = vrsqrt.f32 %v630_v29  ;;  %945 = vmatmul.bf16.gmra.mxu0 %v7148_v27  ;;  %1074 = vmatmul.bf16.gmra.mxu1 %v7148_v27  ;;  %v728_v35 = vmul.f32 %v6240_v21, %v727_v32  ;;  %v804_v54 = vmul.f32 %v725_v37, %v6981_v45  ;;  %vm742_vm15 = vweird.f32 %v630_v29 }
 0x1ae   : > { %1187 = vmatmul.bf16.gmra.mxu2 %v7148_v27  ;;  %6243 = vrsqrt.f32 %v7156_v25  ;;  %v749_v56 = vmul.f32 0.5, %v748_v28 }
 0x1af   : > { %v729_v39 = vmul.f32 0.5, %v728_v35  ;;  %v823_v60 = vmul.f32 %v7011_v8, %v804_v54  ;;  %v6055_v54 = vld [vmem:[%s8974_s3 + $0x68] sm:$0xff] }
 0x1b0   : > { %v599_v50 = vpop.xlane.xlu2 %598  ;;  %v750_v61 = vsub.f32 1.5, %v749_v56  ;;  %v6054_v56 = vld [vmem:[%s8974_s3 + $0x60] sm:$0xff] }
 0x1b1   : > { %v617_v51 = vmul.f32 %v599_v50, %v6823_v13  ;;  %v730_v52 = vsub.f32 1.5, %v729_v39  ;;  %v842_v3 = vadd.f32 %v7032_v43, %v823_v60  ;;  %v6065_v50 = vld [vmem:[%s8975_s4 + $0x78] sm:$0xff] }
 0x1b2   : > { %1743 = vmatpush.bf16.msrb.mxu2 %v6065_v50  ;;  %v6061_v60 = vld [vmem:[%s8975_s4 + $0x58] sm:$0xff] }
 0x1b3   : > { %v6242_v22 = vpop.eup %6241  ;;  %v633_v46 = vadd.f32 1e-05, %v617_v51  ;;  %v731_v26 = vmul.f32 %v6240_v21, %v730_v52  ;;  %v6056_v52 = vld [vmem:[%s8974_s3 + $0x70] sm:$0xff] }
 0x1b4   : > { %v737_v36 = vmul.f32 %v6242_v22, %v630_v29  ;;  %vm743_vm0 = vweird.f32 %v6242_v22  ;;  %v6244_v63 = vpop.eup %6243 }
 0x1b5   : > { %6245 = vrsqrt.f32 %v633_v46  ;;  %v735_v57 = vsel %vm734_vm14, %v6240_v21, %v731_v26  ;;  %vm744_vm3 = vmor %vm742_vm15, %vm743_vm0  ;;  %v757_v9 = vmul.f32 %v6244_v63, %v7156_v25  ;;  %vm772_vm5 = vweird.f32 %v633_v46 }
 0x1b6   : > { %v738_v58 = vmul.f32 %v6242_v22, %v737_v36  ;;  %v805_v47 = vmul.f32 %v735_v57, %v7018_v10  ;;  %v751_v10 = vmul.f32 %v7146_v20, %v750_v61  ;;  %vm763_vm8 = vweird.f32 %v6244_v63  ;;  %v601_v28 = vpop.xlane.xlu0 %600  ;;  %v6062_v36 = vld [vmem:[%s8975_s4 + $0x60] sm:$0xff] }
 0x1b7   : > { %v758_v48 = vmul.f32 %v6244_v63, %v757_v9  ;;  %vm764_vm10 = vmor %vm762_vm7, %vm763_vm8  ;;  %v6050_v9 = vld [vmem:[%s8974_s3 + $0x40] sm:$0xff] }
 0x1b8   : > { %v739_v62 = vmul.f32 0.5, %v738_v58  ;;  %v824_v45 = vmul.f32 %v7011_v8, %v805_v47  ;;  %v755_v33 = vsel %vm754_vm4, %v7146_v20, %v751_v10  ;;  %v6053_v58 = vld [vmem:[%s8974_s3 + $0x58] sm:$0xff] }
 0x1b9   : > { %v807_v16 = vmul.f32 %v755_v33, %v7006_v6  ;;  %v759_v5 = vmul.f32 0.5, %v758_v48 }
 0x1ba   : > { %v740_v0 = vsub.f32 1.5, %v739_v62  ;;  %v843_v4 = vadd.f32 %v7032_v43, %v824_v45  ;;  %v6060_v45 = vld [vmem:[%s8975_s4 + $0x50] sm:$0xff] }
 0x1bb   : > { %v6246_v1 = vpop.eup %6245  ;;  %v826_v49 = vmul.f32 %v7011_v8, %v807_v16  ;;  %v760_v59 = vsub.f32 1.5, %v759_v5  ;;  %v7251_v5 = vpop.f32.mrf.mxu1 }
 0x1bc   : > { %v741_v7 = vmul.f32 %v6242_v22, %v740_v0  ;;  %v767_v12 = vmul.f32 %v6246_v1, %v633_v46  ;;  %v7171_v42 = vpack.c.bf16 %v843_v4, %v842_v3  ;;  %vm773_vm6 = vweird.f32 %v6246_v1  ;;  %v6063_v46 = vld [vmem:[%s8975_s4 + $0x68] sm:$0xff] }
 0x1bd   : > { %vm774_vm9 = vmor %vm772_vm5, %vm773_vm6  ;;  %v761_v21 = vmul.f32 %v6244_v63, %v760_v59  ;;  %v6051_v3 = vld [vmem:[%s8974_s3 + $0x48] sm:$0xff] }
 0x1be   : > { %v745_v44 = vsel %vm744_vm3, %v6242_v22, %v741_v7  ;;  %v768_v41 = vmul.f32 %v6246_v1, %v767_v12  ;;  %950 = vmatmul.bf16.gmra.mxu0 %v7171_v42  ;;  %1079 = vmatmul.bf16.gmra.mxu1 %v7171_v42  ;;  %v6064_v22 = vld [vmem:[%s8975_s4 + $0x70] sm:$0xff]  ;;  %v6059_v4 = vld [vmem:[%s8975_s4 + $0x48] sm:$0xff]  ;;  %v6058_v12 = vld [vmem:[%s8975_s4 + $0x40] sm:$0xff] }
 0x1bf   : > { %1192 = vmatmul.bf16.gmra.mxu2 %v7171_v42  ;;  %v806_v24 = vmul.f32 %v745_v44, %v7064_v55  ;;  %v845_v55 = vadd.f32 %v7032_v43, %v826_v49  ;;  %v765_v30 = vsel %vm764_vm10, %v6244_v63, %v761_v21  ;;  %v6052_v63 = vld [vmem:[%s8974_s3 + $0x50] sm:$0xff] }
 0x1c0   : > { %v769_v17 = vmul.f32 0.5, %v768_v41  ;;  %v808_v32 = vmul.f32 %v765_v30, %v7048_v40  ;;  %v6057_v40 = vld [vmem:[%s8974_s3 + $0x78] sm:$0xff]  ;;  %1744 = vmatpush.bf16.msrb.mxu2 %v6064_v22 }
 0x1c1   : > { %v825_v15 = vmul.f32 %v7011_v8, %v806_v24  ;;  %1613 = vmatpush.bf16.msrb.mxu1 %v6057_v40 }
 0x1c2   : > { %v770_v19 = vsub.f32 1.5, %v769_v17  ;;  %v827_v35 = vmul.f32 %v7011_v8, %v808_v32 }
 0x1c3   : > { %v844_v23 = vadd.f32 %v7032_v43, %v825_v15 }
 0x1c4   : > { %v771_v20 = vmul.f32 %v6246_v1, %v770_v19  ;;  %v846_v37 = vadd.f32 %v7032_v43, %v827_v35  ;;  %1745 = vmatpush.bf16.msrb.mxu2 %v6063_v46 }
 0x1c5   : > { %v7184_v6 = vpack.c.bf16 %v845_v55, %v844_v23  ;;  %1614 = vmatpush.bf16.msrb.mxu1 %v6056_v52 }
 0x1c6   : > { %v775_v29 = vsel %vm774_vm9, %v6246_v1, %v771_v20  ;;  %v7256_v20 = vpop.f32.mrf.mxu2 }
 0x1c7   : > { %v809_v38 = vmul.f32 %v775_v29, %v7088_v2  ;;  %v618_v2 = vmul.f32 %v601_v28, %v6823_v13 }
 0x1c8   : > { %1746 = vmatpush.bf16.msrb.mxu2 %v6062_v36 }
 0x1c9   : > { %v828_v34 = vmul.f32 %v7011_v8, %v809_v38  ;;  %v634_v51 = vadd.f32 1e-05, %v618_v2  ;;  %1615 = vmatpush.bf16.msrb.mxu1 %v6055_v54 }
 0x1cb   : > { %v847_v25 = vadd.f32 %v7032_v43, %v828_v34  ;;  %6247 = vrsqrt.f32 %v634_v51  ;;  %vm782_vm11 = vweird.f32 %v634_v51 }
 0x1cc   : > { %1747 = vmatpush.bf16.msrb.mxu2 %v6061_v60 }
 0x1cd   : > { %v7195_v39 = vpack.c.bf16 %v847_v25, %v846_v37  ;;  %1616 = vmatpush.bf16.msrb.mxu1 %v6054_v56 }
 0x1ce   : > { %955 = vmatmul.bf16.gmra.mxu0 %v7184_v6  ;;  %1084 = vmatmul.bf16.gmra.mxu1 %v7184_v6  ;;  %v7267_v30 = vpop.f32.mrf.mxu2 }
 0x1cf   : > { %1197 = vmatmul.bf16.gmra.mxu2 %v7184_v6 }
 0x1d0   : > { %1748 = vmatpush.bf16.msrb.mxu2 %v6060_v45 }
 0x1d1   : > { %v6248_v26 = vpop.eup %6247  ;;  %1617 = vmatpush.bf16.msrb.mxu1 %v6053_v58 }
 0x1d2   : > { %v777_v57 = vmul.f32 %v6248_v26, %v634_v51  ;;  %vm783_vm12 = vweird.f32 %v6248_v26 }
 0x1d3   : > { %vm784_vm13 = vmor %vm782_vm11, %vm783_vm12 }
 0x1d4   : > { %v778_v47 = vmul.f32 %v6248_v26, %v777_v57  ;;  %1749 = vmatpush.bf16.msrb.mxu2 %v6059_v4 }
 0x1d5   : > { %1618 = vmatpush.bf16.msrb.mxu1 %v6052_v63 }
 0x1d6   : > { %v779_v1 = vmul.f32 0.5, %v778_v47 }
 0x1d8   : > { %v780_v10 = vsub.f32 1.5, %v779_v1  ;;  %1750 = vmatpush.bf16.msrb.mxu2 %v6058_v12 }
 0x1d9   : > { %1619 = vmatpush.bf16.msrb.mxu1 %v6051_v3 }
 0x1da   : > { %v781_v44 = vmul.f32 %v6248_v26, %v780_v10 }
 0x1dc   : > { %v785_v48 = vsel %vm784_vm13, %v6248_v26, %v781_v44 }
 0x1dd   : > { %1620 = vmatpush.bf16.msrb.mxu1 %v6050_v9  ;;  %v810_v16 = vmul.f32 %v785_v48, %v7101_v14  ;;  %v7262_v14 = vpop.f32.mrf.mxu1 }
 0x1de   : > { %960 = vmatmul.bf16.gmra.mxu0 %v7195_v39  ;;  %1089 = vmatmul.bf16.gmra.mxu1 %v7195_v39 }
 0x1df   : > { %1202 = vmatmul.bf16.gmra.mxu2 %v7195_v39  ;;  %v829_v49 = vmul.f32 %v7011_v8, %v810_v16 }
 0x1e1   : > { %v848_v55 = vadd.f32 %v7032_v43, %v829_v49 }
 0x218   : > { %v603_v61 = vpop.xlane.xlu1 %602 }
 0x219   : > { %v619_v62 = vmul.f32 %v603_v61, %v6823_v13 }
 0x21b   : > { %v635_v0 = vadd.f32 1e-05, %v619_v62 }
 0x21d   : > { %6249 = vrsqrt.f32 %v635_v0  ;;  %vm792_vm15 = vweird.f32 %v635_v0 }
 0x223   : > { %v6250_v7 = vpop.eup %6249 }
 0x224   : > { %v787_v41 = vmul.f32 %v6250_v7, %v635_v0  ;;  %vm793_vm14 = vweird.f32 %v6250_v7 }
 0x225   : > { %vm794_vm0 = vmor %vm792_vm15, %vm793_vm14 }
 0x226   : > { %v788_v33 = vmul.f32 %v6250_v7, %v787_v41 }
 0x228   : > { %v789_v24 = vmul.f32 0.5, %v788_v33 }
 0x22a   : > { %v790_v17 = vsub.f32 1.5, %v789_v24  ;;  %v931_v24 = vpop.f32.mrf.mxu0 }
 0x22c   : > { %v791_v15 = vmul.f32 %v6250_v7, %v790_v17 }
 0x22e   : > { %v795_v19 = vsel %vm794_vm0, %v6250_v7, %v791_v15 }
 0x22f   : > { %v811_v59 = vmul.f32 %v795_v19, %v7135_v11  ;;  %v7269_v11 = vpop.f32.mrf.mxu1 }
 0x231   : > { %v830_v23 = vmul.f32 %v7011_v8, %v811_v59  ;;  %v7271_v8 = vpop.f32.mrf.mxu2 }
 0x233   : > { %v849_v21 = vadd.f32 %v7032_v43, %v830_v23  ;;  %v933_v23 = vpop.f32.mrf.mxu0 }
 0x235   : > { %v7260_v29 = vpack.c.bf16 %v849_v21, %v848_v55  ;;  %v1447_v21 = vpack.c.bf16 %v7267_v30, %v7256_v20  ;;  %v1221_v20 = vpack.c.bf16 %v7262_v14, %v7251_v5 }
 0x237   : > { %965 = vmatmul.bf16.gmra.mxu0 %v7260_v29  ;;  %1094 = vmatmul.bf16.gmra.mxu1 %v7260_v29  ;;  %v7275_v43 = vpop.f32.mrf.mxu1 }
 0x238   : > { %1207 = vmatmul.bf16.gmra.mxu2 %v7260_v29 }
 0x239   : > { %v7277_v38 = vpop.f32.mrf.mxu2 }
 0x23a   : > { %v1448_v59 = vpack.c.bf16 %v7277_v38, %v7271_v8  ;;  %v1222_v8 = vpack.c.bf16 %v7275_v43, %v7269_v11 }
 0x23f   : > { %v7279_v32 = vpop.f32.mrf.mxu1 }
 0x241   : > { %v1183_v34 = vpop.f32.mrf.mxu2 }
 0x247   : > { %1621 = vmatmul.bf16.vlgmr.msrb.gmra.mxu1 %v7070_v53  ;;  %v7283_v35 = vpop.f32.mrf.mxu1 }
 0x248   : > { %1751 = vmatmul.bf16.vlgmr.msrb.gmra.mxu2 %v7070_v53 }
 0x249   : > { %v1185_v25 = vpop.f32.mrf.mxu2 }
 0x24a   : > { %v1449_v15 = vpack.c.bf16 %v1185_v25, %v1183_v34  ;;  %v1223_v34 = vpack.c.bf16 %v7283_v35, %v7279_v32  ;;  %v1255_v32 = vsel %vm1229_vm1, %v1221_v20, 0  ;;  %v972_v35 = vmul.f32 0.17677669, %v933_v23 }
 0x24f   : > { %v7285_v37 = vpop.f32.mrf.mxu1 }
 0x251   : > { %v1188_v28 = vpop.f32.mrf.mxu2 }
 0x257   : > { %1626 = vmatmul.bf16.gmra.mxu1 %v7107_v18  ;;  %v1077_v2 = vpop.f32.mrf.mxu1 }
 0x258   : > { %1756 = vmatmul.bf16.gmra.mxu2 %v7107_v18  ;;  %v1224_v19 = vpack.c.bf16 %v1077_v2, %v7285_v37  ;;  %v1261_v37 = vsel %vm1229_vm1, %v1223_v34, 0  ;;  %v1258_v2 = vsel %vm1229_vm1, %v1222_v8, 0 }
 0x259   : > { %v1190_v40 = vpop.f32.mrf.mxu2 }
 0x25a   : > { %v1450_v17 = vpack.c.bf16 %v1190_v40, %v1188_v28  ;;  %v1264_v55 = vsel %vm1229_vm1, %v1224_v19, 0  ;;  %v936_v28 = vpop.f32.mrf.mxu0 }
 0x25f   : > { %v1080_v50 = vpop.f32.mrf.mxu1 }
 0x261   : > { %v1193_v51 = vpop.f32.mrf.mxu2 }
 0x262   : > { %v938_v40 = vpop.f32.mrf.mxu0 }
 0x267   : > { %1631 = vmatmul.bf16.gmra.mxu1 %v7119_v31  ;;  %v1082_v52 = vpop.f32.mrf.mxu1 }
 0x268   : > { %1761 = vmatmul.bf16.gmra.mxu2 %v7119_v31  ;;  %v1225_v33 = vpack.c.bf16 %v1082_v52, %v1080_v50  ;;  %v971_v50 = vmul.f32 0.17677669, %v931_v24 }
 0x269   : > { %v1195_v22 = vpop.f32.mrf.mxu2 }
 0x26a   : > { %v1451_v41 = vpack.c.bf16 %v1195_v22, %v1193_v51  ;;  %v1267_v16 = vsel %vm1229_vm1, %v1225_v33, 0  ;;  %v941_v52 = vpop.f32.mrf.mxu0  ;;  %v1213_v11 = vpack.c.bf16 %v972_v35, %v971_v50  ;;  %v6073_v33 = vld [vmem:[%s8976_s5 + $0x78] sm:$0xff]  ;;  %v6067_v50 = vld [vmem:[%s8976_s5 + $0x48] sm:$0xff] }
 0x26f   : > { %v1085_v54 = vpop.f32.mrf.mxu1 }
 0x271   : > { %v1198_v46 = vpop.f32.mrf.mxu2 }
 0x272   : > { %v943_v22 = vpop.f32.mrf.mxu0 }
 0x277   : > { %1636 = vmatmul.bf16.gmra.mxu1 %v7148_v27  ;;  %v1087_v26 = vpop.f32.mrf.mxu1 }
 0x278   : > { %1766 = vmatmul.bf16.gmra.mxu2 %v7148_v27  ;;  %v1226_v7 = vpack.c.bf16 %v1087_v26, %v1085_v54  ;;  %v974_v54 = vmul.f32 0.17677669, %v938_v40  ;;  %v6068_v40 = vld [vmem:[%s8976_s5 + $0x50] sm:$0xff] }
 0x279   : > { %v1200_v56 = vpop.f32.mrf.mxu2 }
 0x27a   : > { %v1452_v12 = vpack.c.bf16 %v1200_v56, %v1198_v46  ;;  %v1270_v44 = vsel %vm1229_vm1, %v1226_v7, 0  ;;  %v973_v46 = vmul.f32 0.17677669, %v936_v28  ;;  %v946_v14 = vpop.f32.mrf.mxu0 }
 0x27c   : > { %v1214_v5 = vpack.c.bf16 %v974_v54, %v973_v46 }
 0x27f   : > { %v1090_v36 = vpop.f32.mrf.mxu1 }
 0x281   : > { %v1203_v57 = vpop.f32.mrf.mxu2 }
 0x287   : > { %1641 = vmatmul.bf16.gmra.mxu1 %v7171_v42  ;;  %v1092_v58 = vpop.f32.mrf.mxu1 }
 0x288   : > { %1771 = vmatmul.bf16.gmra.mxu2 %v7171_v42  ;;  %v1227_v0 = vpack.c.bf16 %v1092_v58, %v1090_v36  ;;  %v948_v36 = vpop.f32.mrf.mxu0  ;;  %v975_v58 = vmul.f32 0.17677669, %v941_v52 }
 0x289   : > { %v1205_v60 = vpop.f32.mrf.mxu2 }
 0x28a   : > { %v1273_v4 = vsel %vm1229_vm1, %v1227_v0, 0  ;;  %v1453_v10 = vpack.c.bf16 %v1205_v60, %v1203_v57  ;;  %v976_v57 = vmul.f32 0.17677669, %v943_v22 }
 0x297   : > { %1646 = vmatmul.bf16.gmra.mxu1 %v7184_v6 }
 0x298   : > { %1776 = vmatmul.bf16.gmra.mxu2 %v7184_v6 }
 0x2a7   : > { %1651 = vmatmul.bf16.gmra.mxu1 %v7195_v39 }
 0x2a8   : > { %1781 = vmatmul.bf16.gmra.mxu2 %v7195_v39 }
 0x2b4   : > { %v1095_v47 = vpop.f32.mrf.mxu1 }
 0x2b7   : > { %1656 = vmatmul.bf16.gmra.mxu1 %v7260_v29 }
 0x2b8   : > { %1786 = vmatmul.bf16.gmra.mxu2 %v7260_v29 }
 0x2bb   : > { %v1208_v61 = vpop.f32.mrf.mxu2 }
 0x2bc   : > { %v1097_v62 = vpop.f32.mrf.mxu1 }
 0x2bd   : > { %v1228_v63 = vpack.c.bf16 %v1097_v62, %v1095_v47  ;;  %v1215_v47 = vpack.c.bf16 %v976_v57, %v975_v58 }
 0x2bf   : > { %v1276_v45 = vsel %vm1229_vm1, %v1228_v63, 0  ;;  %v978_v63 = vmul.f32 0.17677669, %v948_v36 }
 0x2c0   : > { %1278 = vmatpush.bf16.xpose.msra.mxu3 %v1276_v45  ;;  %v977_v45 = vmul.f32 0.17677669, %v946_v14 }
 0x2c3   : > { %v1210_v1 = vpop.f32.mrf.mxu2 }
 0x2c4   : > { %v1454_v3 = vpack.c.bf16 %v1210_v1, %v1208_v61  ;;  %v951_v61 = vpop.f32.mrf.mxu0 }
 0x2c6   : > { %1455 = vmatpush.bf16.msrb.mxu0 %v1454_v3  ;;  %v1216_v3 = vpack.c.bf16 %v978_v63, %v977_v45 }
 0x2c8   : > { %1279 = vmatpush.bf16.xpose.msra.mxu3 %v1273_v4 }
 0x2ca   : > { %1456 = vmatpush.bf16.msrb.mxu0 %v1453_v10 }
 0x2cb   : > { %v7301_v9 = vpop.f32.mrf.mxu2 }
 0x2cc   : > { %v953_v1 = vpop.f32.mrf.mxu0 }
 0x2cd   : > { %v980_v7 = vmul.f32 0.17677669, %v953_v1 }
 0x2ce   : > { %1457 = vmatpush.bf16.msrb.mxu0 %v1452_v12  ;;  %v979_v12 = vmul.f32 0.17677669, %v951_v61 }
 0x2d0   : > { %1280 = vmatpush.bf16.xpose.msra.mxu3 %v1270_v44 }
 0x2d2   : > { %1458 = vmatpush.bf16.msrb.mxu0 %v1451_v41  ;;  %v1217_v41 = vpack.c.bf16 %v980_v7, %v979_v12 }
 0x2d3   : > { %v7304_v48 = vpop.f32.mrf.mxu2 }
 0x2d4   : > { %v956_v10 = vpop.f32.mrf.mxu0 }
 0x2d6   : > { %1459 = vmatpush.bf16.msrb.mxu0 %v1450_v17  ;;  %v6072_v17 = vld [vmem:[%s8976_s5 + $0x70] sm:$0xff] }
 0x2d8   : > { %1281 = vmatpush.bf16.xpose.msra.mxu3 %v1267_v16 }
 0x2da   : > { %1460 = vmatpush.bf16.msrb.mxu0 %v1449_v15 }
 0x2db   : > { %v7308_v49 = vpop.f32.mrf.mxu2 }
 0x2dc   : > { %v958_v24 = vpop.f32.mrf.mxu0 }
 0x2dd   : > { %v982_v23 = vmul.f32 0.17677669, %v958_v24 }
 0x2de   : > { %1461 = vmatpush.bf16.msrb.mxu0 %v1448_v59  ;;  %v6071_v59 = vld [vmem:[%s8976_s5 + $0x68] sm:$0xff] }
 0x2e0   : > { %1282 = vmatpush.bf16.xpose.msra.mxu3 %v1264_v55  ;;  %v6070_v55 = vld [vmem:[%s8976_s5 + $0x60] sm:$0xff] }
 0x2e2   : > { %1462 = vmatpush.bf16.msrb.mxu0 %v1447_v21 }
 0x2e3   : > { %v7317_v25 = vpop.f32.mrf.mxu2 }
 0x2e4   : > { %v961_v21 = vpop.f32.mrf.mxu0 }
 0x2e5   : > { %v983_v54 = vmul.f32 0.17677669, %v961_v21 }
 0x2e8   : > { %1283 = vmatpush.bf16.xpose.msra.mxu3 %v1261_v37  ;;  %v981_v37 = vmul.f32 0.17677669, %v956_v10 }
 0x2ea   : > { %v1218_v28 = vpack.c.bf16 %v982_v23, %v981_v37 }
 0x2eb   : > { %v7322_v38 = vpop.f32.mrf.mxu2 }
 0x2f0   : > { %1284 = vmatpush.bf16.xpose.msra.mxu3 %v1258_v2  ;;  %v6069_v2 = vld [vmem:[%s8976_s5 + $0x58] sm:$0xff] }
 0x2f3   : > { %v7327_v30 = vpop.f32.mrf.mxu2 }
 0x2f8   : > { %1285 = vmatpush.bf16.xpose.msra.mxu3 %v1255_v32  ;;  %v963_v32 = vpop.f32.mrf.mxu0 }
 0x2f9   : > { %v984_v52 = vmul.f32 0.17677669, %v963_v32 }
 0x2fb   : > { %v7330_v51 = vpop.f32.mrf.mxu2 }
 0x2ff   : > { %5350 = vmatmul.msk.bf16.vlgmr.msra.gmra.mxu3 %vm1229_vm1, %v1213_v11  ;;  %v6066_v11 = vld [vmem:[%s8976_s5 + $0x40] sm:$0xff] }
 0x300   : > { %1857 = vmatpush.bf16.msrb.mxu3 %v6073_v33  ;;  %v966_v46 = vpop.f32.mrf.mxu0 }
 0x303   : > { %v7333_v43 = vpop.f32.mrf.mxu2 }
 0x304   : > { %1858 = vmatpush.bf16.msrb.mxu3 %v6072_v17  ;;  %v1917_v36 = vpack.c.bf16 %v7333_v43, %v7330_v51  ;;  %v1914_v43 = vpack.c.bf16 %v7304_v48, %v7301_v9 }
 0x306   : > { %v1956_v58 = vsel %vm1229_vm1, %v1917_v36, 0  ;;  %v1947_v63 = vsel %vm1229_vm1, %v1914_v43, 0 }
 0x308   : > { %1859 = vmatpush.bf16.msrb.mxu3 %v6071_v59  ;;  %v968_v57 = vpop.f32.mrf.mxu0 }
 0x30b   : > { %v7335_v26 = vpop.f32.mrf.mxu2 }
 0x30c   : > { %1860 = vmatpush.bf16.msrb.mxu3 %v6070_v55 }
 0x30f   : > { %5351 = vmatmul.msk.bf16.gmra.mxu3 %vm1229_vm1, %v1214_v5  ;;  %v1219_v5 = vpack.c.bf16 %v984_v52, %v983_v54 }
 0x310   : > { %1861 = vmatpush.bf16.msrb.mxu3 %v6069_v2 }
 0x313   : > { %v1774_v56 = vpop.f32.mrf.mxu2 }
 0x314   : > { %1862 = vmatpush.bf16.msrb.mxu3 %v6068_v40  ;;  %v1918_v22 = vpack.c.bf16 %v1774_v56, %v7335_v26  ;;  %v1916_v26 = vpack.c.bf16 %v7327_v30, %v7322_v38  ;;  %v985_v56 = vmul.f32 0.17677669, %v966_v46 }
 0x316   : > { %v1959_v14 = vsel %vm1229_vm1, %v1918_v22, 0  ;;  %v1953_v61 = vsel %vm1229_vm1, %v1916_v26, 0 }
 0x318   : > { %1863 = vmatpush.bf16.msrb.mxu3 %v6067_v50 }
 0x31b   : > { %v1777_v60 = vpop.f32.mrf.mxu2 }
 0x31c   : > { %1864 = vmatpush.bf16.msrb.mxu3 %v6066_v11 }
 0x31f   : > { %5352 = vmatmul.msk.bf16.gmra.mxu3 %vm1229_vm1, %v1215_v47 }
 0x323   : > { %v1779_v62 = vpop.f32.mrf.mxu2 }
 0x324   : > { %v1919_v20 = vpack.c.bf16 %v1779_v62, %v1777_v60  ;;  %v986_v60 = vmul.f32 0.17677669, %v968_v57  ;;  %v1915_v62 = vpack.c.bf16 %v7317_v25, %v7308_v49 }
 0x326   : > { %v1962_v35 = vsel %vm1229_vm1, %v1919_v20, 0  ;;  %v1220_v47 = vpack.c.bf16 %v986_v60, %v985_v56  ;;  %v1950_v51 = vsel %vm1229_vm1, %v1915_v62, 0 }
 0x32b   : > { %v1782_v0 = vpop.f32.mrf.mxu2 }
 0x32f   : > { %5353 = vmatmul.msk.bf16.gmra.mxu3 %vm1229_vm1, %v1216_v3 }
 0x333   : > { %v1784_v4 = vpop.f32.mrf.mxu2 }
 0x334   : > { %v1920_v34 = vpack.c.bf16 %v1784_v4, %v1782_v0 }
 0x336   : > { %v1965_v8 = vsel %vm1229_vm1, %v1920_v34, 0 }
 0x33b   : > { %v1787_v44 = vpop.f32.mrf.mxu2 }
 0x33f   : > { %5354 = vmatmul.msk.bf16.gmra.mxu3 %vm1229_vm1, %v1217_v41 }
 0x343   : > { %v1789_v16 = vpop.f32.mrf.mxu2 }
 0x344   : > { %v1921_v15 = vpack.c.bf16 %v1789_v16, %v1787_v44 }
 0x346   : > { %v1968_v19 = vsel %vm1229_vm1, %v1921_v15, 0 }
 0x347   : > { %1970 = vmatpush.bf16.xpose.msra.mxu0 %v1968_v19 }
 0x34f   : > { %1971 = vmatpush.bf16.xpose.msra.mxu0 %v1965_v8  ;;  %5355 = vmatmul.msk.bf16.gmra.mxu3 %vm1229_vm1, %v1218_v28 }
 0x357   : > { %1972 = vmatpush.bf16.xpose.msra.mxu0 %v1962_v35 }
 0x35f   : > { %1973 = vmatpush.bf16.xpose.msra.mxu0 %v1959_v14  ;;  %5356 = vmatmul.msk.bf16.gmra.mxu3 %vm1229_vm1, %v1219_v5 }
 0x367   : > { %1974 = vmatpush.bf16.xpose.msra.mxu0 %v1956_v58 }
 0x36f   : > { %1975 = vmatpush.bf16.xpose.msra.mxu0 %v1953_v61  ;;  %5357 = vmatmul.msk.bf16.gmra.mxu3 %vm1229_vm1, %v1220_v47 }
 0x377   : > { %1976 = vmatpush.bf16.xpose.msra.mxu0 %v1950_v51 }
 0x37f   : > { %1977 = vmatpush.bf16.xpose.msra.mxu0 %v1947_v63  ;;  %1865 = vmatmul.bf16.vlgmr.msrb.gmra.mxu3 %v7070_v53 }
 0x382   : > { %v1287_v38 = vpop.f32.mrf.mxu3 }
 0x383   : > { %1327 = vmax.xlane.f32.xlu2 %v1287_v38 }
 0x38a   : > { %v1289_v30 = vpop.f32.mrf.mxu3 }
 0x38b   : > { %1329 = vmax.xlane.f32.xlu0 %v1289_v30 }
 0x38f   : > { %1870 = vmatmul.bf16.gmra.mxu3 %v7107_v18 }
 0x392   : > { %v1292_v45 = vpop.f32.mrf.mxu3 }
 0x393   : > { %1331 = vmax.xlane.f32.xlu1 %v1292_v45 }
 0x39a   : > { %v1294_v49 = vpop.f32.mrf.mxu3 }
 0x39b   : > { %1333 = vmax.xlane.f32.xlu2 %v1294_v49 }
 0x39f   : > { %1875 = vmatmul.bf16.gmra.mxu3 %v7119_v31 }
 0x3a2   : > { %v1297_v25 = vpop.f32.mrf.mxu3 }
 0x3a3   : > { %1335 = vmax.xlane.f32.xlu0 %v1297_v25 }
 0x3aa   : > { %v1299_v9 = vpop.f32.mrf.mxu3 }
 0x3ab   : > { %1337 = vmax.xlane.f32.xlu1 %v1299_v9 }
 0x3af   : > { %1880 = vmatmul.bf16.gmra.mxu3 %v7148_v27 }
 0x3b2   : > { %v7389_v48 = vpop.f32.mrf.mxu3 }
 0x3b3   : > { %1339 = vmax.xlane.f32.xlu2 %v7389_v48 }
 0x3ba   : > { %v7392_v0 = vpop.f32.mrf.mxu3 }
 0x3bb   : > { %1341 = vmax.xlane.f32.xlu0 %v7392_v0 }
 0x3bf   : > { %1885 = vmatmul.bf16.gmra.mxu3 %v7171_v42 }
 0x3c2   : > { %v7396_v1 = vpop.f32.mrf.mxu3 }
 0x3c3   : > { %1343 = vmax.xlane.f32.xlu1 %v7396_v1 }
 0x3ca   : > { %v7399_v3 = vpop.f32.mrf.mxu3 }
 0x3cb   : > { %1345 = vmax.xlane.f32.xlu2 %v7399_v3 }
 0x3cf   : > { %1890 = vmatmul.bf16.gmra.mxu3 %v7184_v6 }
 0x3d2   : > { %v7403_v4 = vpop.f32.mrf.mxu3 }
 0x3d3   : > { %1347 = vmax.xlane.f32.xlu0 %v7403_v4 }
 0x3da   : > { %v7406_v10 = vpop.f32.mrf.mxu3 }
 0x3db   : > { %1349 = vmax.xlane.f32.xlu1 %v7406_v10 }
 0x3df   : > { %1895 = vmatmul.bf16.gmra.mxu3 %v7195_v39 }
 0x3e2   : > { %v7410_v7 = vpop.f32.mrf.mxu3 }
 0x3e3   : > { %1351 = vmax.xlane.f32.xlu2 %v7410_v7 }
 0x3ea   : > { %v7413_v12 = vpop.f32.mrf.mxu3 }
 0x3eb   : > { %1353 = vmax.xlane.f32.xlu0 %v7413_v12 }
 0x3ef   : > { %1900 = vmatmul.bf16.gmra.mxu3 %v7260_v29 }
 0x3f2   : > { %v7417_v44 = vpop.f32.mrf.mxu3 }
 0x3f3   : > { %1355 = vmax.xlane.f32.xlu1 %v7417_v44 }
 0x3f6   : > { %v1328_v41 = vpop.xlane.xlu2 %1327 }
 0x3f7   : > { %v1359_v33 = vsub.f32 %v1287_v38, %v1328_v41 }
 0x3f9   : > { %v1375_v17 = vmul.f32 1.442695, %v1359_v33 }
 0x3fa   : > { %v7420_v24 = vpop.f32.mrf.mxu3 }
 0x3fb   : > { %1357 = vmax.xlane.f32.xlu2 %v7420_v24  ;;  %6251 = vpow2.f32 %v1375_v17 }
 0x3fe   : > { %v1330_v16 = vpop.xlane.xlu0 %1329 }
 0x3ff   : > { %v1360_v15 = vsub.f32 %v1289_v30, %v1330_v16 }
 0x401   : > { %v1377_v19 = vmul.f32 1.442695, %v1360_v15  ;;  %v7425_v55 = vpop.eup %6251 }
 0x402   : > { %v7423_v59 = vpop.f32.mrf.mxu3 }
 0x403   : > { %6253 = vpow2.f32 %v1377_v19 }
 0x406   : > { %v1332_v23 = vpop.xlane.xlu1 %1331 }
 0x407   : > { %v1361_v34 = vsub.f32 %v1292_v45, %v1332_v23 }
 0x409   : > { %v7427_v21 = vpop.eup %6253  ;;  %v1379_v8 = vmul.f32 1.442695, %v1361_v34 }
 0x40a   : > { %v7429_v37 = vpop.f32.mrf.mxu3  ;;  %v1439_v28 = vpack.c.bf16 %v7427_v21, %v7425_v55 }
 0x40b   : > { %6255 = vpow2.f32 %v1379_v8 }
 0x40c   : > { %1463 = vmatmul.bf16.vlgmr.msrb.gmra.mxu0 %v1439_v28 }
 0x40e   : > { %v1334_v2 = vpop.xlane.xlu2 %1333 }
 0x40f   : > { %v1362_v40 = vsub.f32 %v1294_v49, %v1334_v2 }
 0x411   : > { %v1381_v20 = vmul.f32 1.442695, %v1362_v40  ;;  %v7435_v50 = vpop.eup %6255 }
 0x412   : > { %v7433_v32 = vpop.f32.mrf.mxu3 }
 0x413   : > { %6257 = vpow2.f32 %v1381_v20 }
 0x416   : > { %v1336_v35 = vpop.xlane.xlu0 %1335 }
 0x417   : > { %v1363_v11 = vsub.f32 %v1297_v25, %v1336_v35 }
 0x419   : > { %v7437_v52 = vpop.eup %6257  ;;  %v1383_v46 = vmul.f32 1.442695, %v1363_v11 }
 0x41a   : > { %v7439_v22 = vpop.f32.mrf.mxu3  ;;  %v1440_v54 = vpack.c.bf16 %v7437_v52, %v7435_v50 }
 0x41b   : > { %6259 = vpow2.f32 %v1383_v46 }
 0x41c   : > { %1468 = vmatmul.bf16.gmra.mxu0 %v1440_v54 }
 0x41e   : > { %v1338_v5 = vpop.xlane.xlu1 %1337 }
 0x41f   : > { %v1364_v14 = vsub.f32 %v1299_v9, %v1338_v5 }
 0x421   : > { %v1385_v36 = vmul.f32 1.442695, %v1364_v14  ;;  %v7445_v60 = vpop.eup %6259  ;;  %v1622_v14 = vpop.f32.mrf.mxu1 }
 0x422   : > { %v7443_v57 = vpop.f32.mrf.mxu3 }
 0x423   : > { %6261 = vpow2.f32 %v1385_v36 }
 0x426   : > { %v1340_v58 = vpop.xlane.xlu2 %1339 }
 0x427   : > { %v1365_v56 = vsub.f32 %v7389_v48, %v1340_v58 }
 0x429   : > { %v7447_v26 = vpop.eup %6261  ;;  %v1387_v62 = vmul.f32 1.442695, %v1365_v56 }
 0x42a   : > { %v7450_v47 = vpop.f32.mrf.mxu3  ;;  %v1441_v61 = vpack.c.bf16 %v7447_v26, %v7445_v60 }
 0x42b   : > { %6263 = vpow2.f32 %v1387_v62  ;;  %v1624_v62 = vpop.f32.mrf.mxu1 }
 0x42c   : > { %1473 = vmatmul.bf16.gmra.mxu0 %v1441_v61 }
 0x42e   : > { %v1342_v51 = vpop.xlane.xlu0 %1341 }
 0x42f   : > { %v1366_v43 = vsub.f32 %v7392_v0, %v1342_v51 }
 0x431   : > { %v1389_v63 = vmul.f32 1.442695, %v1366_v43  ;;  %v7457_v45 = vpop.eup %6263 }
 0x432   : > { %v7455_v38 = vpop.f32.mrf.mxu3 }
 0x433   : > { %6265 = vpow2.f32 %v1389_v63 }
 0x436   : > { %v1344_v30 = vpop.xlane.xlu1 %1343 }
 0x437   : > { %v1367_v25 = vsub.f32 %v7396_v1, %v1344_v30 }
 0x439   : > { %v7459_v49 = vpop.eup %6265  ;;  %v1391_v41 = vmul.f32 1.442695, %v1367_v25 }
 0x43a   : > { %v7462_v9 = vpop.f32.mrf.mxu3  ;;  %v1442_v48 = vpack.c.bf16 %v7459_v49, %v7457_v45 }
 0x43b   : > { %6267 = vpow2.f32 %v1391_v41 }
 0x43c   : > { %1478 = vmatmul.bf16.gmra.mxu0 %v1442_v48 }
 0x43e   : > { %v1346_v0 = vpop.xlane.xlu2 %1345 }
 0x43f   : > { %v1368_v33 = vsub.f32 %v7399_v3, %v1346_v0  ;;  %v1627_v0 = vpop.f32.mrf.mxu1 }
 0x441   : > { %v1393_v17 = vmul.f32 1.442695, %v1368_v33  ;;  %v7469_v19 = vpop.eup %6267 }
 0x442   : > { %v7467_v16 = vpop.f32.mrf.mxu3 }
 0x443   : > { %6269 = vpow2.f32 %v1393_v17 }
 0x446   : > { %v1348_v15 = vpop.xlane.xlu0 %1347 }
 0x447   : > { %v1369_v1 = vsub.f32 %v7403_v4, %v1348_v15 }
 0x449   : > { %v7471_v23 = vpop.eup %6269  ;;  %v1395_v8 = vmul.f32 1.442695, %v1369_v1 }
 0x44a   : > { %v1888_v34 = vpop.f32.mrf.mxu3  ;;  %v1443_v28 = vpack.c.bf16 %v7471_v23, %v7469_v19 }
 0x44b   : > { %6271 = vpow2.f32 %v1395_v8  ;;  %v1629_v8 = vpop.f32.mrf.mxu1 }
 0x44c   : > { %1483 = vmatmul.bf16.gmra.mxu0 %v1443_v28 }
 0x44e   : > { %v1350_v2 = vpop.xlane.xlu1 %1349 }
 0x44f   : > { %v1370_v3 = vsub.f32 %v7406_v10, %v1350_v2 }
 0x451   : > { %v1397_v40 = vmul.f32 1.442695, %v1370_v3  ;;  %v7477_v11 = vpop.eup %6271 }
 0x452   : > { %v1891_v20 = vpop.f32.mrf.mxu3 }
 0x453   : > { %6273 = vpow2.f32 %v1397_v40  ;;  %v1632_v40 = vpop.f32.mrf.mxu1 }
 0x456   : > { %v1352_v35 = vpop.xlane.xlu2 %1351 }
 0x457   : > { %v1371_v4 = vsub.f32 %v7410_v7, %v1352_v35  ;;  %v1663_v35 = vmul.f32 0.17677669, %v1624_v62 }
 0x459   : > { %v7479_v54 = vpop.eup %6273  ;;  %v1399_v36 = vmul.f32 1.442695, %v1371_v4  ;;  %v2143_v4 = vpack.c.bf16 %v1888_v34, %v7467_v16  ;;  %v2140_v16 = vpack.c.bf16 %v7439_v22, %v7433_v32  ;;  %v1665_v34 = vmul.f32 0.17677669, %v1629_v8 }
 0x45a   : > { %v1893_v46 = vpop.f32.mrf.mxu3  ;;  %v1444_v5 = vpack.c.bf16 %v7479_v54, %v7477_v11 }
 0x45b   : > { %6275 = vpow2.f32 %v1399_v36 }
 0x45c   : > { %1488 = vmatmul.bf16.gmra.mxu0 %v1444_v5  ;;  %v1662_v5 = vmul.f32 0.17677669, %v1622_v14  ;;  %v2139_v14 = vpack.c.bf16 %v7429_v37, %v7423_v59 }
 0x45e   : > { %v1354_v58 = vpop.xlane.xlu0 %1353 }
 0x45f   : > { %v1372_v10 = vsub.f32 %v7413_v12, %v1354_v58  ;;  %v1906_v58 = vpack.c.bf16 %v1663_v35, %v1662_v5  ;;  %v6081_v35 = vld [vmem:[%s8974_s3 + $0xa8] sm:$0xff] }
 0x461   : > { %v1401_v56 = vmul.f32 1.442695, %v1372_v10  ;;  %v7485_v43 = vpop.eup %6275  ;;  %v2142_v10 = vpack.c.bf16 %v7462_v9, %v7455_v38 }
 0x462   : > { %v1896_v61 = vpop.f32.mrf.mxu3 }
 0x463   : > { %6277 = vpow2.f32 %v1401_v56  ;;  %v1634_v56 = vpop.f32.mrf.mxu1 }
 0x466   : > { %v1356_v51 = vpop.xlane.xlu1 %1355 }
 0x467   : > { %v1373_v7 = vsub.f32 %v7417_v44, %v1356_v51  ;;  %v1667_v51 = vmul.f32 0.17677669, %v1634_v56 }
 0x469   : > { %v7487_v63 = vpop.eup %6277  ;;  %v1403_v48 = vmul.f32 1.442695, %v1373_v7  ;;  %v1666_v7 = vmul.f32 0.17677669, %v1632_v40 }
 0x46a   : > { %v1898_v30 = vpop.f32.mrf.mxu3  ;;  %v1445_v25 = vpack.c.bf16 %v7487_v63, %v7485_v43 }
 0x46b   : > { %6279 = vpow2.f32 %v1403_v48  ;;  %v2145_v3 = vpack.c.bf16 %v1898_v30, %v1896_v61  ;;  %v1664_v61 = vmul.f32 0.17677669, %v1627_v0  ;;  %v1637_v38 = vpop.f32.mrf.mxu1  ;;  %v1908_v32 = vpack.c.bf16 %v1667_v51, %v1666_v7  ;;  %v6076_v51 = vld [vmem:[%s8974_s3 + $0x80] sm:$0xff] }
 0x46c   : > { %1493 = vmatmul.bf16.gmra.mxu0 %v1445_v25  ;;  %v1668_v48 = vmul.f32 0.17677669, %v1637_v38  ;;  %v6077_v38 = vld [vmem:[%s8974_s3 + $0x88] sm:$0xff] }
 0x46d   : > { %v1907_v62 = vpack.c.bf16 %v1665_v34, %v1664_v61 }
 0x46e   : > { %v1358_v41 = vpop.xlane.xlu2 %1357 }
 0x46f   : > { %v1374_v12 = vsub.f32 %v7420_v24, %v1358_v41  ;;  %v2144_v24 = vpack.c.bf16 %v1893_v46, %v1891_v20  ;;  %v2141_v20 = vpack.c.bf16 %v7450_v47, %v7443_v57 }
 0x471   : > { %v1405_v33 = vmul.f32 1.442695, %v1374_v12  ;;  %v7493_v15 = vpop.eup %6279 }
 0x472   : > { %v1901_v17 = vpop.f32.mrf.mxu3 }
 0x473   : > { %6281 = vpow2.f32 %v1405_v33  ;;  %v1639_v47 = vpop.f32.mrf.mxu1 }
 0x474   : > { %v1669_v37 = vmul.f32 0.17677669, %v1639_v47 }
 0x476   : > { %v1909_v12 = vpack.c.bf16 %v1669_v37, %v1668_v48 }
 0x479   : > { %v7495_v1 = vpop.eup %6281 }
 0x47a   : > { %v1903_v28 = vpop.f32.mrf.mxu3  ;;  %v1446_v44 = vpack.c.bf16 %v7495_v1, %v7493_v15 }
 0x47b   : > { %v2146_v2 = vpack.c.bf16 %v1903_v28, %v1901_v17  ;;  %v1642_v22 = vpop.f32.mrf.mxu1 }
 0x47c   : > { %1498 = vmatmul.bf16.gmra.mxu0 %v1446_v44  ;;  %v1670_v28 = vmul.f32 0.17677669, %v1642_v22 }
 0x47d   : > { %2147 = vmatpush.bf16.msra.mxu1 %v2146_v2 }
 0x481   : > { %2148 = vmatpush.bf16.msra.mxu1 %v2145_v3  ;;  %v6083_v3 = vld [vmem:[%s8974_s3 + $0xb8] sm:$0xff] }
 0x482   : > { %2476 = vmatpush.bf16.msrb.mxu0 %v6083_v3 }
 0x483   : > { %v1644_v25 = vpop.f32.mrf.mxu1 }
 0x484   : > { %v1671_v17 = vmul.f32 0.17677669, %v1644_v25 }
 0x485   : > { %2149 = vmatpush.bf16.msra.mxu1 %v2144_v24  ;;  %v6082_v24 = vld [vmem:[%s8974_s3 + $0xb0] sm:$0xff] }
 0x486   : > { %v1910_v8 = vpack.c.bf16 %v1671_v17, %v1670_v28  ;;  %2477 = vmatpush.bf16.msrb.mxu0 %v6082_v24 }
 0x489   : > { %v7500_v36 = vpop.f32.mrf.mxu0  ;;  %2150 = vmatpush.bf16.msra.mxu1 %v2143_v4 }
 0x48a   : > { %2478 = vmatpush.bf16.msrb.mxu0 %v6081_v35 }
 0x48b   : > { %v1647_v0 = vpop.f32.mrf.mxu1 }
 0x48c   : > { %5502 = vmatmul.msk.bf16.vlgmr.msra.gmra.mxu0 %vm1229_vm1, %v1906_v58  ;;  %v1672_v58 = vmul.f32 0.17677669, %v1647_v0 }
 0x48d   : > { %2151 = vmatpush.bf16.msra.mxu1 %v2142_v10  ;;  %v6080_v10 = vld [vmem:[%s8974_s3 + $0xa0] sm:$0xff] }
 0x48e   : > { %2479 = vmatpush.bf16.msrb.mxu0 %v6080_v10 }
 0x491   : > { %v7507_v46 = vpop.f32.mrf.mxu0  ;;  %2152 = vmatpush.bf16.msra.mxu1 %v2141_v20 }
 0x493   : > { %v1649_v2 = vpop.f32.mrf.mxu1 }
 0x494   : > { %v1673_v5 = vmul.f32 0.17677669, %v1649_v2 }
 0x495   : > { %2153 = vmatpush.bf16.msra.mxu1 %v2140_v16  ;;  %v6079_v16 = vld [vmem:[%s8974_s3 + $0x98] sm:$0xff] }
 0x496   : > { %v1911_v20 = vpack.c.bf16 %v1673_v5, %v1672_v58  ;;  %2480 = vmatpush.bf16.msrb.mxu0 %v6079_v16 }
 0x499   : > { %v7513_v9 = vpop.f32.mrf.mxu0  ;;  %2154 = vmatpush.bf16.msra.mxu1 %v2139_v14  ;;  %v6078_v14 = vld [vmem:[%s8974_s3 + $0x90] sm:$0xff] }
 0x49a   : > { %2481 = vmatpush.bf16.msrb.mxu0 %v6078_v14 }
 0x49b   : > { %v1652_v4 = vpop.f32.mrf.mxu1 }
 0x49c   : > { %5503 = vmatmul.msk.bf16.gmra.mxu0 %vm1229_vm1, %v1907_v62  ;;  %v1674_v47 = vmul.f32 0.17677669, %v1652_v4 }
 0x49e   : > { %2482 = vmatpush.bf16.msrb.mxu0 %v6077_v38 }
 0x4a1   : > { %v7516_v57 = vpop.f32.mrf.mxu0 }
 0x4a2   : > { %2483 = vmatpush.bf16.msrb.mxu0 %v6076_v51 }
 0x4a3   : > { %v1654_v34 = vpop.f32.mrf.mxu1 }
 0x4a4   : > { %v1675_v62 = vmul.f32 0.17677669, %v1654_v34 }
 0x4a6   : > { %v1912_v22 = vpack.c.bf16 %v1675_v62, %v1674_v47 }
 0x4a9   : > { %v7518_v30 = vpop.f32.mrf.mxu0 }
 0x4ab   : > { %v1657_v7 = vpop.f32.mrf.mxu1 }
 0x4ac   : > { %5504 = vmatmul.msk.bf16.gmra.mxu0 %vm1229_vm1, %v1908_v32 }
 0x4b1   : > { %v7521_v59 = vpop.f32.mrf.mxu0 }
 0x4b3   : > { %v1659_v25 = vpop.f32.mrf.mxu1 }
 0x4b4   : > { %v1677_v48 = vmul.f32 0.17677669, %v1659_v25 }
 0x4b9   : > { %v7523_v41 = vpop.f32.mrf.mxu0 }
 0x4bc   : > { %5505 = vmatmul.msk.bf16.gmra.mxu0 %vm1229_vm1, %v1909_v12  ;;  %v1676_v12 = vmul.f32 0.17677669, %v1657_v7 }
 0x4be   : > { %v1913_v17 = vpack.c.bf16 %v1677_v48, %v1676_v12 }
 0x4c1   : > { %v7526_v33 = vpop.f32.mrf.mxu0 }
 0x4c9   : > { %v7528_v44 = vpop.f32.mrf.mxu0 }
 0x4cc   : > { %5506 = vmatmul.msk.bf16.gmra.mxu0 %vm1229_vm1, %v1910_v8 }
 0x4d1   : > { %v7537_v40 = vpop.f32.mrf.mxu0 }
 0x4d9   : > { %v7545_v56 = vpop.f32.mrf.mxu0 }
 0x4da   : > { %9005 = vst [vmem:[#allocation9_spill] sm:$0xff] %v7545_v56 }
 0x4dc   : > { %5507 = vmatmul.msk.bf16.gmra.mxu0 %vm1229_vm1, %v1911_v20 }
 0x4e1   : > { %v7554_v61 = vpop.f32.mrf.mxu0 }
 0x4e9   : > { %v7562_v32 = vpop.f32.mrf.mxu0 }
 0x4ea   : > { %9006 = vst [vmem:[#allocation10_spill] sm:$0xff] %v7562_v32 }
 0x4ec   : > { %5508 = vmatmul.msk.bf16.gmra.mxu0 %vm1229_vm1, %v1912_v22 }
 0x4f1   : > { %v7565_v37 = vpop.f32.mrf.mxu0 }
 0x4f2   : > { %9007 = vst [vmem:[#allocation11_spill] sm:$0xff] %v7565_v37 }
 0x4f9   : > { %v7567_v0 = vpop.f32.mrf.mxu0 }
 0x4fa   : > { %9008 = vst [vmem:[#allocation12_spill] sm:$0xff] %v7567_v0 }
 0x4fc   : > { %5509 = vmatmul.msk.bf16.gmra.mxu0 %vm1229_vm1, %v1913_v17 }
 0x501   : > { %v7570_v28 = vpop.f32.mrf.mxu0 }
 0x502   : > { %9009 = vst [vmem:[#allocation13_spill] sm:$0xff] %v7570_v28 }
 0x509   : > { %v1979_v8 = vpop.f32.mrf.mxu0 }
 0x50a   : > { %2019 = vmax.xlane.f32.xlu0 %v1979_v8 }
 0x50c   : > { %2484 = vmatmul.bf16.vlgmr.msrb.gmra.mxu0 %v7070_v53 }
 0x511   : > { %v1981_v2 = vpop.f32.mrf.mxu0 }
 0x512   : > { %2021 = vmax.xlane.f32.xlu1 %v1981_v2 }
 0x519   : > { %v1984_v3 = vpop.f32.mrf.mxu0 }
 0x51a   : > { %2023 = vmax.xlane.f32.xlu2 %v1984_v3 }
 0x51c   : > { %2489 = vmatmul.bf16.gmra.mxu0 %v7107_v18 }
 0x521   : > { %v1986_v24 = vpop.f32.mrf.mxu0 }
 0x522   : > { %2025 = vmax.xlane.f32.xlu0 %v1986_v24 }
 0x529   : > { %v1989_v35 = vpop.f32.mrf.mxu0 }
 0x52a   : > { %2027 = vmax.xlane.f32.xlu1 %v1989_v35 }
 0x52c   : > { %2494 = vmatmul.bf16.gmra.mxu0 %v7119_v31 }
 0x531   : > { %v1991_v4 = vpop.f32.mrf.mxu0 }
 0x532   : > { %2029 = vmax.xlane.f32.xlu2 %v1991_v4 }
 0x539   : > { %v7575_v5 = vpop.f32.mrf.mxu0 }
 0x53a   : > { %2031 = vmax.xlane.f32.xlu0 %v7575_v5 }
 0x53c   : > { %2499 = vmatmul.bf16.gmra.mxu0 %v7148_v27 }
 0x541   : > { %v7579_v58 = vpop.f32.mrf.mxu0 }
 0x542   : > { %2033 = vmax.xlane.f32.xlu1 %v7579_v58 }
 0x549   : > { %v7582_v10 = vpop.f32.mrf.mxu0 }
 0x54a   : > { %2035 = vmax.xlane.f32.xlu2 %v7582_v10 }
 0x54c   : > { %2504 = vmatmul.bf16.gmra.mxu0 %v7171_v42 }
 0x551   : > { %v7586_v20 = vpop.f32.mrf.mxu0 }
 0x552   : > { %2037 = vmax.xlane.f32.xlu0 %v7586_v20 }
 0x559   : > { %v7589_v16 = vpop.f32.mrf.mxu0 }
 0x55a   : > { %2039 = vmax.xlane.f32.xlu1 %v7589_v16 }
 0x55c   : > { %2509 = vmatmul.bf16.gmra.mxu0 %v7184_v6 }
 0x561   : > { %v7593_v34 = vpop.f32.mrf.mxu0 }
 0x562   : > { %2041 = vmax.xlane.f32.xlu2 %v7593_v34 }
 0x569   : > { %v7596_v14 = vpop.f32.mrf.mxu0 }
 0x56a   : > { %2043 = vmax.xlane.f32.xlu0 %v7596_v14 }
 0x56c   : > { %2514 = vmatmul.bf16.gmra.mxu0 %v7195_v39 }
 0x571   : > { %v7600_v38 = vpop.f32.mrf.mxu0 }
 0x572   : > { %2045 = vmax.xlane.f32.xlu1 %v7600_v38 }
 0x579   : > { %v7603_v62 = vpop.f32.mrf.mxu0 }
 0x57a   : > { %2047 = vmax.xlane.f32.xlu2 %v7603_v62 }
 0x57c   : > { %2519 = vmatmul.bf16.gmra.mxu0 %v7260_v29 }
 0x57d   : > { %v2020_v47 = vpop.xlane.xlu0 %2019 }
 0x57e   : > { %v2051_v51 = vsub.f32 %v1979_v8, %v2020_v47 }
 0x580   : > { %v2067_v7 = vmul.f32 1.442695, %v2051_v51 }
 0x581   : > { %v7607_v22 = vpop.f32.mrf.mxu0 }
 0x582   : > { %6283 = vpow2.f32 %v2067_v7  ;;  %2049 = vmax.xlane.f32.xlu0 %v7607_v22 }
 0x585   : > { %v2022_v25 = vpop.xlane.xlu1 %2021 }
 0x586   : > { %v2052_v48 = vsub.f32 %v1981_v2, %v2022_v25 }
 0x588   : > { %v6284_v12 = vpop.eup %6283  ;;  %v2069_v17 = vmul.f32 1.442695, %v2052_v48 }
 0x589   : > { %2099 = vadd.xlane.f32.xlu1 %v6284_v12 }
 0x58a   : > { %6285 = vpow2.f32 %v2069_v17 }
 0x58d   : > { %v2024_v13 = vpop.xlane.xlu2 %2023 }
 0x58e   : > { %v2053_v0 = vsub.f32 %v1984_v3, %v2024_v13 }
 0x590   : > { %v6286_v28 = vpop.eup %6285  ;;  %v2071_v37 = vmul.f32 1.442695, %v2053_v0 }
 0x591   : > { %v2131_v32 = vpack.c.bf16 %v6286_v28, %v6284_v12  ;;  %2101 = vadd.xlane.f32.xlu2 %v6286_v28 }
 0x592   : > { %6287 = vpow2.f32 %v2071_v37 }
 0x593   : > { %2155 = vmatmul.bf16.vlgmr.msra.gmra.mxu1 %v2131_v32 }
 0x595   : > { %v2026_v8 = vpop.xlane.xlu0 %2025 }
 0x596   : > { %v2054_v47 = vsub.f32 %v1986_v24, %v2026_v8 }
 0x598   : > { %v6288_v51 = vpop.eup %6287  ;;  %v2073_v7 = vmul.f32 1.442695, %v2054_v47 }
 0x599   : > { %2103 = vadd.xlane.f32.xlu0 %v6288_v51 }
 0x59a   : > { %6289 = vpow2.f32 %v2073_v7 }
 0x59d   : > { %v2028_v56 = vpop.xlane.xlu1 %2027 }
 0x59e   : > { %v2055_v2 = vsub.f32 %v1989_v35, %v2028_v56  ;;  %v6091_v56 = vld [vmem:[%s8975_s4 + $0xb8] sm:$0xff] }
 0x59f   : > { %2606 = vmatpush.bf16.msrb.mxu1 %v6091_v56 }
 0x5a0   : > { %v6290_v25 = vpop.eup %6289  ;;  %v2075_v48 = vmul.f32 1.442695, %v2055_v2 }
 0x5a1   : > { %2105 = vadd.xlane.f32.xlu1 %v6290_v25  ;;  %v2132_v17 = vpack.c.bf16 %v6290_v25, %v6288_v51 }
 0x5a2   : > { %6291 = vpow2.f32 %v2075_v48 }
 0x5a3   : > { %2160 = vmatmul.bf16.gmra.mxu1 %v2132_v17  ;;  %v6090_v17 = vld [vmem:[%s8975_s4 + $0xb0] sm:$0xff] }
 0x5a4   : > { %2607 = vmatpush.bf16.msrb.mxu1 %v6090_v17 }
 0x5a5   : > { %v2030_v13 = vpop.xlane.xlu2 %2029 }
 0x5a6   : > { %v2056_v0 = vsub.f32 %v1991_v4, %v2030_v13 }
 0x5a8   : > { %v6292_v3 = vpop.eup %6291  ;;  %v2077_v28 = vmul.f32 1.442695, %v2056_v0 }
 0x5a9   : > { %2107 = vadd.xlane.f32.xlu2 %v6292_v3 }
 0x5aa   : > { %6293 = vpow2.f32 %v2077_v28 }
 0x5ad   : > { %v2032_v32 = vpop.xlane.xlu0 %2031 }
 0x5ae   : > { %v2057_v37 = vsub.f32 %v7575_v5, %v2032_v32 }
 0x5b0   : > { %v6294_v24 = vpop.eup %6293  ;;  %v2079_v12 = vmul.f32 1.442695, %v2057_v37 }
 0x5b1   : > { %2109 = vadd.xlane.f32.xlu0 %v6294_v24  ;;  %v2133_v8 = vpack.c.bf16 %v6294_v24, %v6292_v3 }
 0x5b2   : > { %6295 = vpow2.f32 %v2079_v12  ;;  %v6089_v12 = vld [vmem:[%s8975_s4 + $0xa8] sm:$0xff] }
 0x5b3   : > { %2165 = vmatmul.bf16.gmra.mxu1 %v2133_v8 }
 0x5b4   : > { %2608 = vmatpush.bf16.msrb.mxu1 %v6089_v12 }
 0x5b5   : > { %v2034_v35 = vpop.xlane.xlu1 %2033 }
 0x5b6   : > { %v2058_v4 = vsub.f32 %v7579_v58, %v2034_v35 }
 0x5b8   : > { %v6296_v47 = vpop.eup %6295  ;;  %v2081_v51 = vmul.f32 1.442695, %v2058_v4  ;;  %v6088_v4 = vld [vmem:[%s8975_s4 + $0xa0] sm:$0xff] }
 0x5b9   : > { %2111 = vadd.xlane.f32.xlu1 %v6296_v47  ;;  %2609 = vmatpush.bf16.msrb.mxu1 %v6088_v4 }
 0x5ba   : > { %6297 = vpow2.f32 %v2081_v51 }
 0x5bd   : > { %v2036_v7 = vpop.xlane.xlu2 %2035 }
 0x5be   : > { %v2059_v5 = vsub.f32 %v7582_v10, %v2036_v7 }
 0x5c0   : > { %v6298_v2 = vpop.eup %6297  ;;  %v2083_v25 = vmul.f32 1.442695, %v2059_v5 }
 0x5c1   : > { %2113 = vadd.xlane.f32.xlu2 %v6298_v2  ;;  %v2134_v48 = vpack.c.bf16 %v6298_v2, %v6296_v47 }
 0x5c2   : > { %6299 = vpow2.f32 %v2083_v25 }
 0x5c3   : > { %2170 = vmatmul.bf16.gmra.mxu1 %v2134_v48 }
 0x5c5   : > { %v2038_v13 = vpop.xlane.xlu0 %2037 }
 0x5c6   : > { %v2060_v58 = vsub.f32 %v7586_v20, %v2038_v13 }
 0x5c8   : > { %v6300_v0 = vpop.eup %6299  ;;  %v2085_v3 = vmul.f32 1.442695, %v2060_v58 }
 0x5c9   : > { %2115 = vadd.xlane.f32.xlu0 %v6300_v0 }
 0x5ca   : > { %6301 = vpow2.f32 %v2085_v3 }
 0x5cd   : > { %v2040_v28 = vpop.xlane.xlu1 %2039 }
 0x5ce   : > { %v2061_v10 = vsub.f32 %v7589_v16, %v2040_v28  ;;  %v6075_v28 = vld [vmem:[%s8977_s6 + $0x18] sm:$0xff] }
 0x5cf   : > { %2283 = vmatpush.bf16.msra.mxu2 %v6075_v28 }
 0x5d0   : > { %v6302_v32 = vpop.eup %6301  ;;  %v2087_v37 = vmul.f32 1.442695, %v2061_v10 }
 0x5d1   : > { %2117 = vadd.xlane.f32.xlu1 %v6302_v32  ;;  %v2135_v24 = vpack.c.bf16 %v6302_v32, %v6300_v0 }
 0x5d2   : > { %6303 = vpow2.f32 %v2087_v37 }
 0x5d3   : > { %2175 = vmatmul.bf16.gmra.mxu1 %v2135_v24 }
 0x5d5   : > { %v2042_v8 = vpop.xlane.xlu2 %2041 }
 0x5d6   : > { %v2062_v20 = vsub.f32 %v7593_v34, %v2042_v8 }
 0x5d8   : > { %v6304_v56 = vpop.eup %6303  ;;  %v2089_v35 = vmul.f32 1.442695, %v2062_v20 }
 0x5d9   : > { %1407 = vadd.xlane.f32.xlu1 %v7425_v55  ;;  %2119 = vadd.xlane.f32.xlu2 %v6304_v56  ;;  %v6087_v55 = vld [vmem:[%s8975_s4 + $0x98] sm:$0xff] }
 0x5da   : > { %6305 = vpow2.f32 %v2089_v35  ;;  %2610 = vmatpush.bf16.msrb.mxu1 %v6087_v55  ;;  %v6049_v55 = vld [vmem:[%s8977_s6 + $0x8] sm:$0xff] }
 0x5db   : > { %2368 = vmatpush.bf16.msra.mxu3 %v6049_v55 }
 0x5dd   : > { %v2044_v16 = vpop.xlane.xlu0 %2043 }
 0x5de   : > { %v2063_v47 = vsub.f32 %v7596_v14, %v2044_v16  ;;  %v6086_v14 = vld [vmem:[%s8975_s4 + $0x90] sm:$0xff] }
 0x5df   : > { %2611 = vmatpush.bf16.msrb.mxu1 %v6086_v14 }
 0x5e0   : > { %v6306_v51 = vpop.eup %6305  ;;  %v2091_v7 = vmul.f32 1.442695, %v2063_v47 }
 0x5e1   : > { %1409 = vadd.xlane.f32.xlu2 %v7427_v21  ;;  %2121 = vadd.xlane.f32.xlu0 %v6306_v51  ;;  %v2136_v34 = vpack.c.bf16 %v6306_v51, %v6304_v56  ;;  %v6085_v21 = vld [vmem:[%s8975_s4 + $0x88] sm:$0xff] }
 0x5e2   : > { %6307 = vpow2.f32 %v2091_v7 }
 0x5e3   : > { %2180 = vmatmul.bf16.gmra.mxu1 %v2136_v34 }
 0x5e4   : > { %2612 = vmatpush.bf16.msrb.mxu1 %v6085_v21 }
 0x5e5   : > { %v2046_v5 = vpop.xlane.xlu1 %2045 }
 0x5e6   : > { %v2064_v2 = vsub.f32 %v7600_v38, %v2046_v5  ;;  %v6084_v38 = vld [vmem:[%s8975_s4 + $0x80] sm:$0xff] }
 0x5e8   : > { %v6308_v25 = vpop.eup %6307  ;;  %v2093_v48 = vmul.f32 1.442695, %v2064_v2  ;;  %2613 = vmatpush.bf16.msrb.mxu1 %v6084_v38 }
 0x5e9   : > { %1411 = vadd.xlane.f32.xlu2 %v7435_v50  ;;  %2123 = vadd.xlane.f32.xlu0 %v6308_v25 }
 0x5ea   : > { %6309 = vpow2.f32 %v2093_v48 }
 0x5ed   : > { %v2048_v17 = vpop.xlane.xlu2 %2047 }
 0x5ee   : > { %v2065_v13 = vsub.f32 %v7603_v62, %v2048_v17 }
 0x5f0   : > { %v6310_v58 = vpop.eup %6309  ;;  %v2095_v0 = vmul.f32 1.442695, %v2065_v13 }
 0x5f1   : > { %2125 = vadd.xlane.f32.xlu1 %v6310_v58  ;;  %1413 = vadd.xlane.f32.xlu0 %v7437_v52  ;;  %v2137_v50 = vpack.c.bf16 %v6310_v58, %v6308_v25  ;;  %v6074_v52 = vld [vmem:[%s8977_s6 + $0x10] sm:$0xff]  ;;  %v6048_v25 = vld [vmem:[%s8977_s6] sm:$0xff] }
 0x5f2   : > { %6311 = vpow2.f32 %v2095_v0  ;;  %2284 = vmatpush.bf16.msra.mxu2 %v6074_v52  ;;  %2369 = vmatpush.bf16.msra.mxu3 %v6048_v25 }
 0x5f3   : > { %2185 = vmatmul.bf16.gmra.mxu1 %v2137_v50 }
 0x5f5   : > { %v2050_v3 = vpop.xlane.xlu0 %2049 }
 0x5f6   : > { %v2066_v62 = vsub.f32 %v7607_v22, %v2050_v3 }
 0x5f8   : > { %v6312_v10 = vpop.eup %6311  ;;  %v2097_v32 = vmul.f32 1.442695, %v2066_v62 }
 0x5f9   : > { %2127 = vadd.xlane.f32.xlu1 %v6312_v10  ;;  %1415 = vadd.xlane.f32.xlu0 %v7445_v60 }
 0x5fa   : > { %6313 = vpow2.f32 %v2097_v32 }
 0x5fc   : > { %v2100_v60 = vpop.xlane.xlu1 %2099 }
 0x5fd   : > { %6315 = vrcp.f32 %v2100_v60 }
 0x600   : > { %v6314_v37 = vpop.eup %6313 }
 0x601   : > { %1417 = vadd.xlane.f32.xlu1 %v7447_v26  ;;  %1421 = vadd.xlane.f32.xlu0 %v7459_v49  ;;  %v2138_v24 = vpack.c.bf16 %v6314_v37, %v6312_v10 }
 0x602   : > { %2129 = vadd.xlane.f32.xlu2 %v6314_v37 }
 0x603   : > { %2190 = vmatmul.bf16.gmra.mxu1 %v2138_v24  ;;  %v6316_v26 = vpop.eup %6315 }
 0x604   : > { %v2102_v22 = vpop.xlane.xlu2 %2101 }
 0x605   : > { %6317 = vrcp.f32 %v2102_v22 }
 0x609   : > { %1423 = vadd.xlane.f32.xlu1 %v7469_v19  ;;  %1427 = vadd.xlane.f32.xlu0 %v7477_v11 }
 0x60a   : > { %1419 = vadd.xlane.f32.xlu2 %v7457_v45 }
 0x60b   : > { %v6318_v49 = vpop.eup %6317 }
 0x610   : > { %v2156_v12 = vpop.f32.mrf.mxu1 }
 0x611   : > { %1429 = vadd.xlane.f32.xlu1 %v7479_v54  ;;  %1433 = vadd.xlane.f32.xlu0 %v7487_v63  ;;  %v2212_v8 = vmul.f32 %v6316_v26, %v2156_v12  ;;  %v2104_v54 = vpop.xlane.xlu0 %2103 }
 0x612   : > { %1425 = vadd.xlane.f32.xlu2 %v7471_v23  ;;  %6319 = vrcp.f32 %v2104_v54 }
 0x613   : > { %2614 = vmatmul.bf16.vlgmr.msrb.gmra.mxu1 %v7070_v53 }
 0x614   : > { %v2106_v20 = vpop.xlane.xlu1 %2105 }
 0x615   : > { %6321 = vrcp.f32 %v2106_v20 }
 0x618   : > { %v2158_v19 = vpop.f32.mrf.mxu1  ;;  %v6320_v23 = vpop.eup %6319 }
 0x619   : > { %v2213_v11 = vmul.f32 %v6318_v49, %v2158_v19  ;;  %1435 = vadd.xlane.f32.xlu1 %v7493_v15 }
 0x61a   : > { %1431 = vadd.xlane.f32.xlu2 %v7485_v43 }
 0x61b   : > { %v2228_v45 = vpack.c.bf16 %v2213_v11, %v2212_v8  ;;  %v6322_v56 = vpop.eup %6321 }
 0x61c   : > { %v2108_v43 = vpop.xlane.xlu2 %2107 }
 0x61d   : > { %5522 = vmatmul.msk.bf16.vlgmr.msra.gmra.mxu2 %vm1229_vm1, %v2228_v45  ;;  %6323 = vrcp.f32 %v2108_v43 }
 0x620   : > { %v2161_v63 = vpop.f32.mrf.mxu1 }
 0x621   : > { %v2214_v16 = vmul.f32 %v6320_v23, %v2161_v63  ;;  %v6099_v23 = vld [vmem:[%s8976_s5 + $0xb8] sm:$0xff] }
 0x622   : > { %1437 = vadd.xlane.f32.xlu2 %v7495_v1  ;;  %2720 = vmatpush.bf16.msrb.mxu2 %v6099_v23 }
 0x623   : > { %2619 = vmatmul.bf16.gmra.mxu1 %v7107_v18  ;;  %v6324_v7 = vpop.eup %6323 }
 0x624   : > { %v2110_v47 = vpop.xlane.xlu0 %2109 }
 0x625   : > { %6325 = vrcp.f32 %v2110_v47 }
 0x628   : > { %v2163_v35 = vpop.f32.mrf.mxu1 }
 0x629   : > { %v2215_v4 = vmul.f32 %v6322_v56, %v2163_v35 }
 0x62b   : > { %v2229_v15 = vpack.c.bf16 %v2215_v4, %v2214_v16  ;;  %v6326_v34 = vpop.eup %6325  ;;  %v6097_v4 = vld [vmem:[%s8976_s5 + $0xa8] sm:$0xff] }
 0x62c   : > { %v2112_v48 = vpop.xlane.xlu1 %2111 }
 0x62d   : > { %5523 = vmatmul.msk.bf16.gmra.mxu2 %vm1229_vm1, %v2229_v15  ;;  %6327 = vrcp.f32 %v2112_v48  ;;  %v6095_v48 = vld [vmem:[%s8976_s5 + $0x98] sm:$0xff] }
 0x630   : > { %v2166_v51 = vpop.f32.mrf.mxu1 }
 0x631   : > { %v2216_v5 = vmul.f32 %v6324_v7, %v2166_v51 }
 0x633   : > { %2624 = vmatmul.bf16.gmra.mxu1 %v7119_v31  ;;  %v6328_v38 = vpop.eup %6327 }
 0x634   : > { %v2114_v21 = vpop.xlane.xlu2 %2113 }
 0x635   : > { %6329 = vrcp.f32 %v2114_v21 }
 0x638   : > { %v2168_v1 = vpop.f32.mrf.mxu1 }
 0x639   : > { %v2217_v2 = vmul.f32 %v6326_v34, %v2168_v1  ;;  %v6096_v1 = vld [vmem:[%s8976_s5 + $0xa0] sm:$0xff] }
 0x63b   : > { %v2230_v14 = vpack.c.bf16 %v2217_v2, %v2216_v5  ;;  %v6330_v58 = vpop.eup %6329 }
 0x63c   : > { %v2116_v62 = vpop.xlane.xlu0 %2115 }
 0x63d   : > { %5524 = vmatmul.msk.bf16.gmra.mxu2 %vm1229_vm1, %v2230_v14  ;;  %6331 = vrcp.f32 %v2116_v62 }
 0x640   : > { %v2171_v17 = vpop.f32.mrf.mxu1 }
 0x641   : > { %v2218_v50 = vmul.f32 %v6328_v38, %v2171_v17 }
 0x643   : > { %2629 = vmatmul.bf16.gmra.mxu1 %v7148_v27  ;;  %v6332_v60 = vpop.eup %6331 }
 0x644   : > { %v2118_v13 = vpop.xlane.xlu1 %2117 }
 0x645   : > { %6333 = vrcp.f32 %v2118_v13 }
 0x648   : > { %v2173_v0 = vpop.f32.mrf.mxu1 }
 0x649   : > { %v2219_v3 = vmul.f32 %v6330_v58, %v2173_v0  ;;  %v6093_v58 = vld [vmem:[%s8976_s5 + $0x88] sm:$0xff] }
 0x64b   : > { %v2231_v28 = vpack.c.bf16 %v2219_v3, %v2218_v50  ;;  %v6334_v22 = vpop.eup %6333 }
 0x64c   : > { %v2120_v10 = vpop.xlane.xlu2 %2119  ;;  %v1408_v32 = vpop.xlane.xlu1 %1407 }
 0x64d   : > { %5525 = vmatmul.msk.bf16.gmra.mxu2 %vm1229_vm1, %v2231_v28  ;;  %6335 = vrcp.f32 %v1408_v32  ;;  %v6092_v32 = vld [vmem:[%s8976_s5 + $0x80] sm:$0xff] }
 0x650   : > { %v2176_v52 = vpop.f32.mrf.mxu1 }
 0x651   : > { %v2220_v49 = vmul.f32 %v6332_v60, %v2176_v52 }
 0x653   : > { %2634 = vmatmul.bf16.gmra.mxu1 %v7171_v42  ;;  %v6336_v26 = vpop.eup %6335 }
 0x654   : > { %v1410_v37 = vpop.xlane.xlu2 %1409  ;;  %v2122_v24 = vpop.xlane.xlu0 %2121  ;;  %v1520_v45 = vmul.f32 %v6336_v26, %v7500_v36  ;;  %v6098_v36 = vld [vmem:[%s8976_s5 + $0xb0] sm:$0xff] }
 0x655   : > { %6337 = vrcp.f32 %v1410_v37  ;;  %2721 = vmatpush.bf16.msrb.mxu2 %v6098_v36 }
 0x656   : > { %6339 = vrcp.f32 %v2120_v10 }
 0x657   : > { %6341 = vrcp.f32 %v2122_v24 }
 0x658   : > { %v2178_v12 = vpop.f32.mrf.mxu1 }
 0x659   : > { %v2221_v19 = vmul.f32 %v6334_v22, %v2178_v12  ;;  %2722 = vmatpush.bf16.msrb.mxu2 %v6097_v4 }
 0x65b   : > { %v6338_v8 = vpop.eup %6337  ;;  %v2232_v11 = vpack.c.bf16 %v2221_v19, %v2220_v49 }
 0x65c   : > { %v1521_v54 = vmul.f32 %v6338_v8, %v7507_v46  ;;  %v2124_v20 = vpop.xlane.xlu0 %2123  ;;  %v1412_v35 = vpop.xlane.xlu2 %1411 }
 0x65d   : > { %5526 = vmatmul.msk.bf16.gmra.mxu2 %vm1229_vm1, %v2232_v11  ;;  %6343 = vrcp.f32 %v1412_v35  ;;  %v6340_v15 = vpop.eup %6339 }
 0x65e   : > { %v1536_v63 = vpack.c.bf16 %v1521_v54, %v1520_v45  ;;  %v6342_v43 = vpop.eup %6341  ;;  %2723 = vmatpush.bf16.msrb.mxu2 %v6096_v1 }
 0x660   : > { %v2181_v56 = vpop.f32.mrf.mxu1  ;;  %5538 = vmatmul.msk.bf16.vlgmr.msra.gmra.mxu3 %vm1229_vm1, %v1536_v63 }
 0x661   : > { %v2222_v51 = vmul.f32 %v6340_v15, %v2181_v56 }
 0x662   : > { %2724 = vmatpush.bf16.msrb.mxu2 %v6095_v48 }
 0x663   : > { %2639 = vmatmul.bf16.gmra.mxu1 %v7184_v6  ;;  %v6344_v34 = vpop.eup %6343 }
 0x664   : > { %v2126_v46 = vpop.xlane.xlu1 %2125  ;;  %v1414_v16 = vpop.xlane.xlu0 %1413  ;;  %v1522_v14 = vmul.f32 %v6344_v34, %v7513_v9  ;;  %v6094_v9 = vld [vmem:[%s8976_s5 + $0x90] sm:$0xff] }
 0x665   : > { %6345 = vrcp.f32 %v1414_v16 }
 0x666   : > { %6347 = vrcp.f32 %v2124_v20  ;;  %2725 = vmatpush.bf16.msrb.mxu2 %v6094_v9 }
 0x667   : > { %6349 = vrcp.f32 %v2126_v46 }
 0x668   : > { %v2183_v47 = vpop.f32.mrf.mxu1 }
 0x669   : > { %v2223_v7 = vmul.f32 %v6342_v43, %v2183_v47 }
 0x66a   : > { %2726 = vmatpush.bf16.msrb.mxu2 %v6093_v58  ;;  %v9011_v58 = vld [vmem:[#allocation10_spill] sm:$0xff] }
 0x66b   : > { %v2233_v55 = vpack.c.bf16 %v2223_v7, %v2222_v51  ;;  %v6346_v5 = vpop.eup %6345 }
 0x66c   : > { %v2128_v2 = vpop.xlane.xlu1 %2127  ;;  %v1523_v25 = vmul.f32 %v6346_v5, %v7516_v57  ;;  %v1416_v17 = vpop.xlane.xlu0 %1415 }
 0x66d   : > { %5527 = vmatmul.msk.bf16.gmra.mxu2 %vm1229_vm1, %v2233_v55  ;;  %6351 = vrcp.f32 %v1416_v17  ;;  %v6348_v0 = vpop.eup %6347 }
 0x66e   : > { %v1537_v21 = vpack.c.bf16 %v1523_v25, %v1522_v14  ;;  %v6350_v50 = vpop.eup %6349  ;;  %2727 = vmatpush.bf16.msrb.mxu2 %v6092_v32 }
 0x670   : > { %v2186_v13 = vpop.f32.mrf.mxu1  ;;  %5539 = vmatmul.msk.bf16.gmra.mxu3 %vm1229_vm1, %v1537_v21 }
 0x671   : > { %v2224_v62 = vmul.f32 %v6348_v0, %v2186_v13 }
 0x673   : > { %2644 = vmatmul.bf16.gmra.mxu1 %v7195_v39  ;;  %v6352_v28 = vpop.eup %6351 }
 0x674   : > { %v1418_v57 = vpop.xlane.xlu1 %1417  ;;  %v1524_v24 = vmul.f32 %v6352_v28, %v7518_v30  ;;  %v1422_v49 = vpop.xlane.xlu0 %1421 }
 0x675   : > { %6353 = vrcp.f32 %v1418_v57  ;;  %v2130_v38 = vpop.xlane.xlu2 %2129 }
 0x676   : > { %6355 = vrcp.f32 %v2128_v2  ;;  %v9010_v2 = vld [vmem:[#allocation9_spill] sm:$0xff] }
 0x677   : > { %6357 = vrcp.f32 %v2130_v38 }
 0x678   : > { %v2188_v3 = vpop.f32.mrf.mxu1 }
 0x679   : > { %v2225_v10 = vmul.f32 %v6350_v50, %v2188_v3  ;;  %v9012_v50 = vld [vmem:[#allocation11_spill] sm:$0xff] }
 0x67b   : > { %v6354_v52 = vpop.eup %6353  ;;  %v2234_v37 = vpack.c.bf16 %v2225_v10, %v2224_v62 }
 0x67c   : > { %v1525_v60 = vmul.f32 %v6354_v52, %v7521_v59  ;;  %v6356_v19 = vpop.eup %6355  ;;  %v1424_v46 = vpop.xlane.xlu1 %1423 }
 0x67d   : > { %5528 = vmatmul.msk.bf16.gmra.mxu2 %vm1229_vm1, %v2234_v37  ;;  %v1420_v12 = vpop.xlane.xlu2 %1419  ;;  %v6358_v8 = vpop.eup %6357 }
 0x67e   : > { %v1538_v22 = vpack.c.bf16 %v1525_v60, %v1524_v24  ;;  %6359 = vrcp.f32 %v1420_v12  ;;  %v1428_v34 = vpop.xlane.xlu0 %1427  ;;  %v9013_v12 = vld [vmem:[#allocation13_spill] sm:$0xff] }
 0x67f   : > { %6361 = vrcp.f32 %v1422_v49  ;;  %v9014_v49 = vld [vmem:[#allocation12_spill] sm:$0xff] }
 0x680   : > { %v2191_v26 = vpop.f32.mrf.mxu1  ;;  %5540 = vmatmul.msk.bf16.gmra.mxu3 %vm1229_vm1, %v1538_v22 }
 0x681   : > { %v2226_v59 = vmul.f32 %v6356_v19, %v2191_v26 }
 0x683   : > { %2649 = vmatmul.bf16.gmra.mxu1 %v7260_v29 }
 0x684   : > { %v6360_v30 = vpop.eup %6359 }
 0x685   : > { %v6362_v54 = vpop.eup %6361  ;;  %v1526_v20 = vmul.f32 %v6360_v30, %v7523_v41  ;;  %v1426_v56 = vpop.xlane.xlu2 %1425 }
 0x686   : > { %v1527_v23 = vmul.f32 %v6362_v54, %v7526_v33  ;;  %6363 = vrcp.f32 %v1426_v56  ;;  %v1430_v33 = vpop.xlane.xlu1 %1429  ;;  %v1434_v13 = vpop.xlane.xlu0 %1433  ;;  %v6109_v54 = vld [vmem:[%s8974_s3 + $0xf8] sm:$0xff] }
 0x687   : > { %6365 = vrcp.f32 %v1424_v46  ;;  %3270 = vmatpush.bf16.msra.mxu2 %v6109_v54  ;;  %v6107_v46 = vld [vmem:[%s8974_s3 + $0xe8] sm:$0xff] }
 0x688   : > { %v2193_v11 = vpop.f32.mrf.mxu1  ;;  %v1539_v35 = vpack.c.bf16 %v1527_v23, %v1526_v20  ;;  %6367 = vrcp.f32 %v1430_v33  ;;  %v6108_v23 = vld [vmem:[%s8974_s3 + $0xf0] sm:$0xff]  ;;  %v6105_v33 = vld [vmem:[%s8974_s3 + $0xd8] sm:$0xff] }
 0x689   : > { %v2227_v45 = vmul.f32 %v6358_v8, %v2193_v11  ;;  %6369 = vrcp.f32 %v1428_v34  ;;  %v6104_v34 = vld [vmem:[%s8974_s3 + $0xd0] sm:$0xff] }
 0x68b   : > { %v2235_v63 = vpack.c.bf16 %v2227_v45, %v2226_v59  ;;  %3271 = vmatpush.bf16.msra.mxu2 %v6108_v23 }
 0x68c   : > { %v6364_v16 = vpop.eup %6363 }
 0x68d   : > { %5529 = vmatmul.msk.bf16.gmra.mxu2 %vm1229_vm1, %v2235_v63  ;;  %v6366_v15 = vpop.eup %6365  ;;  %v1529_v41 = vmul.f32 %v6364_v16, %v7537_v40  ;;  %v1432_v25 = vpop.xlane.xlu2 %1431 }
 0x68e   : > { %v1528_v43 = vmul.f32 %v6366_v15, %v7528_v44  ;;  %v6368_v1 = vpop.eup %6367  ;;  %6371 = vrcp.f32 %v1432_v25  ;;  %v1436_v52 = vpop.xlane.xlu1 %1435  ;;  %v6102_v25 = vld [vmem:[%s8974_s3 + $0xc0] sm:$0xff] }
 0x68f   : > { %v6370_v40 = vpop.eup %6369  ;;  %v1531_v44 = vmul.f32 %v6368_v1, %v7554_v61  ;;  %6373 = vrcp.f32 %v1434_v13  ;;  %3272 = vmatpush.bf16.msra.mxu2 %v6107_v46 }
 0x690   : > { %v7723_v36 = vpop.f32.mrf.mxu1  ;;  %5541 = vmatmul.msk.bf16.gmra.mxu3 %vm1229_vm1, %v1539_v35  ;;  %v1540_v47 = vpack.c.bf16 %v1529_v41, %v1528_v43  ;;  %v1530_v14 = vmul.f32 %v6370_v40, %v9010_v2  ;;  %v6106_v41 = vld [vmem:[%s8974_s3 + $0xe0] sm:$0xff] }
 0x692   : > { %v1541_v48 = vpack.c.bf16 %v1531_v44, %v1530_v14  ;;  %v6103_v44 = vld [vmem:[%s8974_s3 + $0xc8] sm:$0xff] }
 0x693   : > { %3273 = vmatpush.bf16.msra.mxu2 %v6106_v41 }
 0x694   : > { %v6372_v9 = vpop.eup %6371 }
 0x695   : > { %v6374_v61 = vpop.eup %6373  ;;  %v1532_v0 = vmul.f32 %v6372_v9, %v9011_v58  ;;  %v1438_v28 = vpop.xlane.xlu2 %1437 }
 0x696   : > { %v1533_v3 = vmul.f32 %v6374_v61, %v9012_v50  ;;  %6375 = vrcp.f32 %v1438_v28 }
 0x697   : > { %6377 = vrcp.f32 %v1436_v52  ;;  %3274 = vmatpush.bf16.msra.mxu2 %v6105_v33 }
 0x698   : > { %v7726_v4 = vpop.f32.mrf.mxu1  ;;  %v1542_v62 = vpack.c.bf16 %v1533_v3, %v1532_v0 }
 0x69b   : > { %3275 = vmatpush.bf16.msra.mxu2 %v6104_v34 }
 0x69c   : > { %v6376_v37 = vpop.eup %6375 }
 0x69d   : > { %2728 = vmatmul.bf16.vlgmr.msrb.gmra.mxu2 %v7070_v53  ;;  %v6378_v22 = vpop.eup %6377  ;;  %v1535_v26 = vmul.f32 %v6376_v37, %v9013_v12 }
 0x69e   : > { %v1534_v19 = vmul.f32 %v6378_v22, %v9014_v49 }
 0x69f   : > { %3276 = vmatpush.bf16.msra.mxu2 %v6103_v44 }
 0x6a0   : > { %v2286_v51 = vpop.f32.mrf.mxu2  ;;  %v7731_v7 = vpop.f32.mrf.mxu1  ;;  %5542 = vmatmul.msk.bf16.gmra.mxu3 %vm1229_vm1, %v1540_v47  ;;  %v1543_v8 = vpack.c.bf16 %v1535_v26, %v1534_v19 }
 0x6a1   : > { %v2485_v19 = vpop.f32.mrf.mxu0 }
 0x6a3   : > { %3277 = vmatpush.bf16.msra.mxu2 %v6102_v25 }
 0x6a8   : > { %v7734_v55 = vpop.f32.mrf.mxu2  ;;  %v7736_v5 = vpop.f32.mrf.mxu1 }
 0x6a9   : > { %v2778_v44 = vpack.c.bf16 %v7736_v5, %v7731_v7 }
 0x6ad   : > { %2733 = vmatmul.bf16.gmra.mxu2 %v7107_v18 }
 0x6b0   : > { %v2291_v21 = vpop.f32.mrf.mxu2  ;;  %v7741_v17 = vpop.f32.mrf.mxu1  ;;  %5543 = vmatmul.msk.bf16.gmra.mxu3 %vm1229_vm1, %v1541_v48 }
 0x6b8   : > { %v7744_v57 = vpop.f32.mrf.mxu2  ;;  %v7746_v38 = vpop.f32.mrf.mxu1 }
 0x6bd   : > { %2738 = vmatmul.bf16.gmra.mxu2 %v7119_v31 }
 0x6c0   : > { %v2296_v10 = vpop.f32.mrf.mxu2  ;;  %v7751_v32 = vpop.f32.mrf.mxu1  ;;  %5544 = vmatmul.msk.bf16.gmra.mxu3 %vm1229_vm1, %v1542_v62 }
 0x6c8   : > { %v7754_v24 = vpop.f32.mrf.mxu2  ;;  %v7756_v60 = vpop.f32.mrf.mxu1 }
 0x6cd   : > { %2743 = vmatmul.bf16.gmra.mxu2 %v7148_v27 }
 0x6d0   : > { %v2301_v30 = vpop.f32.mrf.mxu2  ;;  %v7761_v11 = vpop.f32.mrf.mxu1  ;;  %5545 = vmatmul.msk.bf16.gmra.mxu3 %vm1229_vm1, %v1543_v8 }
 0x6d8   : > { %v7764_v59 = vpop.f32.mrf.mxu2  ;;  %v2637_v45 = vpop.f32.mrf.mxu1 }
 0x6d9   : > { %v2781_v54 = vpack.c.bf16 %v2637_v45, %v7761_v11  ;;  %v2779_v45 = vpack.c.bf16 %v7746_v38, %v7741_v17  ;;  %v2813_v17 = vsel %vm1229_vm1, %v2778_v44, 0 }
 0x6dd   : > { %2748 = vmatmul.bf16.gmra.mxu2 %v7171_v42 }
 0x6e0   : > { %v2306_v20 = vpop.f32.mrf.mxu2  ;;  %v2640_v63 = vpop.f32.mrf.mxu1 }
 0x6e3   : > { %v2371_v56 = vpop.f32.mrf.mxu3 }
 0x6e4   : > { %v7773_v35 = vadd.f32 %v2371_v56, %v2286_v51  ;;  %v2822_v56 = vsel %vm1229_vm1, %v2781_v54, 0 }
 0x6e8   : > { %v7778_v16 = vpop.f32.mrf.mxu2  ;;  %v2642_v15 = vpop.f32.mrf.mxu1 }
 0x6eb   : > { %v7783_v43 = vpop.f32.mrf.mxu3 }
 0x6ed   : > { %2753 = vmatmul.bf16.gmra.mxu2 %v7184_v6 }
 0x6f0   : > { %v2311_v47 = vpop.f32.mrf.mxu2  ;;  %v2645_v51 = vpop.f32.mrf.mxu1 }
 0x6f3   : > { %v2376_v1 = vpop.f32.mrf.mxu3 }
 0x6f4   : > { %v7792_v40 = vadd.f32 %v2376_v1, %v2291_v21 }
 0x6f8   : > { %v7797_v2 = vpop.f32.mrf.mxu2  ;;  %v2647_v14 = vpop.f32.mrf.mxu1 }
 0x6f9   : > { %v2783_v62 = vpack.c.bf16 %v2647_v14, %v2645_v51 }
 0x6fb   : > { %v7802_v48 = vpop.f32.mrf.mxu3  ;;  %v2828_v37 = vsel %vm1229_vm1, %v2783_v62, 0  ;;  %v2525_v62 = vmul.f32 0.17677669, %v2485_v19 }
 0x6fd   : > { %2758 = vmatmul.bf16.gmra.mxu2 %v7195_v39 }
 0x700   : > { %v2316_v13 = vpop.f32.mrf.mxu2  ;;  %v2650_v21 = vpop.f32.mrf.mxu1 }
 0x703   : > { %v2381_v9 = vpop.f32.mrf.mxu3 }
 0x704   : > { %v7805_v61 = vadd.f32 %v2381_v9, %v2296_v10  ;;  %v2782_v10 = vpack.c.bf16 %v2642_v15, %v2640_v63  ;;  %v2487_v63 = vpop.f32.mrf.mxu0  ;;  %v2780_v15 = vpack.c.bf16 %v7756_v60, %v7751_v32  ;;  %v2816_v32 = vsel %vm1229_vm1, %v2779_v45, 0 }
 0x706   : > { %v2825_v49 = vsel %vm1229_vm1, %v2782_v10, 0  ;;  %v2819_v51 = vsel %vm1229_vm1, %v2780_v15, 0 }
 0x708   : > { %v7807_v58 = vpop.f32.mrf.mxu2  ;;  %v2652_v0 = vpop.f32.mrf.mxu1 }
 0x709   : > { %v2784_v50 = vpack.c.bf16 %v2652_v0, %v2650_v21 }
 0x70b   : > { %v2831_v3 = vsel %vm1229_vm1, %v2784_v50, 0  ;;  %v7810_v28 = vpop.f32.mrf.mxu3  ;;  %v2526_v50 = vmul.f32 0.17677669, %v2487_v63 }
 0x70c   : > { %2833 = vmatpush.bf16.xpose.msrb.mxu3 %v2831_v3 }
 0x70d   : > { %2763 = vmatmul.bf16.gmra.mxu2 %v7260_v29 }
 0x710   : > { %v2321_v52 = vpop.f32.mrf.mxu2 }
 0x713   : > { %v2386_v22 = vpop.f32.mrf.mxu3 }
 0x714   : > { %2834 = vmatpush.bf16.xpose.msrb.mxu3 %v2828_v37  ;;  %v7814_v12 = vadd.f32 %v2386_v22, %v2301_v30  ;;  %v2769_v22 = vpack.c.bf16 %v2526_v50, %v2525_v62 }
 0x718   : > { %v7816_v26 = vpop.f32.mrf.mxu2 }
 0x71b   : > { %v7819_v8 = vpop.f32.mrf.mxu3 }
 0x71c   : > { %2835 = vmatpush.bf16.xpose.msrb.mxu3 %v2825_v49 }
 0x71d   : > { %3278 = vmatmul.bf16.vlgmr.msra.gmra.mxu2 %v7070_v53 }
 0x720   : > { %v7823_v23 = vpop.f32.mrf.mxu2 }
 0x723   : > { %v2391_v46 = vpop.f32.mrf.mxu3 }
 0x724   : > { %2836 = vmatpush.bf16.xpose.msrb.mxu3 %v2822_v56  ;;  %v7826_v30 = vadd.f32 %v2391_v46, %v2306_v20  ;;  %v2490_v20 = vpop.f32.mrf.mxu0 }
 0x725   : > { %v2527_v19 = vmul.f32 0.17677669, %v2490_v20 }
 0x728   : > { %v7830_v41 = vpop.f32.mrf.mxu2 }
 0x729   : > { %v3002_v33 = vpack.c.bf16 %v7830_v41, %v7823_v23 }
 0x72b   : > { %v7835_v11 = vpop.f32.mrf.mxu3 }
 0x72c   : > { %2837 = vmatpush.bf16.xpose.msrb.mxu3 %v2819_v51  ;;  %v2492_v21 = vpop.f32.mrf.mxu0 }
 0x72d   : > { %3283 = vmatmul.bf16.gmra.mxu2 %v7107_v18  ;;  %v2528_v56 = vmul.f32 0.17677669, %v2492_v21 }
 0x72f   : > { %v2770_v15 = vpack.c.bf16 %v2528_v56, %v2527_v19 }
 0x730   : > { %v7840_v34 = vpop.f32.mrf.mxu2 }
 0x733   : > { %v2396_v60 = vpop.f32.mrf.mxu3 }
 0x734   : > { %2838 = vmatpush.bf16.xpose.msrb.mxu3 %v2816_v32  ;;  %v7843_v1 = vadd.f32 %v2396_v60, %v2311_v47  ;;  %v2777_v47 = vpack.c.bf16 %v7726_v4, %v7723_v36  ;;  %v2495_v5 = vpop.f32.mrf.mxu0 }
 0x735   : > { %v2529_v44 = vmul.f32 0.17677669, %v2495_v5 }
 0x736   : > { %v2810_v7 = vsel %vm1229_vm1, %v2777_v47, 0 }
 0x738   : > { %v7847_v14 = vpop.f32.mrf.mxu2 }
 0x739   : > { %v3003_v25 = vpack.c.bf16 %v7847_v14, %v7840_v34 }
 0x73b   : > { %v7852_v38 = vpop.f32.mrf.mxu3 }
 0x73c   : > { %2839 = vmatpush.bf16.xpose.msrb.mxu3 %v2813_v17  ;;  %v2497_v4 = vpop.f32.mrf.mxu0 }
 0x73d   : > { %3288 = vmatmul.bf16.gmra.mxu2 %v7119_v31  ;;  %v2530_v60 = vmul.f32 0.17677669, %v2497_v4 }
 0x73f   : > { %v2771_v21 = vpack.c.bf16 %v2530_v60, %v2529_v44  ;;  %v6116_v60 = vld [vmem:[%s8975_s4 + $0xf0] sm:$0xff]  ;;  %v6115_v44 = vld [vmem:[%s8975_s4 + $0xe8] sm:$0xff] }
 0x740   : > { %v7857_v9 = vpop.f32.mrf.mxu2 }
 0x743   : > { %v2401_v0 = vpop.f32.mrf.mxu3 }
 0x744   : > { %2840 = vmatpush.bf16.xpose.msrb.mxu3 %v2810_v7  ;;  %v7860_v3 = vadd.f32 %v2401_v0, %v2316_v13  ;;  %v2500_v46 = vpop.f32.mrf.mxu0 }
 0x745   : > { %v2531_v0 = vmul.f32 0.17677669, %v2500_v46 }
 0x748   : > { %v7862_v37 = vpop.f32.mrf.mxu2 }
 0x749   : > { %v3004_v10 = vpack.c.bf16 %v7862_v37, %v7857_v9 }
 0x74b   : > { %5690 = vmatmul.msk.bf16.vlgmr.msrb.gmra.mxu3 %vm1229_vm1, %v2769_v22  ;;  %v7867_v36 = vpop.f32.mrf.mxu3 }
 0x74c   : > { %v2502_v32 = vpop.f32.mrf.mxu0 }
 0x74d   : > { %3293 = vmatmul.bf16.gmra.mxu2 %v7148_v27  ;;  %v2532_v47 = vmul.f32 0.17677669, %v2502_v32  ;;  %v6117_v32 = vld [vmem:[%s8975_s4 + $0xf8] sm:$0xff] }
 0x74e   : > { %3400 = vmatpush.bf16.msra.mxu3 %v6117_v32 }
 0x74f   : > { %v2772_v62 = vpack.c.bf16 %v2532_v47, %v2531_v0  ;;  %v6114_v0 = vld [vmem:[%s8975_s4 + $0xe0] sm:$0xff] }
 0x750   : > { %v7870_v49 = vpop.f32.mrf.mxu2 }
 0x752   : > { %3401 = vmatpush.bf16.msra.mxu3 %v6116_v60 }
 0x753   : > { %v2406_v54 = vpop.f32.mrf.mxu3 }
 0x754   : > { %v7872_v13 = vadd.f32 %v2406_v54, %v2321_v52  ;;  %v2505_v52 = vpop.f32.mrf.mxu0 }
 0x755   : > { %v2533_v54 = vmul.f32 0.17677669, %v2505_v52 }
 0x756   : > { %3402 = vmatpush.bf16.msra.mxu3 %v6115_v44 }
 0x758   : > { %v7874_v63 = vpop.f32.mrf.mxu2 }
 0x759   : > { %v3005_v51 = vpack.c.bf16 %v7874_v63, %v7870_v49 }
 0x75a   : > { %3403 = vmatpush.bf16.msra.mxu3 %v6114_v0 }
 0x75b   : > { %5691 = vmatmul.msk.bf16.gmra.mxu3 %vm1229_vm1, %v2770_v15  ;;  %v7925_v49 = vpop.f32.mrf.mxu3 }
 0x75c   : > { %v2507_v7 = vpop.f32.mrf.mxu0 }
 0x75d   : > { %3298 = vmatmul.bf16.gmra.mxu2 %v7171_v42  ;;  %v2534_v5 = vmul.f32 0.17677669, %v2507_v7 }
 0x75f   : > { %v2773_v19 = vpack.c.bf16 %v2534_v5, %v2533_v54  ;;  %v6113_v54 = vld [vmem:[%s8975_s4 + $0xd8] sm:$0xff] }
 0x760   : > { %v2749_v45 = vpop.f32.mrf.mxu2  ;;  %3404 = vmatpush.bf16.msra.mxu3 %v6113_v54 }
 0x764   : > { %v2510_v22 = vpop.f32.mrf.mxu0 }
 0x765   : > { %v2535_v47 = vmul.f32 0.17677669, %v2510_v22  ;;  %v6112_v22 = vld [vmem:[%s8975_s4 + $0xd0] sm:$0xff] }
 0x766   : > { %3405 = vmatpush.bf16.msra.mxu3 %v6112_v22 }
 0x768   : > { %v2751_v17 = vpop.f32.mrf.mxu2 }
 0x769   : > { %v3006_v44 = vpack.c.bf16 %v2751_v17, %v2749_v45 }
 0x76b   : > { %5692 = vmatmul.msk.bf16.gmra.mxu3 %vm1229_vm1, %v2771_v21 }
 0x76c   : > { %v2512_v15 = vpop.f32.mrf.mxu0 }
 0x76d   : > { %3303 = vmatmul.bf16.gmra.mxu2 %v7184_v6  ;;  %v2536_v52 = vmul.f32 0.17677669, %v2512_v15 }
 0x770   : > { %v2754_v20 = vpop.f32.mrf.mxu2 }
 0x774   : > { %v2515_v21 = vpop.f32.mrf.mxu0 }
 0x778   : > { %v2756_v50 = vpop.f32.mrf.mxu2 }
 0x779   : > { %v3007_v15 = vpack.c.bf16 %v2756_v50, %v2754_v20 }
 0x77b   : > { %5693 = vmatmul.msk.bf16.gmra.mxu3 %vm1229_vm1, %v2772_v62  ;;  %v2774_v62 = vpack.c.bf16 %v2536_v52, %v2535_v47  ;;  %v2537_v52 = vmul.f32 0.17677669, %v2515_v21 }
 0x77c   : > { %v2517_v32 = vpop.f32.mrf.mxu0 }
 0x77d   : > { %3308 = vmatmul.bf16.gmra.mxu2 %v7195_v39  ;;  %v2538_v60 = vmul.f32 0.17677669, %v2517_v32 }
 0x77f   : > { %v2775_v47 = vpack.c.bf16 %v2538_v60, %v2537_v52 }
 0x780   : > { %v2759_v4 = vpop.f32.mrf.mxu2 }
 0x788   : > { %v2761_v56 = vpop.f32.mrf.mxu2 }
 0x78b   : > { %5694 = vmatmul.msk.bf16.gmra.mxu3 %vm1229_vm1, %v2773_v19  ;;  %v3008_v19 = vpack.c.bf16 %v2761_v56, %v2759_v4  ;;  %v2520_v4 = vpop.f32.mrf.mxu0  ;;  %v6110_v56 = vld [vmem:[%s8975_s4 + $0xc0] sm:$0xff] }
 0x78c   : > { %v2539_v20 = vmul.f32 0.17677669, %v2520_v4 }
 0x78d   : > { %3313 = vmatmul.bf16.gmra.mxu2 %v7260_v29 }
 0x790   : > { %v2764_v46 = vpop.f32.mrf.mxu2 }
 0x793   : > { %v2522_v45 = vpop.f32.mrf.mxu0 }
 0x794   : > { %v2540_v17 = vmul.f32 0.17677669, %v2522_v45 }
 0x796   : > { %v2776_v50 = vpack.c.bf16 %v2540_v17, %v2539_v20 }
 0x798   : > { %v2766_v7 = vpop.f32.mrf.mxu2 }
 0x799   : > { %v3009_v5 = vpack.c.bf16 %v2766_v7, %v2764_v46  ;;  %v6111_v46 = vld [vmem:[%s8975_s4 + $0xc8] sm:$0xff] }
 0x79a   : > { %3406 = vmatpush.bf16.msra.mxu3 %v6111_v46 }
 0x79b   : > { %5695 = vmatmul.msk.bf16.gmra.mxu3 %vm1229_vm1, %v2774_v62  ;;  %3010 = vmatpush.bf16.msra.mxu0 %v3009_v5 }
 0x79e   : > { %3407 = vmatpush.bf16.msra.mxu3 %v6110_v56 }
 0x79f   : > { %3011 = vmatpush.bf16.msra.mxu0 %v3008_v19 }
 0x7a3   : > { %3012 = vmatpush.bf16.msra.mxu0 %v3007_v15 }
 0x7a7   : > { %3013 = vmatpush.bf16.msra.mxu0 %v3006_v44 }
 0x7ab   : > { %5696 = vmatmul.msk.bf16.gmra.mxu3 %vm1229_vm1, %v2775_v47  ;;  %3014 = vmatpush.bf16.msra.mxu0 %v3005_v51 }
 0x7af   : > { %3015 = vmatpush.bf16.msra.mxu0 %v3004_v10 }
 0x7b3   : > { %3016 = vmatpush.bf16.msra.mxu0 %v3003_v25 }
 0x7b7   : > { %3017 = vmatpush.bf16.msra.mxu0 %v3002_v33 }
 0x7bb   : > { %5697 = vmatmul.msk.bf16.gmra.mxu3 %vm1229_vm1, %v2776_v50 }
 0x7cb   : > { %3408 = vmatmul.bf16.vlgmr.msra.gmra.mxu3 %v7070_v53 }
 0x7ce   : > { %v2842_v9 = vpop.f32.mrf.mxu3 }
 0x7cf   : > { %2882 = vmax.xlane.f32.xlu0 %v2842_v9 }
 0x7d6   : > { %v2844_v37 = vpop.f32.mrf.mxu3 }
 0x7d7   : > { %2884 = vmax.xlane.f32.xlu1 %v2844_v37 }
 0x7db   : > { %3413 = vmatmul.bf16.gmra.mxu3 %v7107_v18 }
 0x7de   : > { %v2847_v34 = vpop.f32.mrf.mxu3 }
 0x7df   : > { %2886 = vmax.xlane.f32.xlu2 %v2847_v34 }
 0x7e6   : > { %v2849_v14 = vpop.f32.mrf.mxu3 }
 0x7e7   : > { %2888 = vmax.xlane.f32.xlu0 %v2849_v14 }
 0x7eb   : > { %3418 = vmatmul.bf16.gmra.mxu3 %v7119_v31 }
 0x7ee   : > { %v2852_v23 = vpop.f32.mrf.mxu3 }
 0x7ef   : > { %2890 = vmax.xlane.f32.xlu1 %v2852_v23 }
 0x7f6   : > { %v7930_v41 = vpop.f32.mrf.mxu3 }
 0x7f7   : > { %2892 = vmax.xlane.f32.xlu2 %v7930_v41 }
 0x7fb   : > { %3423 = vmatmul.bf16.gmra.mxu3 %v7148_v27 }
 0x7fe   : > { %v7934_v33 = vpop.f32.mrf.mxu3 }
 0x7ff   : > { %2894 = vmax.xlane.f32.xlu0 %v7934_v33 }
 0x806   : > { %v7937_v25 = vpop.f32.mrf.mxu3 }
 0x807   : > { %2896 = vmax.xlane.f32.xlu1 %v7937_v25 }
 0x80b   : > { %3428 = vmatmul.bf16.gmra.mxu3 %v7171_v42 }
 0x80e   : > { %v7941_v10 = vpop.f32.mrf.mxu3 }
 0x80f   : > { %2898 = vmax.xlane.f32.xlu2 %v7941_v10 }
 0x816   : > { %v7944_v63 = vpop.f32.mrf.mxu3 }
 0x817   : > { %2900 = vmax.xlane.f32.xlu0 %v7944_v63 }
 0x81b   : > { %3433 = vmatmul.bf16.gmra.mxu3 %v7184_v6 }
 0x81e   : > { %v7948_v51 = vpop.f32.mrf.mxu3 }
 0x81f   : > { %2902 = vmax.xlane.f32.xlu1 %v7948_v51 }
 0x826   : > { %v7951_v21 = vpop.f32.mrf.mxu3 }
 0x827   : > { %2904 = vmax.xlane.f32.xlu2 %v7951_v21 }
 0x82b   : > { %3438 = vmatmul.bf16.gmra.mxu3 %v7195_v39 }
 0x82e   : > { %v7955_v7 = vpop.f32.mrf.mxu3 }
 0x82f   : > { %2906 = vmax.xlane.f32.xlu0 %v7955_v7 }
 0x836   : > { %v7958_v0 = vpop.f32.mrf.mxu3 }
 0x837   : > { %2908 = vmax.xlane.f32.xlu1 %v7958_v0 }
 0x83b   : > { %3443 = vmatmul.bf16.gmra.mxu3 %v7260_v29 }
 0x83e   : > { %v7962_v62 = vpop.f32.mrf.mxu3 }
 0x83f   : > { %2910 = vmax.xlane.f32.xlu2 %v7962_v62 }
 0x842   : > { %v2883_v5 = vpop.xlane.xlu0 %2882 }
 0x843   : > { %v2914_v54 = vsub.f32 %v2842_v9, %v2883_v5 }
 0x845   : > { %v2930_v19 = vmul.f32 1.442695, %v2914_v54 }
 0x846   : > { %v7965_v32 = vpop.f32.mrf.mxu3 }
 0x847   : > { %6379 = vpow2.f32 %v2930_v19  ;;  %2912 = vmax.xlane.f32.xlu0 %v7965_v32 }
 0x84a   : > { %v2885_v22 = vpop.xlane.xlu1 %2884 }
 0x84b   : > { %v2915_v15 = vsub.f32 %v2844_v37, %v2885_v22 }
 0x84d   : > { %v6380_v46 = vpop.eup %6379  ;;  %v2932_v60 = vmul.f32 1.442695, %v2915_v15 }
 0x84e   : > { %2962 = vadd.xlane.f32.xlu1 %v6380_v46  ;;  %v7968_v44 = vpop.f32.mrf.mxu3 }
 0x84f   : > { %6381 = vpow2.f32 %v2932_v60 }
 0x852   : > { %v2887_v52 = vpop.xlane.xlu2 %2886 }
 0x853   : > { %v2916_v4 = vsub.f32 %v2847_v34, %v2887_v52 }
 0x855   : > { %v6382_v56 = vpop.eup %6381  ;;  %v2934_v47 = vmul.f32 1.442695, %v2916_v4 }
 0x856   : > { %v2994_v45 = vpack.c.bf16 %v6382_v56, %v6380_v46  ;;  %2964 = vadd.xlane.f32.xlu2 %v6382_v56  ;;  %v7970_v17 = vpop.f32.mrf.mxu3 }
 0x857   : > { %6383 = vpow2.f32 %v2934_v47 }
 0x858   : > { %3018 = vmatmul.bf16.vlgmr.msra.gmra.mxu0 %v2994_v45 }
 0x85a   : > { %v2889_v20 = vpop.xlane.xlu0 %2888 }
 0x85b   : > { %v2917_v50 = vsub.f32 %v2849_v14, %v2889_v20 }
 0x85d   : > { %v6384_v9 = vpop.eup %6383  ;;  %v2936_v37 = vmul.f32 1.442695, %v2917_v50 }
 0x85e   : > { %2966 = vadd.xlane.f32.xlu0 %v6384_v9  ;;  %v7972_v5 = vpop.f32.mrf.mxu3 }
 0x85f   : > { %6385 = vpow2.f32 %v2936_v37 }
 0x862   : > { %v2891_v54 = vpop.xlane.xlu1 %2890 }
 0x863   : > { %v2918_v19 = vsub.f32 %v2852_v23, %v2891_v54 }
 0x865   : > { %v6386_v22 = vpop.eup %6385  ;;  %v2938_v34 = vmul.f32 1.442695, %v2918_v19 }
 0x866   : > { %2968 = vadd.xlane.f32.xlu1 %v6386_v22  ;;  %v7974_v15 = vpop.f32.mrf.mxu3  ;;  %v2995_v46 = vpack.c.bf16 %v6386_v22, %v6384_v9 }
 0x867   : > { %6387 = vpow2.f32 %v2938_v34 }
 0x868   : > { %3023 = vmatmul.bf16.gmra.mxu0 %v2995_v46 }
 0x86a   : > { %v2893_v60 = vpop.xlane.xlu2 %2892 }
 0x86b   : > { %v2919_v52 = vsub.f32 %v7930_v41, %v2893_v60 }
 0x86d   : > { %v6388_v14 = vpop.eup %6387  ;;  %v2940_v4 = vmul.f32 1.442695, %v2919_v52 }
 0x86e   : > { %2970 = vadd.xlane.f32.xlu2 %v6388_v14  ;;  %v7977_v56 = vpop.f32.mrf.mxu3 }
 0x86f   : > { %6389 = vpow2.f32 %v2940_v4 }
 0x872   : > { %v2895_v47 = vpop.xlane.xlu0 %2894 }
 0x873   : > { %v2920_v23 = vsub.f32 %v7934_v33, %v2895_v47 }
 0x875   : > { %v6390_v45 = vpop.eup %6389  ;;  %v2942_v20 = vmul.f32 1.442695, %v2920_v23 }
 0x876   : > { %2972 = vadd.xlane.f32.xlu0 %v6390_v45  ;;  %v7980_v50 = vpop.f32.mrf.mxu3  ;;  %v2996_v9 = vpack.c.bf16 %v6390_v45, %v6388_v14 }
 0x877   : > { %6391 = vpow2.f32 %v2942_v20 }
 0x878   : > { %3028 = vmatmul.bf16.gmra.mxu0 %v2996_v9 }
 0x87a   : > { %v2897_v37 = vpop.xlane.xlu1 %2896 }
 0x87b   : > { %v2921_v41 = vsub.f32 %v7937_v25, %v2897_v37  ;;  %v6101_v25 = vld [vmem:[%s8977_s6 + $0x28] sm:$0xff] }
 0x87c   : > { %3146 = vmatpush.bf16.msra.mxu1 %v6101_v25  ;;  %v6123_v25 = vld [vmem:[%s8976_s5 + $0xe8] sm:$0xff] }
 0x87d   : > { %v6392_v54 = vpop.eup %6391  ;;  %v2944_v19 = vmul.f32 1.442695, %v2921_v41 }
 0x87e   : > { %2974 = vadd.xlane.f32.xlu1 %v6392_v54  ;;  %v7983_v22 = vpop.f32.mrf.mxu3 }
 0x87f   : > { %6393 = vpow2.f32 %v2944_v19 }
 0x882   : > { %v2899_v34 = vpop.xlane.xlu2 %2898 }
 0x883   : > { %v2922_v33 = vsub.f32 %v7941_v10, %v2899_v34 }
 0x885   : > { %v6394_v46 = vpop.eup %6393  ;;  %v2946_v60 = vmul.f32 1.442695, %v2922_v33 }
 0x886   : > { %2976 = vadd.xlane.f32.xlu2 %v6394_v46  ;;  %v7986_v52 = vpop.f32.mrf.mxu3  ;;  %v2997_v14 = vpack.c.bf16 %v6394_v46, %v6392_v54 }
 0x887   : > { %6395 = vpow2.f32 %v2946_v60 }
 0x888   : > { %3033 = vmatmul.bf16.gmra.mxu0 %v2997_v14 }
 0x88a   : > { %v2901_v4 = vpop.xlane.xlu0 %2900 }
 0x88b   : > { %v2923_v47 = vsub.f32 %v7944_v63, %v2901_v4  ;;  %v6125_v63 = vld [vmem:[%s8976_s5 + $0xf8] sm:$0xff] }
 0x88c   : > { %3514 = vmatpush.bf16.msrb.mxu0 %v6125_v63  ;;  %v6120_v63 = vld [vmem:[%s8976_s5 + $0xd0] sm:$0xff] }
 0x88d   : > { %v6396_v23 = vpop.eup %6395  ;;  %v2948_v45 = vmul.f32 1.442695, %v2923_v47 }
 0x88e   : > { %2978 = vadd.xlane.f32.xlu0 %v6396_v23  ;;  %v7992_v10 = vpop.f32.mrf.mxu3 }
 0x88f   : > { %6397 = vpow2.f32 %v2948_v45 }
 0x892   : > { %v2903_v20 = vpop.xlane.xlu1 %2902 }
 0x893   : > { %v2924_v9 = vsub.f32 %v7948_v51, %v2903_v20  ;;  %v6124_v51 = vld [vmem:[%s8976_s5 + $0xf0] sm:$0xff] }
 0x894   : > { %3515 = vmatpush.bf16.msrb.mxu0 %v6124_v51 }
 0x895   : > { %v6398_v37 = vpop.eup %6397  ;;  %v2950_v41 = vmul.f32 1.442695, %v2924_v9 }
 0x896   : > { %2980 = vadd.xlane.f32.xlu1 %v6398_v37  ;;  %v7995_v54 = vpop.f32.mrf.mxu3  ;;  %v2998_v19 = vpack.c.bf16 %v6398_v37, %v6396_v23  ;;  %v6100_v37 = vld [vmem:[%s8977_s6 + $0x20] sm:$0xff] }
 0x897   : > { %6399 = vpow2.f32 %v2950_v41  ;;  %3147 = vmatpush.bf16.msra.mxu1 %v6100_v37 }
 0x898   : > { %3038 = vmatmul.bf16.gmra.mxu0 %v2998_v19 }
 0x899   : > { %3516 = vmatpush.bf16.msrb.mxu0 %v6123_v25 }
 0x89a   : > { %v2905_v34 = vpop.xlane.xlu2 %2904 }
 0x89b   : > { %v2925_v33 = vsub.f32 %v7951_v21, %v2905_v34  ;;  %v6122_v21 = vld [vmem:[%s8976_s5 + $0xe0] sm:$0xff] }
 0x89d   : > { %v6400_v46 = vpop.eup %6399  ;;  %v2952_v60 = vmul.f32 1.442695, %v2925_v33  ;;  %3517 = vmatpush.bf16.msrb.mxu0 %v6122_v21 }
 0x89e   : > { %2982 = vadd.xlane.f32.xlu2 %v6400_v46  ;;  %v8004_v14 = vpop.f32.mrf.mxu3 }
 0x89f   : > { %6401 = vpow2.f32 %v2952_v60  ;;  %v6119_v60 = vld [vmem:[%s8976_s5 + $0xc8] sm:$0xff] }
 0x8a2   : > { %v2907_v4 = vpop.xlane.xlu0 %2906 }
 0x8a3   : > { %v2926_v47 = vsub.f32 %v7955_v7, %v2907_v4  ;;  %v6121_v7 = vld [vmem:[%s8976_s5 + $0xd8] sm:$0xff] }
 0x8a4   : > { %3518 = vmatpush.bf16.msrb.mxu0 %v6121_v7 }
 0x8a5   : > { %v6402_v23 = vpop.eup %6401  ;;  %v2954_v45 = vmul.f32 1.442695, %v2926_v47  ;;  %v6118_v47 = vld [vmem:[%s8976_s5 + $0xc0] sm:$0xff] }
 0x8a6   : > { %2984 = vadd.xlane.f32.xlu0 %v6402_v23  ;;  %v3436_v20 = vpop.f32.mrf.mxu3  ;;  %v2999_v9 = vpack.c.bf16 %v6402_v23, %v6400_v46 }
 0x8a7   : > { %6403 = vpow2.f32 %v2954_v45 }
 0x8a8   : > { %3043 = vmatmul.bf16.gmra.mxu0 %v2999_v9 }
 0x8a9   : > { %3519 = vmatpush.bf16.msrb.mxu0 %v6120_v63 }
 0x8aa   : > { %v2909_v41 = vpop.xlane.xlu1 %2908 }
 0x8ab   : > { %v2927_v19 = vsub.f32 %v7958_v0, %v2909_v41 }
 0x8ad   : > { %v6404_v34 = vpop.eup %6403  ;;  %v2956_v33 = vmul.f32 1.442695, %v2927_v19  ;;  %3520 = vmatpush.bf16.msrb.mxu0 %v6119_v60 }
 0x8ae   : > { %2986 = vadd.xlane.f32.xlu1 %v6404_v34  ;;  %v3439_v46 = vpop.f32.mrf.mxu3 }
 0x8af   : > { %6405 = vpow2.f32 %v2956_v33 }
 0x8b1   : > { %3521 = vmatpush.bf16.msrb.mxu0 %v6118_v47 }
 0x8b2   : > { %v2911_v51 = vpop.xlane.xlu2 %2910 }
 0x8b3   : > { %v2928_v25 = vsub.f32 %v7962_v62, %v2911_v51 }
 0x8b5   : > { %v6406_v0 = vpop.eup %6405  ;;  %v2958_v4 = vmul.f32 1.442695, %v2928_v25 }
 0x8b6   : > { %2988 = vadd.xlane.f32.xlu2 %v6406_v0  ;;  %v3441_v21 = vpop.f32.mrf.mxu3  ;;  %v3000_v23 = vpack.c.bf16 %v6406_v0, %v6404_v34  ;;  %v3576_v0 = vpack.c.bf16 %v3436_v20, %v8004_v14 }
 0x8b7   : > { %6407 = vpow2.f32 %v2958_v4  ;;  %v3577_v34 = vpack.c.bf16 %v3441_v21, %v3439_v46  ;;  %v3575_v46 = vpack.c.bf16 %v7995_v54, %v7992_v10 }
 0x8b8   : > { %3048 = vmatmul.bf16.gmra.mxu0 %v3000_v23  ;;  %v3619_v47 = vsel %vm1229_vm1, %v3576_v0, 0 }
 0x8b9   : > { %v3622_v51 = vsel %vm1229_vm1, %v3577_v34, 0  ;;  %v3616_v14 = vsel %vm1229_vm1, %v3575_v46, 0 }
 0x8ba   : > { %v2913_v45 = vpop.xlane.xlu0 %2912 }
 0x8bb   : > { %v2929_v9 = vsub.f32 %v7965_v32, %v2913_v45 }
 0x8bd   : > { %v6408_v37 = vpop.eup %6407  ;;  %v2960_v7 = vmul.f32 1.442695, %v2929_v9 }
 0x8be   : > { %2990 = vadd.xlane.f32.xlu0 %v6408_v37  ;;  %v3444_v62 = vpop.f32.mrf.mxu3 }
 0x8bf   : > { %6409 = vpow2.f32 %v2960_v7 }
 0x8c1   : > { %v2963_v25 = vpop.xlane.xlu1 %2962 }
 0x8c2   : > { %6411 = vrcp.f32 %v2963_v25 }
 0x8c5   : > { %v6410_v41 = vpop.eup %6409 }
 0x8c6   : > { %2992 = vadd.xlane.f32.xlu1 %v6410_v41  ;;  %v3446_v19 = vpop.f32.mrf.mxu3  ;;  %v3001_v63 = vpack.c.bf16 %v6410_v41, %v6408_v37  ;;  %v3574_v41 = vpack.c.bf16 %v7986_v52, %v7983_v22 }
 0x8c7   : > { %v3578_v33 = vpack.c.bf16 %v3446_v19, %v3444_v62 }
 0x8c8   : > { %3053 = vmatmul.bf16.gmra.mxu0 %v3001_v63  ;;  %v6412_v23 = vpop.eup %6411  ;;  %v3613_v10 = vsel %vm1229_vm1, %v3574_v41, 0 }
 0x8c9   : > { %v3625_v60 = vsel %vm1229_vm1, %v3578_v33, 0  ;;  %v2965_v32 = vpop.xlane.xlu2 %2964  ;;  %v3573_v33 = vpack.c.bf16 %v7980_v50, %v7977_v56 }
 0x8ca   : > { %3627 = vmatpush.bf16.xpose.msrb.mxu1 %v3625_v60  ;;  %6413 = vrcp.f32 %v2965_v32  ;;  %v3572_v32 = vpack.c.bf16 %v7974_v15, %v7972_v5 }
 0x8cb   : > { %v3610_v22 = vsel %vm1229_vm1, %v3573_v33, 0 }
 0x8cc   : > { %v3607_v56 = vsel %vm1229_vm1, %v3572_v32, 0  ;;  %v3279_v32 = vpop.f32.mrf.mxu2 }
 0x8d0   : > { %v6414_v45 = vpop.eup %6413 }
 0x8d1   : > { %v2967_v20 = vpop.xlane.xlu0 %2966 }
 0x8d2   : > { %3628 = vmatpush.bf16.xpose.msrb.mxu1 %v3622_v51  ;;  %6415 = vrcp.f32 %v2967_v20 }
 0x8d5   : > { %v3019_v4 = vpop.f32.mrf.mxu0 }
 0x8d6   : > { %v3075_v21 = vmul.f32 %v6412_v23, %v3019_v4 }
 0x8d8   : > { %3522 = vmatmul.bf16.vlgmr.msrb.gmra.mxu0 %v7070_v53  ;;  %v6416_v54 = vpop.eup %6415 }
 0x8d9   : > { %v2969_v62 = vpop.xlane.xlu1 %2968 }
 0x8da   : > { %3629 = vmatpush.bf16.xpose.msrb.mxu1 %v3619_v47  ;;  %6417 = vrcp.f32 %v2969_v62  ;;  %v3571_v47 = vpack.c.bf16 %v7970_v17, %v7968_v44 }
 0x8dc   : > { %v3604_v5 = vsel %vm1229_vm1, %v3571_v47, 0 }
 0x8dd   : > { %v3021_v9 = vpop.f32.mrf.mxu0 }
 0x8de   : > { %v3076_v37 = vmul.f32 %v6414_v45, %v3021_v9 }
 0x8e0   : > { %v3091_v7 = vpack.c.bf16 %v3076_v37, %v3075_v21  ;;  %v6418_v19 = vpop.eup %6417 }
 0x8e1   : > { %v2971_v52 = vpop.xlane.xlu2 %2970 }
 0x8e2   : > { %5710 = vmatmul.msk.bf16.vlgmr.msra.gmra.mxu1 %vm1229_vm1, %v3091_v7  ;;  %6419 = vrcp.f32 %v2971_v52 }
 0x8e3   : > { %3630 = vmatpush.bf16.xpose.msrb.mxu1 %v3616_v14 }
 0x8e5   : > { %v3024_v53 = vpop.f32.mrf.mxu0 }
 0x8e6   : > { %v3077_v60 = vmul.f32 %v6416_v54, %v3024_v53 }
 0x8e8   : > { %3527 = vmatmul.bf16.gmra.mxu0 %v7107_v18  ;;  %v6420_v50 = vpop.eup %6419 }
 0x8e9   : > { %v2973_v25 = vpop.xlane.xlu0 %2972 }
 0x8ea   : > { %6421 = vrcp.f32 %v2973_v25 }
 0x8eb   : > { %3631 = vmatpush.bf16.xpose.msrb.mxu1 %v3613_v10 }
 0x8ed   : > { %v3026_v63 = vpop.f32.mrf.mxu0 }
 0x8ee   : > { %v3078_v34 = vmul.f32 %v6418_v19, %v3026_v63 }
 0x8f0   : > { %v3092_v51 = vpack.c.bf16 %v3078_v34, %v3077_v60  ;;  %v6422_v0 = vpop.eup %6421 }
 0x8f1   : > { %v2975_v15 = vpop.xlane.xlu1 %2974 }
 0x8f2   : > { %5711 = vmatmul.msk.bf16.gmra.mxu1 %vm1229_vm1, %v3092_v51  ;;  %6423 = vrcp.f32 %v2975_v15 }
 0x8f3   : > { %3632 = vmatpush.bf16.xpose.msrb.mxu1 %v3610_v22 }
 0x8f5   : > { %v3029_v18 = vpop.f32.mrf.mxu0 }
 0x8f6   : > { %v3079_v23 = vmul.f32 %v6420_v50, %v3029_v18 }
 0x8f8   : > { %3532 = vmatmul.bf16.gmra.mxu0 %v7119_v31  ;;  %v6424_v21 = vpop.eup %6423 }
 0x8f9   : > { %v2977_v46 = vpop.xlane.xlu2 %2976 }
 0x8fa   : > { %6425 = vrcp.f32 %v2977_v46 }
 0x8fb   : > { %3633 = vmatpush.bf16.xpose.msrb.mxu1 %v3607_v56 }
 0x8fd   : > { %v3031_v4 = vpop.f32.mrf.mxu0 }
 0x8fe   : > { %v3080_v45 = vmul.f32 %v6422_v0, %v3031_v4 }
 0x900   : > { %v3093_v9 = vpack.c.bf16 %v3080_v45, %v3079_v23  ;;  %v6426_v37 = vpop.eup %6425  ;;  %v3281_v23 = vpop.f32.mrf.mxu2 }
 0x901   : > { %v2979_v20 = vpop.xlane.xlu0 %2978 }
 0x902   : > { %5712 = vmatmul.msk.bf16.gmra.mxu1 %vm1229_vm1, %v3093_v9  ;;  %6427 = vrcp.f32 %v2979_v20 }
 0x903   : > { %3634 = vmatpush.bf16.xpose.msrb.mxu1 %v3604_v5 }
 0x905   : > { %v3034_v31 = vpop.f32.mrf.mxu0 }
 0x906   : > { %v3081_v14 = vmul.f32 %v6424_v21, %v3034_v31 }
 0x908   : > { %3537 = vmatmul.bf16.gmra.mxu0 %v7148_v27  ;;  %v6428_v41 = vpop.eup %6427  ;;  %v3284_v21 = vpop.f32.mrf.mxu2 }
 0x909   : > { %v2981_v62 = vpop.xlane.xlu1 %2980 }
 0x90a   : > { %6429 = vrcp.f32 %v2981_v62 }
 0x90d   : > { %v3036_v7 = vpop.f32.mrf.mxu0 }
 0x90e   : > { %v3082_v44 = vmul.f32 %v6426_v37, %v3036_v7 }
 0x910   : > { %v3094_v17 = vpack.c.bf16 %v3082_v44, %v3081_v14  ;;  %v6430_v10 = vpop.eup %6429  ;;  %v3286_v20 = vpop.f32.mrf.mxu2 }
 0x911   : > { %v2983_v33 = vpop.xlane.xlu2 %2982 }
 0x912   : > { %5713 = vmatmul.msk.bf16.gmra.mxu1 %vm1229_vm1, %v3094_v17  ;;  %6431 = vrcp.f32 %v2983_v33 }
 0x915   : > { %v3039_v53 = vpop.f32.mrf.mxu0 }
 0x916   : > { %v3083_v19 = vmul.f32 %v6428_v41, %v3039_v53  ;;  %v3320_v41 = vmul.f32 0.17677669, %v3281_v23 }
 0x918   : > { %3542 = vmatmul.bf16.gmra.mxu0 %v7171_v42  ;;  %v6432_v51 = vpop.eup %6431  ;;  %v3289_v53 = vpop.f32.mrf.mxu2 }
 0x919   : > { %v2985_v60 = vpop.xlane.xlu0 %2984  ;;  %v3323_v23 = vmul.f32 0.17677669, %v3289_v53 }
 0x91a   : > { %6433 = vrcp.f32 %v2985_v60  ;;  %v2374_v60 = vadd.f32 %v7783_v43, %v7734_v55  ;;  %v2379_v55 = vadd.f32 %v7802_v48, %v7744_v57  ;;  %v2384_v57 = vadd.f32 %v7810_v28, %v7754_v24 }
 0x91d   : > { %v3041_v54 = vpop.f32.mrf.mxu0 }
 0x91e   : > { %v3084_v27 = vmul.f32 %v6430_v10, %v3041_v54  ;;  %v3319_v54 = vmul.f32 0.17677669, %v3279_v32 }
 0x920   : > { %v3095_v63 = vpack.c.bf16 %v3084_v27, %v3083_v19  ;;  %v6434_v22 = vpop.eup %6433  ;;  %v3563_v27 = vpack.c.bf16 %v3320_v41, %v3319_v54 }
 0x921   : > { %v2987_v56 = vpop.xlane.xlu1 %2986 }
 0x922   : > { %5714 = vmatmul.msk.bf16.gmra.mxu1 %vm1229_vm1, %v3095_v63  ;;  %6435 = vrcp.f32 %v2987_v56  ;;  %v3291_v63 = vpop.f32.mrf.mxu2 }
 0x925   : > { %v3044_v34 = vpop.f32.mrf.mxu0 }
 0x926   : > { %v3085_v25 = vmul.f32 %v6432_v51, %v3044_v34 }
 0x928   : > { %3547 = vmatmul.bf16.gmra.mxu0 %v7184_v6  ;;  %v6436_v4 = vpop.eup %6435 }
 0x929   : > { %v2989_v50 = vpop.xlane.xlu2 %2988 }
 0x92a   : > { %6437 = vrcp.f32 %v2989_v50 }
 0x92d   : > { %v3046_v52 = vpop.f32.mrf.mxu0 }
 0x92e   : > { %v3086_v42 = vmul.f32 %v6434_v22, %v3046_v52  ;;  %v3322_v22 = vmul.f32 0.17677669, %v3286_v20 }
 0x930   : > { %v3096_v18 = vpack.c.bf16 %v3086_v42, %v3085_v25  ;;  %v6438_v47 = vpop.eup %6437  ;;  %v3321_v25 = vmul.f32 0.17677669, %v3284_v21  ;;  %v3294_v42 = vpop.f32.mrf.mxu2 }
 0x931   : > { %v2991_v15 = vpop.xlane.xlu0 %2990 }
 0x932   : > { %5715 = vmatmul.msk.bf16.gmra.mxu1 %vm1229_vm1, %v3096_v18  ;;  %6439 = vrcp.f32 %v2991_v15  ;;  %v3564_v32 = vpack.c.bf16 %v3322_v22, %v3321_v25 }
 0x935   : > { %v3049_v0 = vpop.f32.mrf.mxu0 }
 0x936   : > { %v3087_v45 = vmul.f32 %v6436_v4, %v3049_v0  ;;  %v3324_v4 = vmul.f32 0.17677669, %v3291_v63 }
 0x938   : > { %3552 = vmatmul.bf16.gmra.mxu0 %v7195_v39  ;;  %v6440_v37 = vpop.eup %6439  ;;  %v3296_v0 = vpop.f32.mrf.mxu2 }
 0x939   : > { %v2993_v46 = vpop.xlane.xlu1 %2992 }
 0x93a   : > { %6441 = vrcp.f32 %v2993_v46  ;;  %v3326_v46 = vmul.f32 0.17677669, %v3296_v0 }
 0x93d   : > { %v3051_v6 = vpop.f32.mrf.mxu0 }
 0x93e   : > { %v3088_v9 = vmul.f32 %v6438_v47, %v3051_v6 }
 0x940   : > { %v3097_v5 = vpack.c.bf16 %v3088_v9, %v3087_v45  ;;  %v6442_v7 = vpop.eup %6441  ;;  %v3565_v45 = vpack.c.bf16 %v3324_v4, %v3323_v23  ;;  %v3299_v9 = vpop.f32.mrf.mxu2 }
 0x941   : > { %v3327_v41 = vmul.f32 0.17677669, %v3299_v9 }
 0x942   : > { %5716 = vmatmul.msk.bf16.gmra.mxu1 %vm1229_vm1, %v3097_v5 }
 0x945   : > { %v3054_v31 = vpop.f32.mrf.mxu0 }
 0x946   : > { %v3089_v14 = vmul.f32 %v6440_v37, %v3054_v31  ;;  %v3325_v37 = vmul.f32 0.17677669, %v3294_v42 }
 0x948   : > { %3557 = vmatmul.bf16.gmra.mxu0 %v7260_v29  ;;  %v3301_v31 = vpop.f32.mrf.mxu2 }
 0x949   : > { %v3328_v20 = vmul.f32 0.17677669, %v3301_v31 }
 0x94d   : > { %v3056_v39 = vpop.f32.mrf.mxu0 }
 0x94e   : > { %v3090_v44 = vmul.f32 %v6442_v7, %v3056_v39  ;;  %v3566_v39 = vpack.c.bf16 %v3326_v46, %v3325_v37 }
 0x950   : > { %v3098_v17 = vpack.c.bf16 %v3090_v44, %v3089_v14  ;;  %v2389_v44 = vadd.f32 %v7819_v8, %v7764_v59 }
 0x952   : > { %5717 = vmatmul.msk.bf16.gmra.mxu1 %vm1229_vm1, %v3098_v17  ;;  %v3304_v17 = vpop.f32.mrf.mxu2 }
 0x953   : > { %v3329_v22 = vmul.f32 0.17677669, %v3304_v17 }
 0x955   : > { %v8066_v62 = vpop.f32.mrf.mxu0 }
 0x95d   : > { %v8068_v10 = vpop.f32.mrf.mxu0 }
 0x95f   : > { %v3149_v19 = vpop.f32.mrf.mxu1 }
 0x960   : > { %v8071_v29 = vadd.f32 %v3149_v19, %v7773_v35  ;;  %v3567_v19 = vpack.c.bf16 %v3328_v20, %v3327_v41 }
 0x962   : > { %5862 = vmatmul.msk.bf16.vlgmr.msrb.gmra.mxu1 %vm1229_vm1, %v3563_v27 }
 0x965   : > { %v8074_v33 = vpop.f32.mrf.mxu0 }
 0x967   : > { %v3151_v34 = vpop.f32.mrf.mxu1 }
 0x968   : > { %v8078_v51 = vadd.f32 %v3151_v34, %v2374_v60 }
 0x96d   : > { %v8080_v52 = vpop.f32.mrf.mxu0 }
 0x96f   : > { %v3154_v18 = vpop.f32.mrf.mxu1 }
 0x970   : > { %v8083_v35 = vadd.f32 %v3154_v18, %v7792_v40 }
 0x972   : > { %5863 = vmatmul.msk.bf16.gmra.mxu1 %vm1229_vm1, %v3564_v32 }
 0x975   : > { %v8086_v56 = vpop.f32.mrf.mxu0 }
 0x977   : > { %v3156_v43 = vpop.f32.mrf.mxu1 }
 0x978   : > { %v8090_v50 = vadd.f32 %v3156_v43, %v2379_v55 }
 0x97d   : > { %v8092_v47 = vpop.f32.mrf.mxu0 }
 0x97f   : > { %v3159_v6 = vpop.f32.mrf.mxu1 }
 0x980   : > { %v8095_v40 = vadd.f32 %v3159_v6, %v7805_v61 }
 0x982   : > { %5864 = vmatmul.msk.bf16.gmra.mxu1 %vm1229_vm1, %v3565_v45 }
 0x985   : > { %v8098_v5 = vpop.f32.mrf.mxu0 }
 0x987   : > { %v3161_v48 = vpop.f32.mrf.mxu1 }
 0x988   : > { %v8102_v15 = vadd.f32 %v3161_v48, %v2384_v57 }
 0x98d   : > { %v3540_v21 = vpop.f32.mrf.mxu0 }
 0x98f   : > { %v3164_v7 = vpop.f32.mrf.mxu1 }
 0x990   : > { %v8105_v61 = vadd.f32 %v3164_v7, %v7814_v12  ;;  %v3306_v12 = vpop.f32.mrf.mxu2 }
 0x991   : > { %v3330_v59 = vmul.f32 0.17677669, %v3306_v12  ;;  %v3797_v12 = vpack.c.bf16 %v8080_v52, %v8074_v33 }
 0x992   : > { %5865 = vmatmul.msk.bf16.gmra.mxu1 %vm1229_vm1, %v3566_v39 }
 0x993   : > { %v3568_v42 = vpack.c.bf16 %v3330_v59, %v3329_v22 }
 0x995   : > { %v3543_v14 = vpop.f32.mrf.mxu0 }
 0x997   : > { %v3166_v24 = vpop.f32.mrf.mxu1 }
 0x998   : > { %v8110_v28 = vadd.f32 %v3166_v24, %v2389_v44  ;;  %v3309_v34 = vpop.f32.mrf.mxu2 }
 0x999   : > { %v3331_v4 = vmul.f32 0.17677669, %v3309_v34 }
 0x99d   : > { %v3545_v53 = vpop.f32.mrf.mxu0 }
 0x99e   : > { %v3800_v41 = vpack.c.bf16 %v3545_v53, %v3543_v14 }
 0x99f   : > { %v3169_v54 = vpop.f32.mrf.mxu1 }
 0x9a0   : > { %v8113_v27 = vadd.f32 %v3169_v54, %v7826_v30  ;;  %v3311_v32 = vpop.f32.mrf.mxu2  ;;  %v3799_v54 = vpack.c.bf16 %v3540_v21, %v8098_v5 }
 0x9a1   : > { %v3332_v43 = vmul.f32 0.17677669, %v3311_v32 }
 0x9a2   : > { %5866 = vmatmul.msk.bf16.gmra.mxu1 %vm1229_vm1, %v3567_v19 }
 0x9a3   : > { %v3569_v45 = vpack.c.bf16 %v3332_v43, %v3331_v4 }
 0x9a5   : > { %v3548_v63 = vpop.f32.mrf.mxu0 }
 0x9a7   : > { %v8116_v60 = vpop.f32.mrf.mxu1 }
 0x9a8   : > { %v3314_v23 = vpop.f32.mrf.mxu2 }
 0x9a9   : > { %v3333_v37 = vmul.f32 0.17677669, %v3314_v23 }
 0x9ad   : > { %v3550_v8 = vpop.f32.mrf.mxu0 }
 0x9af   : > { %v3174_v25 = vpop.f32.mrf.mxu1 }
 0x9b0   : > { %v8119_v18 = vadd.f32 %v3174_v25, %v7843_v1  ;;  %v3316_v48 = vpop.f32.mrf.mxu2 }
 0x9b1   : > { %v3334_v46 = vmul.f32 0.17677669, %v3316_v48 }
 0x9b2   : > { %5867 = vmatmul.msk.bf16.gmra.mxu1 %vm1229_vm1, %v3568_v42 }
 0x9b3   : > { %v3570_v44 = vpack.c.bf16 %v3334_v46, %v3333_v37 }
 0x9b5   : > { %v3553_v30 = vpop.f32.mrf.mxu0 }
 0x9b7   : > { %v8122_v55 = vpop.f32.mrf.mxu1 }
 0x9bd   : > { %v3555_v0 = vpop.f32.mrf.mxu0 }
 0x9be   : > { %v3802_v24 = vpack.c.bf16 %v3555_v0, %v3553_v30 }
 0x9bf   : > { %v3179_v6 = vpop.f32.mrf.mxu1 }
 0x9c0   : > { %v8125_v9 = vadd.f32 %v3179_v6, %v7860_v3  ;;  %v3801_v3 = vpack.c.bf16 %v3550_v8, %v3548_v63  ;;  %v3796_v63 = vpack.c.bf16 %v8068_v10, %v8066_v62 }
 0x9c2   : > { %5868 = vmatmul.msk.bf16.gmra.mxu1 %vm1229_vm1, %v3569_v45 }
 0x9c5   : > { %v3558_v57 = vpop.f32.mrf.mxu0 }
 0x9c7   : > { %v8128_v1 = vpop.f32.mrf.mxu1 }
 0x9cd   : > { %v3560_v31 = vpop.f32.mrf.mxu0 }
 0x9ce   : > { %v3803_v7 = vpack.c.bf16 %v3560_v31, %v3558_v57 }
 0x9cf   : > { %v3184_v39 = vpop.f32.mrf.mxu1 }
 0x9d0   : > { %v8131_v17 = vadd.f32 %v3184_v39, %v7872_v13  ;;  %3804 = vmatpush.bf16.msrb.mxu2 %v3803_v7  ;;  %v3798_v13 = vpack.c.bf16 %v8092_v47, %v8086_v56 }
 0x9d2   : > { %5869 = vmatmul.msk.bf16.gmra.mxu1 %vm1229_vm1, %v3570_v44 }
 0x9d4   : > { %3805 = vmatpush.bf16.msrb.mxu2 %v3802_v24 }
 0x9d7   : > { %v8134_v20 = vpop.f32.mrf.mxu1 }
 0x9d8   : > { %3806 = vmatpush.bf16.msrb.mxu2 %v3801_v3 }
 0x9dc   : > { %3807 = vmatpush.bf16.msrb.mxu2 %v3800_v41 }
 0x9df   : > { %v3636_v19 = vpop.f32.mrf.mxu1 }
 0x9e0   : > { %3808 = vmatpush.bf16.msrb.mxu2 %v3799_v54  ;;  %3676 = vmax.xlane.f32.xlu2 %v3636_v19 }
 0x9e4   : > { %3809 = vmatpush.bf16.msrb.mxu2 %v3798_v13 }
 0x9e7   : > { %v3638_v34 = vpop.f32.mrf.mxu1 }
 0x9e8   : > { %3810 = vmatpush.bf16.msrb.mxu2 %v3797_v12  ;;  %3678 = vmax.xlane.f32.xlu0 %v3638_v34 }
 0x9ec   : > { %3811 = vmatpush.bf16.msrb.mxu2 %v3796_v63 }
 0x9ef   : > { %v3641_v14 = vpop.f32.mrf.mxu1 }
 0x9f0   : > { %3680 = vmax.xlane.f32.xlu1 %v3641_v14 }
 0x9f7   : > { %v3643_v5 = vpop.f32.mrf.mxu1 }
 0x9f8   : > { %3682 = vmax.xlane.f32.xlu2 %v3643_v5 }
 0x9ff   : > { %v3646_v21 = vpop.f32.mrf.mxu1 }
 0xa00   : > { %3684 = vmax.xlane.f32.xlu0 %v3646_v21 }
 0xa07   : > { %v3648_v53 = vpop.f32.mrf.mxu1 }
 0xa08   : > { %3686 = vmax.xlane.f32.xlu1 %v3648_v53 }
 0xa0f   : > { %v3651_v56 = vpop.f32.mrf.mxu1 }
 0xa10   : > { %3688 = vmax.xlane.f32.xlu2 %v3651_v56 }
 0xa17   : > { %v8143_v47 = vpop.f32.mrf.mxu1 }
 0xa18   : > { %3690 = vmax.xlane.f32.xlu0 %v8143_v47 }
 0xa1f   : > { %v8146_v33 = vpop.f32.mrf.mxu1 }
 0xa20   : > { %3692 = vmax.xlane.f32.xlu1 %v8146_v33 }
 0xa27   : > { %v8149_v62 = vpop.f32.mrf.mxu1 }
 0xa28   : > { %3694 = vmax.xlane.f32.xlu2 %v8149_v62 }
 0xa2f   : > { %v8152_v10 = vpop.f32.mrf.mxu1 }
 0xa30   : > { %3696 = vmax.xlane.f32.xlu0 %v8152_v10 }
 0xa37   : > { %v8155_v52 = vpop.f32.mrf.mxu1 }
 0xa38   : > { %3698 = vmax.xlane.f32.xlu1 %v8155_v52 }
 0xa3f   : > { %v8158_v59 = vpop.f32.mrf.mxu1 }
 0xa40   : > { %3700 = vmax.xlane.f32.xlu2 %v8158_v59 }
 0xa47   : > { %v8161_v8 = vpop.f32.mrf.mxu1 }
 0xa48   : > { %3702 = vmax.xlane.f32.xlu0 %v8161_v8 }
 0xa4f   : > { %v8164_v22 = vpop.f32.mrf.mxu1 }
 0xa50   : > { %3704 = vmax.xlane.f32.xlu1 %v8164_v22 }
 0xa53   : > { %v3677_v25 = vpop.xlane.xlu2 %3676 }
 0xa54   : > { %v3708_v42 = vsub.f32 %v3636_v19, %v3677_v25 }
 0xa56   : > { %v3724_v32 = vmul.f32 1.442695, %v3708_v42 }
 0xa57   : > { %v8167_v30 = vpop.f32.mrf.mxu1 }
 0xa58   : > { %6443 = vpow2.f32 %v3724_v32  ;;  %3706 = vmax.xlane.f32.xlu2 %v8167_v30 }
 0xa5b   : > { %v3679_v43 = vpop.xlane.xlu0 %3678 }
 0xa5c   : > { %v3709_v0 = vsub.f32 %v3638_v34, %v3679_v43 }
 0xa5e   : > { %v6444_v4 = vpop.eup %6443  ;;  %v3726_v23 = vmul.f32 1.442695, %v3709_v0 }
 0xa5f   : > { %3756 = vadd.xlane.f32.xlu0 %v6444_v4 }
 0xa60   : > { %6445 = vpow2.f32 %v3726_v23 }
 0xa63   : > { %v3681_v6 = vpop.xlane.xlu1 %3680 }
 0xa64   : > { %v3710_v45 = vsub.f32 %v3641_v14, %v3681_v6 }
 0xa66   : > { %v6446_v57 = vpop.eup %6445  ;;  %v3728_v48 = vmul.f32 1.442695, %v3710_v45  ;;  %v6127_v45 = vld [vmem:[%s8977_s6 + $0x38] sm:$0xff] }
 0xa67   : > { %v3788_v46 = vpack.c.bf16 %v6446_v57, %v6444_v4  ;;  %3758 = vadd.xlane.f32.xlu1 %v6446_v57  ;;  %3940 = vmatpush.bf16.msrb.mxu3 %v6127_v45 }
 0xa68   : > { %6447 = vpow2.f32 %v3728_v48 }
 0xa69   : > { %3812 = vmatmul.bf16.vlgmr.msrb.gmra.mxu2 %v3788_v46 }
 0xa6b   : > { %v3683_v31 = vpop.xlane.xlu2 %3682 }
 0xa6c   : > { %v3711_v37 = vsub.f32 %v3643_v5, %v3683_v31 }
 0xa6e   : > { %v6448_v7 = vpop.eup %6447  ;;  %v3730_v39 = vmul.f32 1.442695, %v3711_v37 }
 0xa6f   : > { %3760 = vadd.xlane.f32.xlu2 %v6448_v7 }
 0xa70   : > { %6449 = vpow2.f32 %v3730_v39 }
 0xa73   : > { %v3685_v44 = vpop.xlane.xlu0 %3684 }
 0xa74   : > { %v3712_v24 = vsub.f32 %v3646_v21, %v3685_v44 }
 0xa76   : > { %v6450_v3 = vpop.eup %6449  ;;  %v3732_v41 = vmul.f32 1.442695, %v3712_v24 }
 0xa77   : > { %3762 = vadd.xlane.f32.xlu0 %v6450_v3  ;;  %v3789_v54 = vpack.c.bf16 %v6450_v3, %v6448_v7 }
 0xa78   : > { %6451 = vpow2.f32 %v3732_v41 }
 0xa79   : > { %3817 = vmatmul.bf16.gmra.mxu2 %v3789_v54 }
 0xa7b   : > { %v3687_v19 = vpop.xlane.xlu1 %3686 }
 0xa7c   : > { %v3713_v13 = vsub.f32 %v3648_v53, %v3687_v19 }
 0xa7e   : > { %v6452_v12 = vpop.eup %6451  ;;  %v3734_v34 = vmul.f32 1.442695, %v3713_v13 }
 0xa7f   : > { %3764 = vadd.xlane.f32.xlu1 %v6452_v12 }
 0xa80   : > { %6453 = vpow2.f32 %v3734_v34 }
 0xa83   : > { %v3689_v63 = vpop.xlane.xlu2 %3688 }
 0xa84   : > { %v3714_v14 = vsub.f32 %v3651_v56, %v3689_v63 }
 0xa86   : > { %v6454_v5 = vpop.eup %6453  ;;  %v3736_v25 = vmul.f32 1.442695, %v3714_v14 }
 0xa87   : > { %3766 = vadd.xlane.f32.xlu2 %v6454_v5  ;;  %v3790_v42 = vpack.c.bf16 %v6454_v5, %v6452_v12 }
 0xa88   : > { %6455 = vpow2.f32 %v3736_v25 }
 0xa89   : > { %3822 = vmatmul.bf16.gmra.mxu2 %v3790_v42 }
 0xa8b   : > { %v3691_v21 = vpop.xlane.xlu0 %3690 }
 0xa8c   : > { %v3715_v32 = vsub.f32 %v8143_v47, %v3691_v21 }
 0xa8e   : > { %v6456_v43 = vpop.eup %6455  ;;  %v3738_v0 = vmul.f32 1.442695, %v3715_v32 }
 0xa8f   : > { %3768 = vadd.xlane.f32.xlu0 %v6456_v43 }
 0xa90   : > { %6457 = vpow2.f32 %v3738_v0 }
 0xa93   : > { %v3693_v53 = vpop.xlane.xlu1 %3692 }
 0xa94   : > { %v3716_v4 = vsub.f32 %v8146_v33, %v3693_v53  ;;  %v6126_v53 = vld [vmem:[%s8977_s6 + $0x30] sm:$0xff] }
 0xa95   : > { %3941 = vmatpush.bf16.msrb.mxu3 %v6126_v53 }
 0xa96   : > { %v6458_v23 = vpop.eup %6457  ;;  %v3740_v6 = vmul.f32 1.442695, %v3716_v4 }
 0xa97   : > { %3770 = vadd.xlane.f32.xlu1 %v6458_v23  ;;  %v3791_v56 = vpack.c.bf16 %v6458_v23, %v6456_v43 }
 0xa98   : > { %6459 = vpow2.f32 %v3740_v6 }
 0xa99   : > { %3827 = vmatmul.bf16.gmra.mxu2 %v3791_v56 }
 0xa9b   : > { %v3695_v57 = vpop.xlane.xlu2 %3694 }
 0xa9c   : > { %v3717_v47 = vsub.f32 %v8149_v62, %v3695_v57 }
 0xa9e   : > { %v6460_v48 = vpop.eup %6459  ;;  %v3742_v46 = vmul.f32 1.442695, %v3717_v47 }
 0xa9f   : > { %3772 = vadd.xlane.f32.xlu2 %v6460_v48 }
 0xaa0   : > { %6461 = vpow2.f32 %v3742_v46 }
 0xaa3   : > { %v3697_v31 = vpop.xlane.xlu0 %3696 }
 0xaa4   : > { %v3718_v33 = vsub.f32 %v8152_v10, %v3697_v31 }
 0xaa6   : > { %v6462_v37 = vpop.eup %6461  ;;  %v3744_v7 = vmul.f32 1.442695, %v3718_v33 }
 0xaa7   : > { %3774 = vadd.xlane.f32.xlu0 %v6462_v37  ;;  %v3792_v39 = vpack.c.bf16 %v6462_v37, %v6460_v48 }
 0xaa8   : > { %6463 = vpow2.f32 %v3744_v7 }
 0xaa9   : > { %3832 = vmatmul.bf16.gmra.mxu2 %v3792_v39 }
 0xaab   : > { %v3699_v44 = vpop.xlane.xlu1 %3698 }
 0xaac   : > { %v3719_v24 = vsub.f32 %v8155_v52, %v3699_v44 }
 0xaae   : > { %v6464_v3 = vpop.eup %6463  ;;  %v3746_v41 = vmul.f32 1.442695, %v3719_v24 }
 0xaaf   : > { %3776 = vadd.xlane.f32.xlu1 %v6464_v3 }
 0xab0   : > { %6465 = vpow2.f32 %v3746_v41 }
 0xab3   : > { %v3701_v62 = vpop.xlane.xlu2 %3700 }
 0xab4   : > { %v3720_v54 = vsub.f32 %v8158_v59, %v3701_v62 }
 0xab6   : > { %v6466_v19 = vpop.eup %6465  ;;  %v3748_v13 = vmul.f32 1.442695, %v3720_v54 }
 0xab7   : > { %3778 = vadd.xlane.f32.xlu2 %v6466_v19  ;;  %v3793_v10 = vpack.c.bf16 %v6466_v19, %v6464_v3 }
 0xab8   : > { %6467 = vpow2.f32 %v3748_v13 }
 0xab9   : > { %3837 = vmatmul.bf16.gmra.mxu2 %v3793_v10 }
 0xabb   : > { %v3703_v12 = vpop.xlane.xlu0 %3702 }
 0xabc   : > { %v3721_v34 = vsub.f32 %v8161_v8, %v3703_v12 }
 0xabe   : > { %v6468_v63 = vpop.eup %6467  ;;  %v3750_v14 = vmul.f32 1.442695, %v3721_v34 }
 0xabf   : > { %3780 = vadd.xlane.f32.xlu0 %v6468_v63 }
 0xac0   : > { %6469 = vpow2.f32 %v3750_v14 }
 0xac3   : > { %v3705_v52 = vpop.xlane.xlu1 %3704 }
 0xac4   : > { %v3722_v5 = vsub.f32 %v8164_v22, %v3705_v52 }
 0xac6   : > { %v6470_v25 = vpop.eup %6469  ;;  %v3752_v42 = vmul.f32 1.442695, %v3722_v5 }
 0xac7   : > { %3782 = vadd.xlane.f32.xlu1 %v6470_v25  ;;  %v3794_v59 = vpack.c.bf16 %v6470_v25, %v6468_v63 }
 0xac8   : > { %6471 = vpow2.f32 %v3752_v42 }
 0xac9   : > { %3842 = vmatmul.bf16.gmra.mxu2 %v3794_v59 }
 0xacb   : > { %v3707_v21 = vpop.xlane.xlu2 %3706 }
 0xacc   : > { %v3723_v32 = vsub.f32 %v8167_v30, %v3707_v21 }
 0xace   : > { %v6472_v43 = vpop.eup %6471  ;;  %v3754_v0 = vmul.f32 1.442695, %v3723_v32 }
 0xacf   : > { %3784 = vadd.xlane.f32.xlu2 %v6472_v43 }
 0xad0   : > { %6473 = vpow2.f32 %v3754_v0 }
 0xad2   : > { %v3757_v4 = vpop.xlane.xlu0 %3756 }
 0xad3   : > { %6475 = vrcp.f32 %v3757_v4 }
 0xad6   : > { %v6474_v8 = vpop.eup %6473 }
 0xad7   : > { %3786 = vadd.xlane.f32.xlu0 %v6474_v8  ;;  %v3795_v22 = vpack.c.bf16 %v6474_v8, %v6472_v43 }
 0xad9   : > { %3847 = vmatmul.bf16.gmra.mxu2 %v3795_v22  ;;  %v6476_v56 = vpop.eup %6475 }
 0xada   : > { %v3759_v23 = vpop.xlane.xlu1 %3758 }
 0xadb   : > { %6477 = vrcp.f32 %v3759_v23 }
 0xae1   : > { %v6478_v30 = vpop.eup %6477 }
 0xae2   : > { %v3761_v46 = vpop.xlane.xlu2 %3760 }
 0xae3   : > { %6479 = vrcp.f32 %v3761_v46 }
 0xae9   : > { %v6480_v37 = vpop.eup %6479 }
 0xaea   : > { %v3763_v31 = vpop.xlane.xlu0 %3762 }
 0xaeb   : > { %6481 = vrcp.f32 %v3763_v31 }
 0xaec   : > { %v3813_v6 = vpop.f32.mrf.mxu2 }
 0xaed   : > { %v3869_v57 = vmul.f32 %v6476_v56, %v3813_v6 }
 0xaf1   : > { %v6482_v7 = vpop.eup %6481 }
 0xaf2   : > { %v3765_v41 = vpop.xlane.xlu1 %3764 }
 0xaf3   : > { %6483 = vrcp.f32 %v3765_v41 }
 0xaf4   : > { %v3815_v45 = vpop.f32.mrf.mxu2 }
 0xaf5   : > { %v3870_v47 = vmul.f32 %v6478_v30, %v3815_v45 }
 0xaf7   : > { %v3885_v48 = vpack.c.bf16 %v3870_v47, %v3869_v57 }
 0xaf9   : > { %5882 = vmatmul.msk.bf16.vlgmr.msrb.gmra.mxu3 %vm1229_vm1, %v3885_v48  ;;  %v6484_v19 = vpop.eup %6483 }
 0xafa   : > { %v3767_v62 = vpop.xlane.xlu2 %3766 }
 0xafb   : > { %6485 = vrcp.f32 %v3767_v62 }
 0xafc   : > { %v3818_v33 = vpop.f32.mrf.mxu2 }
 0xafd   : > { %v3871_v44 = vmul.f32 %v6480_v37, %v3818_v33 }
 0xb01   : > { %v6486_v13 = vpop.eup %6485 }
 0xb02   : > { %v3769_v14 = vpop.xlane.xlu0 %3768 }
 0xb03   : > { %6487 = vrcp.f32 %v3769_v14 }
 0xb04   : > { %v3820_v39 = vpop.f32.mrf.mxu2 }
 0xb05   : > { %v3872_v24 = vmul.f32 %v6482_v7, %v3820_v39 }
 0xb07   : > { %v3886_v3 = vpack.c.bf16 %v3872_v24, %v3871_v44 }
 0xb09   : > { %5883 = vmatmul.msk.bf16.gmra.mxu3 %vm1229_vm1, %v3886_v3  ;;  %v6488_v25 = vpop.eup %6487 }
 0xb0a   : > { %v3771_v52 = vpop.xlane.xlu1 %3770 }
 0xb0b   : > { %6489 = vrcp.f32 %v3771_v52 }
 0xb0c   : > { %v3823_v54 = vpop.f32.mrf.mxu2 }
 0xb0d   : > { %v3873_v12 = vmul.f32 %v6484_v19, %v3823_v54 }
 0xb11   : > { %v6490_v42 = vpop.eup %6489 }
 0xb12   : > { %v3773_v0 = vpop.xlane.xlu2 %3772 }
 0xb13   : > { %6491 = vrcp.f32 %v3773_v0 }
 0xb14   : > { %v3825_v10 = vpop.f32.mrf.mxu2 }
 0xb15   : > { %v3874_v34 = vmul.f32 %v6486_v13, %v3825_v10 }
 0xb17   : > { %v3887_v63 = vpack.c.bf16 %v3874_v34, %v3873_v12 }
 0xb19   : > { %5884 = vmatmul.msk.bf16.gmra.mxu3 %vm1229_vm1, %v3887_v63  ;;  %v6492_v22 = vpop.eup %6491 }
 0xb1a   : > { %v3775_v8 = vpop.xlane.xlu0 %3774 }
 0xb1b   : > { %6493 = vrcp.f32 %v3775_v8 }
 0xb1c   : > { %v3828_v5 = vpop.f32.mrf.mxu2 }
 0xb1d   : > { %v3875_v21 = vmul.f32 %v6488_v25, %v3828_v5 }
 0xb21   : > { %v6494_v4 = vpop.eup %6493 }
 0xb22   : > { %v3777_v45 = vpop.xlane.xlu1 %3776 }
 0xb23   : > { %6495 = vrcp.f32 %v3777_v45 }
 0xb24   : > { %v3830_v59 = vpop.f32.mrf.mxu2 }
 0xb25   : > { %v3876_v32 = vmul.f32 %v6490_v42, %v3830_v59 }
 0xb27   : > { %v3888_v43 = vpack.c.bf16 %v3876_v32, %v3875_v21  ;;  %v8197_v32 = vld [vmem:[%s8978_s7] ss:$0 sm:$0xff] }
 0xb29   : > { %5885 = vmatmul.msk.bf16.gmra.mxu3 %vm1229_vm1, %v3888_v43  ;;  %v6496_v48 = vpop.eup %6495  ;;  %v6603_v43 = vld [vmem:[%s6814_s18] sm:$0xff] }
 0xb2a   : > { %v3779_v57 = vpop.xlane.xlu2 %3778 }
 0xb2b   : > { %6497 = vrcp.f32 %v3779_v57 }
 0xb2c   : > { %v3833_v53 = vpop.f32.mrf.mxu2 }
 0xb2d   : > { %v3877_v6 = vmul.f32 %v6492_v22, %v3833_v53 }
 0xb31   : > { %v6498_v46 = vpop.eup %6497 }
 0xb32   : > { %v3781_v39 = vpop.xlane.xlu0 %3780 }
 0xb33   : > { %6499 = vrcp.f32 %v3781_v39 }
 0xb34   : > { %v3835_v23 = vpop.f32.mrf.mxu2 }
 0xb35   : > { %v3878_v56 = vmul.f32 %v6494_v4, %v3835_v23  ;;  %v6604_v4 = vld [vmem:[%s6814_s18 + $0x8] sm:$0xff] }
 0xb37   : > { %v3889_v30 = vpack.c.bf16 %v3878_v56, %v3877_v6 }
 0xb39   : > { %5886 = vmatmul.msk.bf16.gmra.mxu3 %vm1229_vm1, %v3889_v30  ;;  %v6500_v3 = vpop.eup %6499  ;;  %v6605_v30 = vld [vmem:[%s6814_s18 + $0x10] sm:$0xff] }
 0xb3a   : > { %v3783_v44 = vpop.xlane.xlu1 %3782 }
 0xb3b   : > { %6501 = vrcp.f32 %v3783_v44 }
 0xb3c   : > { %v3838_v47 = vpop.f32.mrf.mxu2 }
 0xb3d   : > { %v3879_v33 = vmul.f32 %v6496_v48, %v3838_v47  ;;  %v6606_v48 = vld [vmem:[%s6814_s18 + $0x18] sm:$0xff] }
 0xb41   : > { %v6502_v41 = vpop.eup %6501 }
 0xb42   : > { %v3785_v10 = vpop.xlane.xlu2 %3784 }
 0xb43   : > { %6503 = vrcp.f32 %v3785_v10 }
 0xb44   : > { %v3840_v31 = vpop.f32.mrf.mxu2 }
 0xb45   : > { %v3880_v37 = vmul.f32 %v6498_v46, %v3840_v31 }
 0xb47   : > { %v3890_v7 = vpack.c.bf16 %v3880_v37, %v3879_v33  ;;  %v6607_v37 = vld [vmem:[%s6814_s18 + $0x20] sm:$0xff] }
 0xb49   : > { %5887 = vmatmul.msk.bf16.gmra.mxu3 %vm1229_vm1, %v3890_v7  ;;  %v6504_v63 = vpop.eup %6503 }
 0xb4a   : > { %v3787_v12 = vpop.xlane.xlu0 %3786 }
 0xb4b   : > { %6505 = vrcp.f32 %v3787_v12 }
 0xb4c   : > { %v3843_v24 = vpop.f32.mrf.mxu2 }
 0xb4d   : > { %v3881_v54 = vmul.f32 %v6500_v3, %v3843_v24  ;;  %v6608_v24 = vld [vmem:[%s6814_s18 + $0x28] sm:$0xff] }
 0xb51   : > { %v6506_v14 = vpop.eup %6505 }
 0xb54   : > { %v3845_v62 = vpop.f32.mrf.mxu2 }
 0xb55   : > { %v3882_v19 = vmul.f32 %v6502_v41, %v3845_v62 }
 0xb57   : > { %v3891_v13 = vpack.c.bf16 %v3882_v19, %v3881_v54  ;;  %v6609_v54 = vld [vmem:[%s6814_s18 + $0x30] sm:$0xff] }
 0xb59   : > { %5888 = vmatmul.msk.bf16.gmra.mxu3 %vm1229_vm1, %v3891_v13 }
 0xb5c   : > { %v3848_v34 = vpop.f32.mrf.mxu2 }
 0xb5d   : > { %v3883_v5 = vmul.f32 %v6504_v63, %v3848_v34  ;;  %v9015_v34 = vld [vmem:[#allocation8_spill] sm:$0xff] }
 0xb64   : > { %v3850_v52 = vpop.f32.mrf.mxu2 }
 0xb65   : > { %v3884_v25 = vmul.f32 %v6506_v14, %v3850_v52 }
 0xb67   : > { %v3892_v42 = vpack.c.bf16 %v3884_v25, %v3883_v5 }
 0xb69   : > { %5889 = vmatmul.msk.bf16.gmra.mxu3 %vm1229_vm1, %v3892_v42  ;;  %v6610_v42 = vld [vmem:[%s6814_s18 + $0x38] sm:$0xff] }
 0xb7c   : > { %v3943_v59 = vpop.f32.mrf.mxu3 }
 0xb7d   : > { %v3983_v21 = vadd.f32 %v3943_v59, %v8071_v29 }
 0xb7f   : > { %v3999_v0 = vadd.f32 %v6603_v43, %v3983_v21 }
 0xb81   : > { %v8201_v8 = vadd.f32 %v8197_v32, %v3999_v0 }
 0xb83   : > { %4037 = vadd.xlane.f32.xlu1 %v8201_v8 }
 0xb84   : > { %v3945_v53 = vpop.f32.mrf.mxu3 }
 0xb85   : > { %v3984_v22 = vadd.f32 %v3945_v53, %v8078_v51 }
 0xb87   : > { %v4000_v23 = vadd.f32 %v6604_v4, %v3984_v22  ;;  %v2394_v4 = vadd.f32 %v7835_v11, %v7778_v16  ;;  %v6612_v11 = vld [vmem:[%s6814_s18 + $0x48] sm:$0xff] }
 0xb89   : > { %v8207_v29 = vadd.f32 %v8197_v32, %v4000_v23  ;;  %v6611_v23 = vld [vmem:[%s6814_s18 + $0x40] sm:$0xff] }
 0xb8b   : > { %4039 = vadd.xlane.f32.xlu2 %v8207_v29 }
 0xb8c   : > { %v3948_v6 = vpop.f32.mrf.mxu3 }
 0xb8d   : > { %v3985_v56 = vadd.f32 %v3948_v6, %v8083_v35 }
 0xb8f   : > { %v4001_v45 = vadd.f32 %v6605_v30, %v3985_v56 }
 0xb91   : > { %v8213_v57 = vadd.f32 %v8197_v32, %v4001_v45 }
 0xb93   : > { %4041 = vadd.xlane.f32.xlu0 %v8213_v57 }
 0xb94   : > { %v3950_v51 = vpop.f32.mrf.mxu3 }
 0xb95   : > { %v3986_v47 = vadd.f32 %v3950_v51, %v8090_v50 }
 0xb97   : > { %v4002_v46 = vadd.f32 %v6606_v48, %v3986_v47 }
 0xb99   : > { %v8219_v31 = vadd.f32 %v8197_v32, %v4002_v46 }
 0xb9b   : > { %4043 = vadd.xlane.f32.xlu1 %v8219_v31 }
 0xb9c   : > { %v3953_v35 = vpop.f32.mrf.mxu3 }
 0xb9d   : > { %v3987_v33 = vadd.f32 %v3953_v35, %v8095_v40 }
 0xb9f   : > { %v4003_v7 = vadd.f32 %v6607_v37, %v3987_v33 }
 0xba1   : > { %v8225_v39 = vadd.f32 %v8197_v32, %v4003_v7 }
 0xba3   : > { %4045 = vadd.xlane.f32.xlu2 %v8225_v39 }
 0xba4   : > { %v3955_v44 = vpop.f32.mrf.mxu3 }
 0xba5   : > { %v3988_v50 = vadd.f32 %v3955_v44, %v8102_v15 }
 0xba7   : > { %v4004_v3 = vadd.f32 %v6608_v24, %v3988_v50  ;;  %v2399_v24 = vadd.f32 %v7852_v38, %v7797_v2  ;;  %v6614_v38 = vld [vmem:[%s6814_s18 + $0x58] sm:$0xff] }
 0xba9   : > { %v8231_v41 = vadd.f32 %v8197_v32, %v4004_v3  ;;  %v6613_v3 = vld [vmem:[%s6814_s18 + $0x50] sm:$0xff] }
 0xbab   : > { %4047 = vadd.xlane.f32.xlu0 %v8231_v41 }
 0xbac   : > { %v3958_v62 = vpop.f32.mrf.mxu3 }
 0xbad   : > { %v3989_v40 = vadd.f32 %v3958_v62, %v8105_v61 }
 0xbaf   : > { %v4005_v19 = vadd.f32 %v6609_v54, %v3989_v40 }
 0xbb1   : > { %v8237_v13 = vadd.f32 %v8197_v32, %v4005_v19 }
 0xbb3   : > { %4049 = vadd.xlane.f32.xlu0 %v8237_v13 }
 0xbb4   : > { %v3960_v10 = vpop.f32.mrf.mxu3 }
 0xbb5   : > { %v3990_v52 = vadd.f32 %v3960_v10, %v8110_v28 }
 0xbb7   : > { %v4006_v59 = vadd.f32 %v6610_v42, %v3990_v52 }
 0xbb9   : > { %v8254_v53 = vadd.f32 %v8197_v32, %v4006_v59 }
 0xbbc   : > { %v3963_v15 = vpop.f32.mrf.mxu3 }
 0xbbd   : > { %v3991_v0 = vadd.f32 %v3963_v15, %v8113_v27  ;;  %v3198_v27 = vadd.f32 %v8116_v60, %v2394_v4 }
 0xbbf   : > { %v4007_v6 = vadd.f32 %v6611_v23, %v3991_v0  ;;  %v6615_v0 = vld [vmem:[%s6814_s18 + $0x60] sm:$0xff] }
 0xbc1   : > { %v8268_v47 = vadd.f32 %v8197_v32, %v4007_v6 }
 0xbc4   : > { %v3965_v5 = vpop.f32.mrf.mxu3 }
 0xbc5   : > { %v3992_v51 = vadd.f32 %v3965_v5, %v3198_v27 }
 0xbc7   : > { %v4008_v46 = vadd.f32 %v6612_v11, %v3992_v51  ;;  %v6617_v51 = vld [vmem:[%s6814_s18 + $0x70] sm:$0xff] }
 0xbc8   : > { %v5948_v11 = vld [vmem:[%s8981_s10 + $0x70] sm:$0xf] }
 0xbc9   : > { %v8282_v44 = vadd.f32 %v8197_v32, %v4008_v46  ;;  %v6142_v46 = vld [vmem:[%s8981_s10 + $0x74] sm:$0xf] }
 0xbcc   : > { %v3968_v30 = vpop.f32.mrf.mxu3 }
 0xbcd   : > { %v3993_v37 = vadd.f32 %v3968_v30, %v8119_v18  ;;  %v3200_v18 = vadd.f32 %v8122_v55, %v2399_v24  ;;  %v6140_v24 = vld [vmem:[%s8981_s10 + $0x64] sm:$0xf] }
 0xbcf   : > { %v4009_v62 = vadd.f32 %v6613_v3, %v3993_v37 }
 0xbd1   : > { %v8294_v10 = vadd.f32 %v8197_v32, %v4009_v62  ;;  %v5942_v62 = vld [vmem:[%s8981_s10 + $0x68] sm:$0xf0] }
 0xbd4   : > { %v3970_v33 = vpop.f32.mrf.mxu3 }
 0xbd5   : > { %v3994_v19 = vadd.f32 %v3970_v33, %v3200_v18  ;;  %v5950_v33 = vld [vmem:[%s8981_s10 + $0x78] sm:$0xf0]  ;;  %v5932_v18 = vld [vmem:[%s8981_s10 + $0x50] sm:$0xf] }
 0xbd6   : > { %v5953_v37 = vor.u32 %v6142_v46, %v5950_v33  ;;  %v5902_v33 = vld [vmem:[%s8981_s10 + $0x18] sm:$0xf0] }
 0xbd8   : > { %4554 = vmatpush.bf16.msra.mxu1 %v5953_v37 }
 0xbf6   : > { %v4038_v12 = vpop.xlane.xlu1 %4037 }
 0xbf7   : > { %v4069_v63 = vmul.f32 %v4038_v12, %v9015_v34  ;;  %v3973_v12 = vpop.f32.mrf.mxu3 }
 0xbf9   : > { %v8242_v14 = vsub.f32 %v8201_v8, %v4069_v63  ;;  %v4010_v63 = vadd.f32 %v6614_v38, %v3994_v19  ;;  %v6139_v19 = vld [vmem:[%s8981_s10 + $0x54] sm:$0xf0] }
 0xbfb   : > { %v4101_v61 = vmul.f32 %v8242_v14, %v8242_v14 }
 0xbfd   : > { %4117 = vadd.xlane.f32.xlu1 %v4101_v61  ;;  %v3995_v61 = vadd.f32 %v3973_v12, %v8125_v9  ;;  %v5933_v12 = vor.u32 %v6139_v19, %v5932_v18  ;;  %v5894_v18 = vld [vmem:[%s8981_s10 + $0x8] sm:$0xf0] }
 0xbfe   : > { %v4040_v25 = vpop.xlane.xlu2 %4039 }
 0xbff   : > { %v4070_v21 = vmul.f32 %v4040_v25, %v9015_v34  ;;  %v8308_v25 = vadd.f32 %v8197_v32, %v4010_v63  ;;  %v3975_v42 = vpop.f32.mrf.mxu3  ;;  %v5924_v63 = vld [vmem:[%s8981_s10 + $0x40] sm:$0xf] }
 0xc01   : > { %v8250_v43 = vsub.f32 %v8207_v29, %v4070_v21  ;;  %v2404_v21 = vadd.f32 %v7867_v36, %v7807_v58  ;;  %v6616_v58 = vld [vmem:[%s6814_s18 + $0x68] sm:$0xff] }
 0xc03   : > { %v4102_v28 = vmul.f32 %v8250_v43, %v8250_v43 }
 0xc05   : > { %4051 = vadd.xlane.f32.xlu1 %v8254_v53  ;;  %4119 = vadd.xlane.f32.xlu2 %v4102_v28  ;;  %v4011_v28 = vadd.f32 %v6615_v0, %v3995_v61  ;;  %v6136_v61 = vld [vmem:[%s8981_s10 + $0x44] sm:$0xf]  ;;  %v6135_v0 = vld [vmem:[%s8981_s10 + $0x34] sm:$0xf0] }
 0xc06   : > { %v4042_v22 = vpop.xlane.xlu0 %4041 }
 0xc07   : > { %v4071_v56 = vmul.f32 %v4042_v22, %v9015_v34  ;;  %v3202_v22 = vadd.f32 %v8128_v1, %v2404_v21  ;;  %v3978_v30 = vpop.f32.mrf.mxu3  ;;  %v5916_v21 = vld [vmem:[%s8981_s10 + $0x30] sm:$0xf] }
 0xc08   : > { %v3997_v27 = vadd.f32 %v3978_v30, %v8131_v17  ;;  %v6143_v17 = vld [vmem:[%s8981_s10 + $0x74] sm:$0xf0] }
 0xc09   : > { %v8265_v45 = vsub.f32 %v8213_v57, %v4071_v56  ;;  %v3996_v23 = vadd.f32 %v3975_v42, %v3202_v22  ;;  %v8322_v56 = vadd.f32 %v8197_v32, %v4011_v28  ;;  %v5926_v42 = vld [vmem:[%s8981_s10 + $0x48] sm:$0xf0]  ;;  %v6134_v28 = vld [vmem:[%s8981_s10 + $0x34] sm:$0xf]  ;;  %v5918_v22 = vld [vmem:[%s8981_s10 + $0x38] sm:$0xf0] }
 0xc0b   : > { %v4103_v48 = vmul.f32 %v8265_v45, %v8265_v45  ;;  %v4012_v36 = vadd.f32 %v6616_v58, %v3996_v23  ;;  %v5921_v23 = vor.u32 %v6134_v28, %v5918_v22  ;;  %v6133_v58 = vld [vmem:[%s8981_s10 + $0x24] sm:$0xf0] }
 0xc0d   : > { %4053 = vadd.xlane.f32.xlu1 %v8268_v47  ;;  %4121 = vadd.xlane.f32.xlu2 %v4103_v48  ;;  %v8328_v1 = vadd.f32 %v8197_v32, %v4012_v36  ;;  %v4013_v48 = vadd.f32 %v6617_v51, %v3997_v27  ;;  %v6132_v36 = vld [vmem:[%s8981_s10 + $0x24] sm:$0xf]  ;;  %v5910_v27 = vld [vmem:[%s8981_s10 + $0x28] sm:$0xf0] }
 0xc0e   : > { %v4044_v16 = vpop.xlane.xlu1 %4043  ;;  %v5913_v51 = vor.u32 %v6132_v36, %v5910_v27 }
 0xc0f   : > { %v4072_v35 = vmul.f32 %v4044_v16, %v9015_v34  ;;  %v8333_v16 = vadd.f32 %v8197_v32, %v4013_v48  ;;  %v5900_v48 = vld [vmem:[%s8981_s10 + $0x10] sm:$0xf] }
 0xc11   : > { %v8276_v60 = vsub.f32 %v8219_v31, %v4072_v35  ;;  %v5949_v35 = vor.u32 %v6143_v17, %v5948_v11  ;;  %v6131_v11 = vld [vmem:[%s8981_s10 + $0x14] sm:$0xf0]  ;;  %v6130_v17 = vld [vmem:[%s8981_s10 + $0x14] sm:$0xf] }
 0xc13   : > { %v4104_v7 = vmul.f32 %v8276_v60, %v8276_v60  ;;  %4505 = vmatpush.bf16.msra.mxu0 %v5949_v35  ;;  %v5901_v35 = vor.u32 %v6131_v11, %v5900_v48 }
 0xc15   : > { %4123 = vadd.xlane.f32.xlu0 %v4104_v7  ;;  %4055 = vadd.xlane.f32.xlu2 %v8282_v44  ;;  %v5940_v7 = vld [vmem:[%s8981_s10 + $0x60] sm:$0xf] }
 0xc16   : > { %v4046_v50 = vpop.xlane.xlu2 %4045 }
 0xc17   : > { %v4073_v40 = vmul.f32 %v4046_v50, %v9015_v34  ;;  %v6141_v50 = vld [vmem:[%s8981_s10 + $0x64] sm:$0xf0] }
 0xc18   : > { %v5941_v3 = vor.u32 %v6141_v50, %v5940_v7  ;;  %v5905_v7 = vor.u32 %v6130_v17, %v5902_v33 }
 0xc19   : > { %v8291_v54 = vsub.f32 %v8225_v39, %v4073_v40  ;;  %v5945_v40 = vor.u32 %v6140_v24, %v5942_v62  ;;  %v5892_v24 = vld [vmem:[%s8981_s10] sm:$0xf] }
 0xc1a   : > { %4506 = vmatpush.bf16.msra.mxu0 %v5941_v3  ;;  %v6129_v3 = vld [vmem:[%s8981_s10 + $0x4] sm:$0xf0] }
 0xc1b   : > { %v4105_v15 = vmul.f32 %v8291_v54, %v8291_v54  ;;  %4555 = vmatpush.bf16.msra.mxu1 %v5945_v40  ;;  %v5893_v62 = vor.u32 %v6129_v3, %v5892_v24  ;;  %v6128_v40 = vld [vmem:[%s8981_s10 + $0x4] sm:$0xf] }
 0xc1c   : > { %v5897_v19 = vor.u32 %v6128_v40, %v5894_v18 }
 0xc1d   : > { %4057 = vadd.xlane.f32.xlu2 %v8294_v10  ;;  %4125 = vadd.xlane.f32.xlu0 %v4105_v15  ;;  %v6138_v15 = vld [vmem:[%s8981_s10 + $0x54] sm:$0xf] }
 0xc1e   : > { %v4048_v2 = vpop.xlane.xlu0 %4047  ;;  %4507 = vmatpush.bf16.msra.mxu0 %v5933_v12 }
 0xc1f   : > { %v4074_v55 = vmul.f32 %v4048_v2, %v9015_v34  ;;  %v5934_v2 = vld [vmem:[%s8981_s10 + $0x58] sm:$0xf0] }
 0xc20   : > { %v5937_v38 = vor.u32 %v6138_v15, %v5934_v2 }
 0xc21   : > { %v8302_v52 = vsub.f32 %v8231_v41, %v4074_v55  ;;  %v6137_v55 = vld [vmem:[%s8981_s10 + $0x44] sm:$0xf0] }
 0xc22   : > { %4556 = vmatpush.bf16.msra.mxu1 %v5937_v38 }
 0xc23   : > { %v4106_v5 = vmul.f32 %v8302_v52, %v8302_v52 }
 0xc25   : > { %4127 = vadd.xlane.f32.xlu1 %v4106_v5  ;;  %4059 = vadd.xlane.f32.xlu0 %v8308_v25  ;;  %v5925_v5 = vor.u32 %v6137_v55, %v5924_v63 }
 0xc26   : > { %v4050_v59 = vpop.xlane.xlu0 %4049 }
 0xc27   : > { %v4075_v9 = vmul.f32 %v4050_v59, %v9015_v34  ;;  %v5929_v59 = vor.u32 %v6136_v61, %v5926_v42  ;;  %4508 = vmatpush.bf16.msra.mxu0 %v5925_v5 }
 0xc29   : > { %v8317_v4 = vsub.f32 %v8237_v13, %v4075_v9  ;;  %4557 = vmatpush.bf16.msra.mxu1 %v5929_v59  ;;  %v5917_v9 = vor.u32 %v6135_v0, %v5916_v21 }
 0xc2b   : > { %v4107_v6 = vmul.f32 %v8317_v4, %v8317_v4  ;;  %4509 = vmatpush.bf16.msra.mxu0 %v5917_v9  ;;  %v2409_v9 = vadd.f32 %v7925_v49, %v7816_v26 }
 0xc2d   : > { %4129 = vadd.xlane.f32.xlu1 %v4107_v6  ;;  %4061 = vadd.xlane.f32.xlu0 %v8322_v56  ;;  %v5908_v6 = vld [vmem:[%s8981_s10 + $0x20] sm:$0xf] }
 0xc2e   : > { %4558 = vmatpush.bf16.msra.mxu1 %v5921_v23  ;;  %v5909_v30 = vor.u32 %v6133_v58, %v5908_v6  ;;  %v3980_v6 = vpop.f32.mrf.mxu3 }
 0xc30   : > { %4510 = vmatpush.bf16.msra.mxu0 %v5909_v30  ;;  %v3204_v30 = vadd.f32 %v8134_v20, %v2409_v9 }
 0xc32   : > { %4559 = vmatpush.bf16.msra.mxu1 %v5913_v51  ;;  %v3998_v17 = vadd.f32 %v3980_v6, %v3204_v30 }
 0xc34   : > { %4511 = vmatpush.bf16.msra.mxu0 %v5901_v35 }
 0xc35   : > { %4063 = vadd.xlane.f32.xlu1 %v8328_v1 }
 0xc36   : > { %4560 = vmatpush.bf16.msra.mxu1 %v5905_v7 }
 0xc38   : > { %4512 = vmatpush.bf16.msra.mxu0 %v5893_v62 }
 0xc3a   : > { %4561 = vmatpush.bf16.msra.mxu1 %v5897_v19 }
 0xc3d   : > { %4065 = vadd.xlane.f32.xlu1 %v8333_v16 }
 0xc70   : > { %v4118_v46 = vpop.xlane.xlu1 %4117 }
 0xc71   : > { %v4149_v37 = vmul.f32 %v4118_v46, %v9015_v34 }
 0xc73   : > { %v4165_v50 = vadd.f32 1e-05, %v4149_v37  ;;  %v6618_v37 = vld [vmem:[%s6814_s18 + $0x78] sm:$0xff]  ;;  %s5181_s18 = scalar_lea.hbm %s8985_s14, %s6160_s22 }
 0xc74   : > { %v4014_v7 = vadd.f32 %v6618_v37, %v3998_v17  ;;  %s5184_s21 = sshll.u32 %s5181_s18, 4  ;;  %s5185_s21 = int_to_ptr.hbm [resolvable:$true] %s5184_s21 }
 0xc75   : > { %6507 = vrsqrt.f32 %v4165_v50  ;;  %vm4187_vm3 = vweird.f32 %v4165_v50  ;;  %s6633_s26 = sshra.s32 %s5185_s21, 4  ;;  %s6634_s26 = int_to_ptr.hbm [resolvable:$true] %s6633_s26 }
 0xc76   : > { %s6635_s27 = scalar_lea.hbm %s6634_s26, 128  ;;  %p6640_p0 = scmp.lt.s32.totalorder %s6634_s26, %s8985_s14 }
 0xc77   : > { %p6636_p11 = scmp.ne.s32.totalorder %s6634_s26, %s6635_s27  ;;  %p6641_p1 = scmp.lt.s32.totalorder %s6639_s15, %s6635_s27 }
 0xc78   : > { %v4052_v15 = vpop.xlane.xlu1 %4051  ;;  %v4120_v12 = vpop.xlane.xlu2 %4119 }
 0xc79   : > { %v4076_v2 = vmul.f32 %v4052_v15, %v9015_v34  ;;  %v4150_v38 = vmul.f32 %v4120_v12, %v9015_v34  ;;  %p6637_p12 = pnand %p6636_p11, %p6799_p5  ;;  %p6642_p2 = por %p6641_p1, %p6640_p0 }
 0xc7b   : > { %v6508_v63 = vpop.eup %6507  ;;  %v8436_v55 = vsub.f32 %v8254_v53, %v4076_v2  ;;  %v4166_v61 = vadd.f32 1e-05, %v4150_v38  ;;  %p6638_p13 = pneg %p6637_p12 }
 0xc7c   : > { %v4182_v5 = vmul.f32 %v6508_v63, %v4165_v50  ;;  %vm4188_vm2 = vweird.f32 %v6508_v63  ;;  %v8456_v50 = vld [vmem:[%s8979_s8] ss:$0 sm:$0xff] }
 0xc7d   : > { %6509 = vrsqrt.f32 %v4166_v61  ;;  %v4108_v42 = vmul.f32 %v8436_v55, %v8436_v55  ;;  %vm4189_vm4 = vmor %vm4187_vm3, %vm4188_vm2  ;;  %vm4197_vm6 = vweird.f32 %v4166_v61  ;;  %p6643_p3 = pnand %p6642_p2, %p6638_p13 }
 0xc7e   : > { %v4183_v59 = vmul.f32 %v6508_v63, %v4182_v5 }
 0xc7f   : > { %4131 = vadd.xlane.f32.xlu2 %v4108_v42 }
 0xc80   : > { %v4184_v21 = vmul.f32 0.5, %v4183_v59  ;;  %v4054_v0 = vpop.xlane.xlu1 %4053  ;;  %v4122_v28 = vpop.xlane.xlu2 %4121 }
 0xc81   : > { %v4077_v22 = vmul.f32 %v4054_v0, %v9015_v34  ;;  %v4151_v23 = vmul.f32 %v4122_v28, %v9015_v34 }
 0xc82   : > { %v4185_v58 = vsub.f32 1.5, %v4184_v21 }
 0xc83   : > { %v6510_v36 = vpop.eup %6509  ;;  %v8446_v27 = vsub.f32 %v8268_v47, %v4077_v22  ;;  %v4167_v51 = vadd.f32 1e-05, %v4151_v23 }
 0xc84   : > { %v4186_v48 = vmul.f32 %v6508_v63, %v4185_v58  ;;  %v4192_v11 = vmul.f32 %v6510_v36, %v4166_v61  ;;  %vm4198_vm5 = vweird.f32 %v6510_v36 }
 0xc85   : > { %6511 = vrsqrt.f32 %v4167_v51  ;;  %v4109_v26 = vmul.f32 %v8446_v27, %v8446_v27  ;;  %vm4199_vm7 = vmor %vm4197_vm6, %vm4198_vm5  ;;  %vm4207_vm9 = vweird.f32 %v4167_v51 }
 0xc86   : > { %v4193_v49 = vmul.f32 %v6510_v36, %v4192_v11  ;;  %v4190_v46 = vsel %vm4189_vm4, %v6508_v63, %v4186_v48  ;;  %v8465_v63 = vadd.f32 %v8197_v32, %v4014_v7 }
 0xc87   : > { %4133 = vadd.xlane.f32.xlu2 %v4109_v26  ;;  %v4341_v18 = vmul.f32 %v4190_v46, %v8242_v14  ;;  %v8470_v14 = vld [vmem:[%s8980_s9] ss:$0 sm:$0xff] }
 0xc88   : > { %v4194_v35 = vmul.f32 0.5, %v4193_v49  ;;  %v4124_v20 = vpop.xlane.xlu0 %4123  ;;  %v4056_v33 = vpop.xlane.xlu2 %4055 }
 0xc89   : > { %v4152_v24 = vmul.f32 %v4124_v20, %v9015_v34  ;;  %v4078_v3 = vmul.f32 %v4056_v33, %v9015_v34  ;;  %v4360_v59 = vmul.f32 %v8456_v50, %v4341_v18 }
 0xc8a   : > { %v4195_v62 = vsub.f32 1.5, %v4194_v35 }
 0xc8b   : > { %v6512_v40 = vpop.eup %6511  ;;  %v4168_v19 = vadd.f32 1e-05, %v4152_v24  ;;  %v8460_v15 = vsub.f32 %v8282_v44, %v4078_v3  ;;  %v4379_v58 = vadd.f32 %v8470_v14, %v4360_v59 }
 0xc8c   : > { %v4196_v12 = vmul.f32 %v6510_v36, %v4195_v62  ;;  %v4202_v2 = vmul.f32 %v6512_v40, %v4167_v51  ;;  %vm4208_vm8 = vweird.f32 %v6512_v40 }
 0xc8d   : > { %6513 = vrsqrt.f32 %v4168_v19  ;;  %v4110_v38 = vmul.f32 %v8460_v15, %v8460_v15  ;;  %vm4209_vm10 = vmor %vm4207_vm9, %vm4208_vm8  ;;  %vm4217_vm12 = vweird.f32 %v4168_v19 }
 0xc8e   : > { %v4200_v5 = vsel %vm4199_vm7, %v6510_v36, %v4196_v12  ;;  %v4203_v42 = vmul.f32 %v6512_v40, %v4202_v2 }
 0xc8f   : > { %v4342_v61 = vmul.f32 %v4200_v5, %v8250_v43  ;;  %4135 = vadd.xlane.f32.xlu0 %v4110_v38  ;;  %4067 = vadd.xlane.f32.xlu2 %v8465_v63 }
 0xc90   : > { %v4204_v21 = vmul.f32 0.5, %v4203_v42  ;;  %v4126_v0 = vpop.xlane.xlu0 %4125  ;;  %v4058_v28 = vpop.xlane.xlu2 %4057 }
 0xc91   : > { %v4361_v32 = vmul.f32 %v8456_v50, %v4342_v61  ;;  %v4153_v9 = vmul.f32 %v4126_v0, %v9015_v34  ;;  %v4079_v22 = vmul.f32 %v4058_v28, %v9015_v34 }
 0xc92   : > { %v4205_v23 = vsub.f32 1.5, %v4204_v21 }
 0xc93   : > { %v6514_v6 = vpop.eup %6513  ;;  %v4380_v36 = vadd.f32 %v8470_v14, %v4361_v32  ;;  %v4169_v30 = vadd.f32 1e-05, %v4153_v9  ;;  %v8481_v43 = vsub.f32 %v8294_v10, %v4079_v22 }
 0xc94   : > { %v4206_v48 = vmul.f32 %v6512_v40, %v4205_v23  ;;  %v4212_v11 = vmul.f32 %v6514_v6, %v4168_v19  ;;  %vm4218_vm11 = vweird.f32 %v6514_v6 }
 0xc95   : > { %6515 = vrsqrt.f32 %v4169_v30  ;;  %v4395_v17 = vpack.c.bf16 %v4380_v36, %v4379_v58  ;;  %v4111_v26 = vmul.f32 %v8481_v43, %v8481_v43  ;;  %vm4219_vm13 = vmor %vm4217_vm12, %vm4218_vm11  ;;  %vm4227_vm15 = vweird.f32 %v4169_v30 }
 0xc96   : > { %v4213_v49 = vmul.f32 %v6514_v6, %v4212_v11  ;;  %v4210_v46 = vsel %vm4209_vm10, %v6512_v40, %v4206_v48 }
 0xc97   : > { %4513 = vmatmul.bf16.vlgmr.msra.gmra.mxu0 %v4395_v17  ;;  %4562 = vmatmul.bf16.vlgmr.msra.gmra.mxu1 %v4395_v17  ;;  %v4343_v62 = vmul.f32 %v4210_v46, %v8265_v45 }
 0xc98   : > { %v4214_v35 = vmul.f32 0.5, %v4213_v49  ;;  %4137 = vadd.xlane.f32.xlu0 %v4111_v26  ;;  %v4128_v20 = vpop.xlane.xlu1 %4127  ;;  %v4060_v33 = vpop.xlane.xlu0 %4059 }
 0xc99   : > { %v4154_v37 = vmul.f32 %v4128_v20, %v9015_v34  ;;  %v4080_v7 = vmul.f32 %v4060_v33, %v9015_v34  ;;  %v4362_v59 = vmul.f32 %v8456_v50, %v4343_v62 }
 0xc9a   : > { %v4215_v24 = vsub.f32 1.5, %v4214_v35 }
 0xc9b   : > { %v6516_v3 = vpop.eup %6515  ;;  %v4170_v18 = vadd.f32 1e-05, %v4154_v37  ;;  %v8489_v51 = vsub.f32 %v8308_v25, %v4080_v7  ;;  %v4381_v22 = vadd.f32 %v8470_v14, %v4362_v59 }
 0xc9c   : > { %v4216_v12 = vmul.f32 %v6514_v6, %v4215_v24  ;;  %v4222_v40 = vmul.f32 %v6516_v3, %v4169_v30  ;;  %vm4228_vm14 = vweird.f32 %v6516_v3 }
 0xc9d   : > { %6517 = vrsqrt.f32 %v4170_v18  ;;  %v4112_v2 = vmul.f32 %v8489_v51, %v8489_v51  ;;  %vm4229_vm0 = vmor %vm4227_vm15, %vm4228_vm14  ;;  %vm4237_vm2 = vweird.f32 %v4170_v18 }
 0xc9e   : > { %v4220_v38 = vsel %vm4219_vm13, %v6514_v6, %v4216_v12  ;;  %v4223_v5 = vmul.f32 %v6516_v3, %v4222_v40 }
 0xc9f   : > { %v4344_v42 = vmul.f32 %v4220_v38, %v8276_v60  ;;  %4139 = vadd.xlane.f32.xlu1 %v4112_v2 }
 0xca0   : > { %v4224_v45 = vmul.f32 0.5, %v4223_v5  ;;  %v4130_v61 = vpop.xlane.xlu1 %4129  ;;  %v4062_v21 = vpop.xlane.xlu0 %4061 }
 0xca1   : > { %v4081_v0 = vmul.f32 %v4062_v21, %v9015_v34  ;;  %v4363_v19 = vmul.f32 %v8456_v50, %v4344_v42 }
 0xca2   : > { %v4225_v28 = vsub.f32 1.5, %v4224_v45 }
 0xca3   : > { %v6518_v32 = vpop.eup %6517  ;;  %v8498_v9 = vsub.f32 %v8322_v56, %v4081_v0  ;;  %v4382_v23 = vadd.f32 %v8470_v14, %v4363_v19 }
 0xca4   : > { %v4226_v60 = vmul.f32 %v6516_v3, %v4225_v28  ;;  %v4232_v6 = vmul.f32 %v6518_v32, %v4170_v18  ;;  %vm4238_vm1 = vweird.f32 %v6518_v32 }
 0xca5   : > { %v4396_v58 = vpack.c.bf16 %v4382_v23, %v4381_v22  ;;  %v4113_v36 = vmul.f32 %v8498_v9, %v8498_v9  ;;  %vm4239_vm3 = vmor %vm4237_vm2, %vm4238_vm1 }
 0xca6   : > { %v4233_v48 = vmul.f32 %v6518_v32, %v4232_v6  ;;  %v4230_v11 = vsel %vm4229_vm0, %v6516_v3, %v4226_v60  ;;  %v6150_v60 = vld [vmem:[%s8983_s12 + $0x30] sm:$0xff] }
 0xca7   : > { %4518 = vmatmul.bf16.gmra.mxu0 %v4396_v58  ;;  %4567 = vmatmul.bf16.gmra.mxu1 %v4396_v58  ;;  %v4345_v35 = vmul.f32 %v4230_v11, %v8291_v54 }
 0xca8   : > { %v4234_v17 = vmul.f32 0.5, %v4233_v48  ;;  %4141 = vadd.xlane.f32.xlu2 %v4113_v36  ;;  %v4064_v26 = vpop.xlane.xlu1 %4063 }
 0xca9   : > { %v4082_v49 = vmul.f32 %v4064_v26, %v9015_v34  ;;  %v4364_v24 = vmul.f32 %v8456_v50, %v4345_v35 }
 0xcaa   : > { %v4235_v46 = vsub.f32 1.5, %v4234_v17  ;;  %v6149_v17 = vld [vmem:[%s8983_s12 + $0x28] sm:$0xff] }
 0xcab   : > { %v8507_v20 = vsub.f32 %v8328_v1, %v4082_v49  ;;  %v4383_v18 = vadd.f32 %v8470_v14, %v4364_v24 }
 0xcac   : > { %v4236_v33 = vmul.f32 %v6518_v32, %v4235_v46 }
 0xcad   : > { %v4114_v30 = vmul.f32 %v8507_v20, %v8507_v20 }
 0xcae   : > { %v4240_v37 = vsel %vm4239_vm3, %v6518_v32, %v4236_v33  ;;  %v6151_v32 = vld [vmem:[%s8983_s12 + $0x38] sm:$0xff] }
 0xcaf   : > { %v4346_v7 = vmul.f32 %v4240_v37, %v8302_v52  ;;  %4143 = vadd.xlane.f32.xlu0 %v4114_v30  ;;  %v4155_v52 = vmul.f32 %v4130_v61, %v9015_v34  ;;  %5039 = vmatpush.bf16.msra.mxu2 %v6151_v32 }
 0xcb0   : > { %v4066_v3 = vpop.xlane.xlu1 %4065 }
 0xcb1   : > { %v4083_v62 = vmul.f32 %v4066_v3, %v9015_v34  ;;  %v4365_v54 = vmul.f32 %v8456_v50, %v4346_v7  ;;  %v4171_v5 = vadd.f32 1e-05, %v4155_v52 }
 0xcb3   : > { %v8516_v12 = vsub.f32 %v8333_v16, %v4083_v62  ;;  %v4384_v40 = vadd.f32 %v8470_v14, %v4365_v54  ;;  %6519 = vrsqrt.f32 %v4171_v5  ;;  %5040 = vmatpush.bf16.msra.mxu2 %v6150_v60  ;;  %vm4247_vm5 = vweird.f32 %v4171_v5  ;;  %v4419_v60 = vld [vmem:[%s8982_s11] sm:$0x3] }
 0xcb5   : > { %v4115_v2 = vmul.f32 %v8516_v12, %v8516_v12  ;;  %v4397_v38 = vpack.c.bf16 %v4384_v40, %v4383_v18 }
 0xcb7   : > { %4145 = vadd.xlane.f32.xlu1 %v4115_v2  ;;  %4523 = vmatmul.bf16.gmra.mxu0 %v4397_v38 }
 0xcb8   : > { %4572 = vmatmul.bf16.gmra.mxu1 %v4397_v38  ;;  %5041 = vmatpush.bf16.msra.mxu2 %v6149_v17  ;;  %v8581_v17 = vperm.slane %v4419_v60, 0 }
 0xcb9   : > { %v6520_v42 = vpop.eup %6519 }
 0xcba   : > { %v4242_v59 = vmul.f32 %v6520_v42, %v4171_v5  ;;  %vm4248_vm4 = vweird.f32 %v6520_v42 }
 0xcbb   : > { %vm4249_vm6 = vmor %vm4247_vm5, %vm4248_vm4 }
 0xcbc   : > { %v4243_v45 = vmul.f32 %v6520_v42, %v4242_v59 }
 0xcbe   : > { %v4244_v28 = vmul.f32 0.5, %v4243_v45 }
 0xcc0   : > { %v4245_v22 = vsub.f32 1.5, %v4244_v28 }
 0xcc2   : > { %v4246_v36 = vmul.f32 %v6520_v42, %v4245_v22 }
 0xcc4   : > { %v4250_v26 = vsel %vm4249_vm6, %v6520_v42, %v4246_v36  ;;  %v6146_v36 = vld [vmem:[%s8983_s12 + $0x10] sm:$0xff] }
 0xcc5   : > { %v4347_v24 = vmul.f32 %v4250_v26, %v8317_v4  ;;  %v6148_v4 = vld [vmem:[%s8983_s12 + $0x20] sm:$0xff]  ;;  %v8583_v26 = vperm.slane %v4419_v60, 1 }
 0xcc6   : > { %5042 = vmatpush.bf16.msra.mxu2 %v6148_v4 }
 0xcc7   : > { %v4366_v5 = vmul.f32 %v8456_v50, %v4347_v24 }
 0xcf2   : > { %v4132_v21 = vpop.xlane.xlu2 %4131 }
 0xcf3   : > { %v4156_v0 = vmul.f32 %v4132_v21, %v9015_v34  ;;  %v6147_v21 = vld [vmem:[%s8983_s12 + $0x18] sm:$0xff] }
 0xcf4   : > { %5043 = vmatpush.bf16.msra.mxu2 %v6147_v21 }
 0xcf5   : > { %v4172_v19 = vadd.f32 1e-05, %v4156_v0  ;;  %v6159_v0 = vld [vmem:[%s8983_s12 + $0x78] sm:$0xff] }
 0xcf6   : > { %6161 = vmatpush.bf16.msra.mxu3 %v6159_v0  ;;  %5088 = vmatpush.bf16.msrb.mxu0 %v6159_v0 }
 0xcf7   : > { %6521 = vrsqrt.f32 %v4172_v19  ;;  %vm4257_vm8 = vweird.f32 %v4172_v19 }
 0xcf8   : > { %5044 = vmatpush.bf16.msra.mxu2 %v6146_v36 }
 0xcfa   : > { %v4134_v23 = vpop.xlane.xlu2 %4133 }
 0xcfb   : > { %v4157_v61 = vmul.f32 %v4134_v23, %v9015_v34 }
 0xcfd   : > { %v6522_v6 = vpop.eup %6521  ;;  %v8531_v58 = vadd.f32 1e-05, %v4157_v61 }
 0xcfe   : > { %v4252_v48 = vmul.f32 %v6522_v6, %v4172_v19  ;;  %vm4258_vm7 = vweird.f32 %v6522_v6 }
 0xcff   : > { %6523 = vrsqrt.f32 %v8531_v58  ;;  %vm4259_vm9 = vmor %vm4257_vm8, %vm4258_vm7  ;;  %vm4267_vm11 = vweird.f32 %v8531_v58 }
 0xd00   : > { %v4253_v11 = vmul.f32 %v6522_v6, %v4252_v48  ;;  %v6158_v48 = vld [vmem:[%s8983_s12 + $0x70] sm:$0xff] }
 0xd01   : > { %6162 = vmatpush.bf16.msra.mxu3 %v6158_v48  ;;  %5089 = vmatpush.bf16.msrb.mxu0 %v6158_v48 }
 0xd02   : > { %v4254_v49 = vmul.f32 0.5, %v4253_v11  ;;  %v4136_v46 = vpop.xlane.xlu0 %4135  ;;  %v4068_v35 = vpop.xlane.xlu2 %4067 }
 0xd03   : > { %v4158_v33 = vmul.f32 %v4136_v46, %v9015_v34  ;;  %v4084_v30 = vmul.f32 %v4068_v35, %v9015_v34 }
 0xd04   : > { %v4255_v37 = vsub.f32 1.5, %v4254_v49 }
 0xd05   : > { %v8539_v7 = vpop.eup %6523  ;;  %v8542_v3 = vadd.f32 1e-05, %v4158_v33  ;;  %v8545_v62 = vsub.f32 %v8465_v63, %v4084_v30  ;;  %v6145_v30 = vld [vmem:[%s8983_s12 + $0x8] sm:$0xff] }
 0xd06   : > { %v4256_v54 = vmul.f32 %v6522_v6, %v4255_v37  ;;  %v4262_v18 = vmul.f32 %v8539_v7, %v8531_v58  ;;  %vm4268_vm10 = vweird.f32 %v8539_v7  ;;  %v6157_v37 = vld [vmem:[%s8983_s12 + $0x68] sm:$0xff]  ;;  %5045 = vmatpush.bf16.msra.mxu2 %v6145_v30 }
 0xd07   : > { %6525 = vrsqrt.f32 %v8542_v3  ;;  %v4116_v40 = vmul.f32 %v8545_v62, %v8545_v62  ;;  %vm8595_vm13 = vmor %vm4267_vm11, %vm4268_vm10  ;;  %vm4277_vm14 = vweird.f32 %v8542_v3  ;;  %6163 = vmatpush.bf16.msra.mxu3 %v6157_v37  ;;  %5090 = vmatpush.bf16.msrb.mxu0 %v6157_v37 }
 0xd08   : > { %v4260_v2 = vsel %vm4259_vm9, %v6522_v6, %v4256_v54  ;;  %v4263_v38 = vmul.f32 %v8539_v7, %v4262_v18 }
 0xd09   : > { %v4348_v52 = vmul.f32 %v4260_v2, %v8436_v55  ;;  %4147 = vadd.xlane.f32.xlu2 %v4116_v40  ;;  %v4385_v55 = vadd.f32 %v8470_v14, %v4366_v5  ;;  %v6154_v40 = vld [vmem:[%s8983_s12 + $0x50] sm:$0xff] }
 0xd0a   : > { %v4264_v42 = vmul.f32 0.5, %v4263_v38 }
 0xd0b   : > { %v4138_v59 = vpop.xlane.xlu0 %4137  ;;  %v4367_v45 = vmul.f32 %v8456_v50, %v4348_v52 }
 0xd0c   : > { %v4159_v19 = vmul.f32 %v4138_v59, %v9015_v34  ;;  %v4265_v22 = vsub.f32 1.5, %v4264_v42  ;;  %v6144_v59 = vld [vmem:[%s8983_s12] sm:$0xff] }
 0xd0d   : > { %v6526_v28 = vpop.eup %6525  ;;  %v4386_v32 = vadd.f32 %v8470_v14, %v4367_v45  ;;  %v6156_v45 = vld [vmem:[%s8983_s12 + $0x60] sm:$0xff]  ;;  %5046 = vmatpush.bf16.msra.mxu2 %v6144_v59 }
 0xd0e   : > { %v4272_v23 = vmul.f32 %v6526_v28, %v8542_v3  ;;  %v8569_v61 = vadd.f32 1e-05, %v4159_v19  ;;  %v4266_v49 = vmul.f32 %v8539_v7, %v4265_v22  ;;  %vm4278_vm12 = vweird.f32 %v6526_v28  ;;  %6164 = vmatpush.bf16.msra.mxu3 %v6156_v45  ;;  %5091 = vmatpush.bf16.msrb.mxu0 %v6156_v45 }
 0xd0f   : > { %v4398_v6 = vpack.c.bf16 %v4386_v32, %v4385_v55  ;;  %vm4279_vm15 = vmor %vm4277_vm14, %vm4278_vm12 }
 0xd10   : > { %v4273_v11 = vmul.f32 %v6526_v28, %v4272_v23  ;;  %6527 = vrsqrt.f32 %v8569_v61  ;;  %v4270_v58 = vsel %vm8595_vm13, %v8539_v7, %v4266_v49  ;;  %vm4287_vm1 = vweird.f32 %v8569_v61 }
 0xd11   : > { %4528 = vmatmul.bf16.gmra.mxu0 %v4398_v6  ;;  %4577 = vmatmul.bf16.gmra.mxu1 %v4398_v6  ;;  %v4349_v21 = vmul.f32 %v4270_v58, %v8446_v27 }
 0xd12   : > { %v4274_v46 = vmul.f32 0.5, %v4273_v11  ;;  %v4140_v35 = vpop.xlane.xlu1 %4139 }
 0xd13   : > { %v4160_v33 = vmul.f32 %v4140_v35, %v9015_v34 }
 0xd14   : > { %v4275_v24 = vsub.f32 1.5, %v4274_v46  ;;  %v4514_v54 = vpop.f32.mrf.mxu0  ;;  %v4563_v18 = vpop.f32.mrf.mxu1 }
 0xd15   : > { %v8599_v4 = vadd.f32 1e-05, %v4160_v33  ;;  %v8602_v2 = vadd.f32 %v4514_v54, %v8581_v17  ;;  %v8605_v38 = vadd.f32 %v4563_v18, %v8583_v26 }
 0xd16   : > { %v8607_v52 = vpop.eup %6527  ;;  %v4276_v5 = vmul.f32 %v6526_v28, %v4275_v24 }
 0xd17   : > { %v4282_v42 = vmul.f32 %v8607_v52, %v8569_v61  ;;  %6529 = vrsqrt.f32 %v8599_v4  ;;  %v4635_v3 = vmul.f32 0.044715, %v8602_v2  ;;  %v4636_v19 = vmul.f32 0.044715, %v8605_v38  ;;  %v6153_v61 = vld [vmem:[%s8983_s12 + $0x48] sm:$0xff] }
 0xd18   : > { %v4280_v7 = vsel %vm4279_vm15, %v6526_v28, %v4276_v5  ;;  %v6155_v28 = vld [vmem:[%s8983_s12 + $0x58] sm:$0xff]  ;;  %vm4288_vm0 = vweird.f32 %v8607_v52  ;;  %vm4297_vm3 = vweird.f32 %v8599_v4 }
 0xd19   : > { %v4283_v0 = vmul.f32 %v8607_v52, %v4282_v42  ;;  %v4667_v55 = vmul.f32 %v4635_v3, %v8602_v2  ;;  %v4350_v32 = vmul.f32 %v4280_v7, %v8460_v15  ;;  %v4668_v49 = vmul.f32 %v4636_v19, %v8605_v38  ;;  %6165 = vmatpush.bf16.msra.mxu3 %v6155_v28  ;;  %vm8656_vm2 = vmor %vm4287_vm1, %vm4288_vm0 }
 0xd1a   : > { %v4368_v15 = vmul.f32 %v8456_v50, %v4349_v21  ;;  %5092 = vmatpush.bf16.msrb.mxu0 %v6155_v28 }
 0xd1b   : > { %v4284_v22 = vmul.f32 0.5, %v4283_v0  ;;  %v4142_v23 = vpop.xlane.xlu2 %4141  ;;  %v4699_v60 = vmul.f32 %v4667_v55, %v8602_v2  ;;  %v4369_v18 = vmul.f32 %v8456_v50, %v4350_v32  ;;  %v4700_v3 = vmul.f32 %v4668_v49, %v8605_v38 }
 0xd1c   : > { %v4161_v27 = vmul.f32 %v4142_v23, %v9015_v34  ;;  %v4516_v6 = vpop.f32.mrf.mxu0  ;;  %v4565_v36 = vpop.f32.mrf.mxu1  ;;  %v4387_v59 = vadd.f32 %v8470_v14, %v4368_v15 }
 0xd1d   : > { %v6530_v48 = vpop.eup %6529  ;;  %v4285_v11 = vsub.f32 1.5, %v4284_v22  ;;  %v8635_v46 = vadd.f32 %v4516_v6, %v8581_v17  ;;  %v4731_v33 = vadd.f32 %v4699_v60, %v8602_v2  ;;  %v8643_v37 = vadd.f32 %v4565_v36, %v8583_v26  ;;  %6166 = vmatpush.bf16.msra.mxu3 %v6154_v40 }
 0xd1e   : > { %v4292_v35 = vmul.f32 %v6530_v48, %v8599_v4  ;;  %v8640_v30 = vadd.f32 1e-05, %v4161_v27  ;;  %v4388_v32 = vadd.f32 %v8470_v14, %v4369_v18  ;;  %5093 = vmatpush.bf16.msrb.mxu0 %v6154_v40  ;;  %vm4298_vm4 = vweird.f32 %v6530_v48  ;;  %v6152_v40 = vld [vmem:[%s8983_s12 + $0x40] sm:$0xff] }
 0xd1f   : > { %v4286_v24 = vmul.f32 %v8607_v52, %v4285_v11  ;;  %v4637_v54 = vmul.f32 0.044715, %v8635_v46  ;;  %v4763_v5 = vmul.f32 0.7978846, %v4731_v33  ;;  %v4638_v21 = vmul.f32 0.044715, %v8643_v37  ;;  %vm4299_vm5 = vmor %vm4297_vm3, %vm4298_vm4 }
 0xd20   : > { %v4293_v58 = vmul.f32 %v6530_v48, %v4292_v35  ;;  %6531 = vrsqrt.f32 %v8640_v30  ;;  %v4399_v36 = vpack.c.bf16 %v4388_v32, %v4387_v59  ;;  %v4732_v33 = vadd.f32 %v4700_v3, %v8605_v38 }
 0xd21   : > { %v4669_v42 = vmul.f32 %v4637_v54, %v8635_v46  ;;  %v4290_v19 = vsel %vm8656_vm2, %v8607_v52, %v4286_v24  ;;  %6533 = vtanh.f32 %v4763_v5  ;;  %v4670_v28 = vmul.f32 %v4638_v21, %v8643_v37  ;;  %6167 = vmatpush.bf16.msra.mxu3 %v6153_v61 }
 0xd22   : > { %v4294_v7 = vmul.f32 0.5, %v4293_v58  ;;  %v4144_v0 = vpop.xlane.xlu0 %4143  ;;  %v4351_v15 = vmul.f32 %v4290_v19, %v8481_v43  ;;  %4533 = vmatmul.bf16.gmra.mxu0 %v4399_v36  ;;  %4582 = vmatmul.bf16.gmra.mxu1 %v4399_v36  ;;  %v4764_v45 = vmul.f32 0.7978846, %v4732_v33  ;;  %vm4307_vm6 = vweird.f32 %v8640_v30 }
 0xd23   : > { %v4701_v55 = vmul.f32 %v4669_v42, %v8635_v46  ;;  %v4162_v22 = vmul.f32 %v4144_v0, %v9015_v34  ;;  %v4702_v24 = vmul.f32 %v4670_v28, %v8643_v37  ;;  %5094 = vmatpush.bf16.msrb.mxu0 %v6153_v61  ;;  %v4603_v61 = vmul.f32 0.5, %v8602_v2 }
 0xd24   : > { %v4295_v23 = vsub.f32 1.5, %v4294_v7  ;;  %v4519_v60 = vpop.f32.mrf.mxu0  ;;  %v4568_v27 = vpop.f32.mrf.mxu1  ;;  %v4370_v7 = vmul.f32 %v8456_v50, %v4351_v15 }
 0xd25   : > { %v4733_v6 = vadd.f32 %v4701_v55, %v8635_v46  ;;  %v8674_v11 = vadd.f32 1e-05, %v4162_v22  ;;  %v8677_v52 = vadd.f32 %v4519_v60, %v8581_v17  ;;  %v8691_v43 = vadd.f32 %v4568_v27, %v8583_v26  ;;  %6168 = vmatpush.bf16.msra.mxu3 %v6152_v40 }
 0xd26   : > { %v8679_v49 = vpop.eup %6531  ;;  %v4296_v35 = vmul.f32 %v6530_v48, %v4295_v23  ;;  %v4734_v21 = vadd.f32 %v4702_v24, %v8643_v37 }
 0xd27   : > { %v4302_v54 = vmul.f32 %v8679_v49, %v8640_v30  ;;  %v4765_v18 = vmul.f32 0.7978846, %v4733_v6  ;;  %6535 = vrsqrt.f32 %v8674_v11  ;;  %v4639_v42 = vmul.f32 0.044715, %v8677_v52  ;;  %v6534_v59 = vpop.eup %6533  ;;  %5095 = vmatpush.bf16.msrb.mxu0 %v6152_v40 }
 0xd28   : > { %v4300_v58 = vsel %vm4299_vm5, %v6530_v48, %v4296_v35  ;;  %v4640_v0 = vmul.f32 0.044715, %v8691_v43  ;;  %v4827_v27 = vadd.f32 1.0, %v6534_v59  ;;  %v4766_v36 = vmul.f32 0.7978846, %v4734_v21 }
 0xd29   : > { %v4352_v4 = vmul.f32 %v4300_v58, %v8489_v51  ;;  %v4303_v5 = vmul.f32 %v8679_v49, %v4302_v54  ;;  %6537 = vtanh.f32 %v4765_v18  ;;  %v4605_v51 = vmul.f32 0.5, %v8635_v46 }
 0xd2a   : > { %v4671_v23 = vmul.f32 %v4639_v42, %v8677_v52  ;;  %v4672_v28 = vmul.f32 %v4640_v0, %v8691_v43  ;;  %6539 = vtanh.f32 %v4764_v45  ;;  %v4389_v35 = vadd.f32 %v8470_v14, %v4370_v7 }
 0xd2b   : > { %v4304_v3 = vmul.f32 0.5, %v4303_v5  ;;  %v4371_v48 = vmul.f32 %v8456_v50, %v4352_v4  ;;  %vm4308_vm7 = vweird.f32 %v8679_v49  ;;  %v4859_v45 = vmul.f32 %v4827_v27, %v4603_v61 }
 0xd2c   : > { %v4521_v19 = vpop.f32.mrf.mxu0  ;;  %v4570_v55 = vpop.f32.mrf.mxu1  ;;  %v4704_v15 = vmul.f32 %v4672_v28, %v8691_v43  ;;  %v4703_v5 = vmul.f32 %v4671_v23, %v8677_v52  ;;  %6541 = vtanh.f32 %v4766_v36  ;;  %vm8730_vm8 = vmor %vm4307_vm6, %vm4308_vm7  ;;  %vm4317_vm10 = vweird.f32 %v8674_v11 }
 0xd2d   : > { %v6536_v32 = vpop.eup %6535  ;;  %v4305_v22 = vsub.f32 1.5, %v4304_v3  ;;  %v8709_v60 = vadd.f32 %v4521_v19, %v8581_v17  ;;  %v8713_v6 = vadd.f32 %v4570_v55, %v8583_v26  ;;  %v4390_v33 = vadd.f32 %v8470_v14, %v4371_v48 }
 0xd2e   : > { %v4312_v2 = vmul.f32 %v6536_v32, %v8674_v11  ;;  %v4736_v58 = vadd.f32 %v4704_v15, %v8691_v43  ;;  %vm4318_vm9 = vweird.f32 %v6536_v32 }
 0xd2f   : > { %v6538_v46 = vpop.eup %6537  ;;  %v4641_v18 = vmul.f32 0.044715, %v8709_v60  ;;  %v4306_v40 = vmul.f32 %v8679_v49, %v4305_v22  ;;  %v4642_v4 = vmul.f32 0.044715, %v8713_v6  ;;  %v4400_v0 = vpack.c.bf16 %v4390_v33, %v4389_v35  ;;  %vm4319_vm11 = vmor %vm4317_vm10, %vm4318_vm9 }
 0xd30   : > { %v4829_v24 = vadd.f32 1.0, %v6538_v46  ;;  %v4313_v54 = vmul.f32 %v6536_v32, %v4312_v2  ;;  %v4768_v3 = vmul.f32 0.7978846, %v4736_v58  ;;  %v6540_v48 = vpop.eup %6539  ;;  %v4735_v2 = vadd.f32 %v4703_v5, %v8677_v52 }
 0xd31   : > { %v4673_v59 = vmul.f32 %v4641_v18, %v8709_v60  ;;  %v4674_v21 = vmul.f32 %v4642_v4, %v8713_v6 }
 0xd32   : > { %v4314_v42 = vmul.f32 0.5, %v4313_v54  ;;  %v4861_v7 = vmul.f32 %v4829_v24, %v4605_v51  ;;  %v4310_v51 = vsel %vm8730_vm8, %v8679_v49, %v4306_v40  ;;  %6543 = vtanh.f32 %v4768_v3  ;;  %4538 = vmatmul.bf16.gmra.mxu0 %v4400_v0  ;;  %4587 = vmatmul.bf16.gmra.mxu1 %v4400_v0  ;;  %v6542_v18 = vpop.eup %6541 }
 0xd33   : > { %v4705_v61 = vmul.f32 %v4673_v59, %v8709_v60  ;;  %v4706_v28 = vmul.f32 %v4674_v21, %v8713_v6  ;;  %v4353_v33 = vmul.f32 %v4310_v51, %v8498_v9  ;;  %v4767_v11 = vmul.f32 0.7978846, %v4735_v2 }
 0xd34   : > { %v4315_v55 = vsub.f32 1.5, %v4314_v42  ;;  %v4524_v22 = vpop.f32.mrf.mxu0  ;;  %v4891_v23 = vpack.c.bf16 %v4861_v7, %v4859_v45  ;;  %v4828_v21 = vadd.f32 1.0, %v6540_v48 }
 0xd35   : > { %v8740_v27 = vadd.f32 %v4524_v22, %v8581_v17  ;;  %v4573_v30 = vpop.f32.mrf.mxu1  ;;  %v4738_v15 = vadd.f32 %v4706_v28, %v8713_v6  ;;  %v4737_v35 = vadd.f32 %v4705_v61, %v8709_v60  ;;  %6545 = vtanh.f32 %v4767_v11 }
 0xd36   : > { %v4316_v46 = vmul.f32 %v6536_v32, %v4315_v55  ;;  %v8745_v36 = vadd.f32 %v4573_v30, %v8583_v26  ;;  %5047 = vmatmul.bf16.vlgmr.msra.gmra.mxu2 %v4891_v23  ;;  %v4606_v22 = vmul.f32 0.5, %v8643_v37  ;;  %v4830_v23 = vadd.f32 1.0, %v6542_v18 }
 0xd37   : > { %v4643_v49 = vmul.f32 0.044715, %v8740_v27  ;;  %v4770_v58 = vmul.f32 0.7978846, %v4738_v15  ;;  %v4769_v5 = vmul.f32 0.7978846, %v4737_v35 }
 0xd38   : > { %v4320_v24 = vsel %vm4319_vm11, %v6536_v32, %v4316_v46  ;;  %v4644_v54 = vmul.f32 0.044715, %v8745_v36  ;;  %v4372_v32 = vmul.f32 %v8456_v50, %v4353_v33  ;;  %v6544_v3 = vpop.eup %6543  ;;  %v4608_v28 = vmul.f32 0.5, %v8691_v43 }
 0xd39   : > { %v4354_v40 = vmul.f32 %v4320_v24, %v8507_v20  ;;  %v4675_v4 = vmul.f32 %v4643_v49, %v8740_v27  ;;  %6547 = vtanh.f32 %v4770_v58  ;;  %v4604_v20 = vmul.f32 0.5, %v8605_v38 }
 0xd3a   : > { %v4676_v42 = vmul.f32 %v4644_v54, %v8745_v36  ;;  %6549 = vtanh.f32 %v4769_v5  ;;  %v4607_v38 = vmul.f32 0.5, %v8677_v52  ;;  %v4832_v46 = vadd.f32 1.0, %v6544_v3 }
 0xd3b   : > { %v4373_v59 = vmul.f32 %v8456_v50, %v4354_v40  ;;  %v4707_v45 = vmul.f32 %v4675_v4, %v8740_v27  ;;  %v6546_v48 = vpop.eup %6545  ;;  %v4610_v15 = vmul.f32 0.5, %v8713_v6  ;;  %v4391_v35 = vadd.f32 %v8470_v14, %v4372_v32 }
 0xd3c   : > { %v4526_v9 = vpop.f32.mrf.mxu0  ;;  %v4708_v7 = vmul.f32 %v4676_v42, %v8745_v36  ;;  %v4831_v24 = vadd.f32 1.0, %v6546_v48  ;;  %v8770_v11 = vmul.f32 %v4828_v21, %v4604_v20  ;;  %v8772_v4 = vmul.f32 %v4830_v23, %v4606_v22 }
 0xd3d   : > { %v4527_v0 = vadd.f32 %v4526_v9, %v8581_v17  ;;  %v4575_v19 = vpop.f32.mrf.mxu1  ;;  %v4739_v55 = vadd.f32 %v4707_v45, %v8740_v27  ;;  %v4392_v2 = vadd.f32 %v8470_v14, %v4373_v59  ;;  %v4609_v5 = vmul.f32 0.5, %v8709_v60 }
 0xd3e   : > { %v4576_v61 = vadd.f32 %v4575_v19, %v8583_v26  ;;  %v4740_v51 = vadd.f32 %v4708_v7, %v8745_v36  ;;  %v4864_v59 = vmul.f32 %v4832_v46, %v4608_v28  ;;  %v4892_v32 = vpack.c.bf16 %v8772_v4, %v8770_v11 }
 0xd3f   : > { %v4645_v30 = vmul.f32 0.044715, %v4527_v0  ;;  %v6548_v37 = vpop.eup %6547  ;;  %v4771_v54 = vmul.f32 0.7978846, %v4739_v55  ;;  %v4401_v52 = vpack.c.bf16 %v4392_v2, %v4391_v35  ;;  %v4863_v7 = vmul.f32 %v4831_v24, %v4607_v38 }
 0xd40   : > { %v4646_v49 = vmul.f32 0.044715, %v4576_v61  ;;  %v6550_v18 = vpop.eup %6549  ;;  %v4834_v43 = vadd.f32 1.0, %v6548_v37  ;;  %v4772_v58 = vmul.f32 0.7978846, %v4740_v51  ;;  %v4613_v48 = vmul.f32 0.5, %v4527_v0 }
 0xd41   : > { %v4677_v33 = vmul.f32 %v4645_v30, %v4527_v0  ;;  %v4833_v42 = vadd.f32 1.0, %v6550_v18  ;;  %6551 = vtanh.f32 %v4771_v54  ;;  %v4614_v35 = vmul.f32 0.5, %v4576_v61 }
 0xd42   : > { %v4678_v40 = vmul.f32 %v4646_v49, %v4576_v61  ;;  %v4866_v45 = vmul.f32 %v4834_v43, %v4610_v15  ;;  %6553 = vtanh.f32 %v4772_v58  ;;  %4543 = vmatmul.bf16.gmra.mxu0 %v4401_v52  ;;  %4592 = vmatmul.bf16.gmra.mxu1 %v4401_v52  ;;  %v4611_v15 = vmul.f32 0.5, %v8740_v27  ;;  %v4146_v58 = vpop.xlane.xlu1 %4145 }
 0xd43   : > { %v4709_v6 = vmul.f32 %v4677_v33, %v4527_v0  ;;  %v4865_v3 = vmul.f32 %v4833_v42, %v4609_v5  ;;  %v4612_v49 = vmul.f32 0.5, %v8745_v36  ;;  %v4163_v52 = vmul.f32 %v4146_v58, %v9015_v34 }
 0xd44   : > { %v4710_v9 = vmul.f32 %v4678_v40, %v4576_v61  ;;  %v4894_v21 = vpack.c.bf16 %v4866_v45, %v4864_v59 }
 0xd45   : > { %v4741_v20 = vadd.f32 %v4709_v6, %v4527_v0  ;;  %v4893_v55 = vpack.c.bf16 %v4865_v3, %v4863_v7  ;;  %v4179_v5 = vadd.f32 1e-05, %v4163_v52 }
 0xd46   : > { %v4742_v19 = vadd.f32 %v4710_v9, %v4576_v61  ;;  %5101 = vmatmul.bf16.vlgmr.msra.gmra.mxu3 %v4894_v21 }
 0xd47   : > { %v4773_v22 = vmul.f32 0.7978846, %v4741_v20  ;;  %5052 = vmatmul.bf16.gmra.mxu2 %v4893_v55  ;;  %v6552_v23 = vpop.eup %6551  ;;  %vm4327_vm13 = vweird.f32 %v4179_v5 }
 0xd48   : > { %v4774_v60 = vmul.f32 0.7978846, %v4742_v19  ;;  %v6554_v51 = vpop.eup %6553  ;;  %v4835_v30 = vadd.f32 1.0, %v6552_v23 }
 0xd49   : > { %6555 = vtanh.f32 %v4773_v22  ;;  %v4836_v2 = vadd.f32 1.0, %v6554_v51 }
 0xd4a   : > { %6557 = vtanh.f32 %v4774_v60  ;;  %v4867_v24 = vmul.f32 %v4835_v30, %v4611_v15 }
 0xd4b   : > { %v4868_v54 = vmul.f32 %v4836_v2, %v4612_v49  ;;  %6559 = vrsqrt.f32 %v4179_v5 }
 0xd4f   : > { %v6556_v28 = vpop.eup %6555 }
 0xd50   : > { %v6558_v38 = vpop.eup %6557  ;;  %v4837_v46 = vadd.f32 1.0, %v6556_v28 }
 0xd51   : > { %v4838_v37 = vadd.f32 1.0, %v6558_v38  ;;  %v6560_v0 = vpop.eup %6559 }
 0xd52   : > { %v4869_v33 = vmul.f32 %v4837_v46, %v4613_v48  ;;  %v4322_v42 = vmul.f32 %v6560_v0, %v4179_v5  ;;  %vm4328_vm12 = vweird.f32 %v6560_v0 }
 0xd53   : > { %v4870_v18 = vmul.f32 %v4838_v37, %v4614_v35  ;;  %vm4329_vm14 = vmor %vm4327_vm13, %vm4328_vm12 }
 0xd54   : > { %v4895_v43 = vpack.c.bf16 %v4869_v33, %v4867_v24  ;;  %v4323_v27 = vmul.f32 %v6560_v0, %v4322_v42 }
 0xd55   : > { %v4896_v40 = vpack.c.bf16 %v4870_v18, %v4868_v54 }
 0xd56   : > { %v4324_v61 = vmul.f32 0.5, %v4323_v27 }
 0xd57   : > { %5106 = vmatmul.bf16.gmra.mxu3 %v4896_v40  ;;  %5057 = vmatmul.bf16.gmra.mxu2 %v4895_v43 }
 0xd58   : > { %v4325_v45 = vsub.f32 1.5, %v4324_v61 }
 0xd5a   : > { %v4326_v7 = vmul.f32 %v6560_v0, %v4325_v45 }
 0xd5c   : > { %v4330_v21 = vsel %vm4329_vm14, %v6560_v0, %v4326_v7 }
 0xd5d   : > { %v4355_v55 = vmul.f32 %v4330_v21, %v8516_v12 }
 0xd5f   : > { %v4374_v48 = vmul.f32 %v8456_v50, %v4355_v55 }
 0xd61   : > { %v4393_v54 = vadd.f32 %v8470_v14, %v4374_v48 }
 0xd7c   : > { %v4148_v6 = vpop.xlane.xlu2 %4147 }
 0xd7d   : > { %v4164_v36 = vmul.f32 %v4148_v6, %v9015_v34 }
 0xd7f   : > { %v4180_v59 = vadd.f32 1e-05, %v4164_v36 }
 0xd81   : > { %6561 = vrsqrt.f32 %v4180_v59  ;;  %vm4337_vm0 = vweird.f32 %v4180_v59 }
 0xd87   : > { %v6562_v9 = vpop.eup %6561 }
 0xd88   : > { %v4332_v3 = vmul.f32 %v6562_v9, %v4180_v59  ;;  %vm4338_vm15 = vweird.f32 %v6562_v9 }
 0xd89   : > { %vm4339_vm1 = vmor %vm4337_vm0, %vm4338_vm15 }
 0xd8a   : > { %v4333_v20 = vmul.f32 %v6562_v9, %v4332_v3 }
 0xd8c   : > { %v4334_v19 = vmul.f32 0.5, %v4333_v20 }
 0xd8e   : > { %v4335_v22 = vsub.f32 1.5, %v4334_v19  ;;  %v4529_v60 = vpop.f32.mrf.mxu0  ;;  %v4578_v23 = vpop.f32.mrf.mxu1 }
 0xd8f   : > { %v4530_v34 = vadd.f32 %v4529_v60, %v8581_v17  ;;  %v4579_v51 = vadd.f32 %v4578_v23, %v8583_v26 }
 0xd90   : > { %v4336_v28 = vmul.f32 %v6562_v9, %v4335_v22 }
 0xd91   : > { %v4647_v30 = vmul.f32 0.044715, %v4530_v34  ;;  %v4648_v2 = vmul.f32 0.044715, %v4579_v51 }
 0xd92   : > { %v4340_v38 = vsel %vm4339_vm1, %v6562_v9, %v4336_v28 }
 0xd93   : > { %v4356_v46 = vmul.f32 %v4340_v38, %v8545_v62  ;;  %v4679_v15 = vmul.f32 %v4647_v30, %v4530_v34  ;;  %v4680_v12 = vmul.f32 %v4648_v2, %v4579_v51 }
 0xd95   : > { %v4375_v49 = vmul.f32 %v8456_v50, %v4356_v46  ;;  %v4711_v35 = vmul.f32 %v4679_v15, %v4530_v34  ;;  %v4712_v37 = vmul.f32 %v4680_v12, %v4579_v51  ;;  %v4615_v46 = vmul.f32 0.5, %v4530_v34 }
 0xd96   : > { %v4531_v33 = vpop.f32.mrf.mxu0  ;;  %v4580_v24 = vpop.f32.mrf.mxu1 }
 0xd97   : > { %v4532_v18 = vadd.f32 %v4531_v33, %v8581_v17  ;;  %v4581_v43 = vadd.f32 %v4580_v24, %v8583_v26  ;;  %v4394_v40 = vadd.f32 %v8470_v14, %v4375_v49  ;;  %v4743_v58 = vadd.f32 %v4711_v35, %v4530_v34 }
 0xd98   : > { %v4744_v52 = vadd.f32 %v4712_v37, %v4579_v51  ;;  %v4616_v49 = vmul.f32 0.5, %v4579_v51 }
 0xd99   : > { %v4649_v5 = vmul.f32 0.044715, %v4532_v18  ;;  %v4650_v62 = vmul.f32 0.044715, %v4581_v43  ;;  %v4402_v0 = vpack.c.bf16 %v4394_v40, %v4393_v54  ;;  %v4775_v42 = vmul.f32 0.7978846, %v4743_v58 }
 0xd9a   : > { %v4776_v6 = vmul.f32 0.7978846, %v4744_v52  ;;  %v4617_v15 = vmul.f32 0.5, %v4532_v18  ;;  %v4618_v35 = vmul.f32 0.5, %v4581_v43 }
 0xd9b   : > { %v4681_v27 = vmul.f32 %v4649_v5, %v4532_v18  ;;  %v4682_v50 = vmul.f32 %v4650_v62, %v4581_v43  ;;  %4548 = vmatmul.bf16.gmra.mxu0 %v4402_v0  ;;  %4597 = vmatmul.bf16.gmra.mxu1 %v4402_v0  ;;  %6563 = vtanh.f32 %v4775_v42 }
 0xd9c   : > { %6565 = vtanh.f32 %v4776_v6 }
 0xd9d   : > { %v4713_v36 = vmul.f32 %v4681_v27, %v4532_v18  ;;  %v4714_v61 = vmul.f32 %v4682_v50, %v4581_v43 }
 0xd9f   : > { %v4745_v59 = vadd.f32 %v4713_v36, %v4532_v18  ;;  %v4746_v45 = vadd.f32 %v4714_v61, %v4581_v43  ;;  %v4534_v3 = vpop.f32.mrf.mxu0  ;;  %v4583_v20 = vpop.f32.mrf.mxu1 }
 0xda0   : > { %v8792_v19 = vadd.f32 %v4534_v3, %v8581_v17  ;;  %v8795_v55 = vadd.f32 %v4583_v20, %v8583_v26 }
 0xda1   : > { %v4777_v9 = vmul.f32 0.7978846, %v4745_v59  ;;  %v4778_v7 = vmul.f32 0.7978846, %v4746_v45  ;;  %v6564_v14 = vpop.eup %6563 }
 0xda2   : > { %v6566_v21 = vpop.eup %6565  ;;  %v4651_v22 = vmul.f32 0.044715, %v8792_v19  ;;  %v4652_v60 = vmul.f32 0.044715, %v8795_v55  ;;  %v4839_v23 = vadd.f32 1.0, %v6564_v14 }
 0xda3   : > { %6567 = vtanh.f32 %v4777_v9  ;;  %v4840_v28 = vadd.f32 1.0, %v6566_v21 }
 0xda4   : > { %6569 = vtanh.f32 %v4778_v7  ;;  %v4683_v2 = vmul.f32 %v4651_v22, %v8792_v19  ;;  %v4684_v38 = vmul.f32 %v4652_v60, %v8795_v55  ;;  %v4871_v58 = vmul.f32 %v4839_v23, %v4615_v46 }
 0xda5   : > { %v4872_v5 = vmul.f32 %v4840_v28, %v4616_v49 }
 0xda6   : > { %v4715_v33 = vmul.f32 %v4683_v2, %v8792_v19  ;;  %v4716_v24 = vmul.f32 %v4684_v38, %v8795_v55 }
 0xda7   : > { %v4536_v54 = vpop.f32.mrf.mxu0  ;;  %v4585_v40 = vpop.f32.mrf.mxu1 }
 0xda8   : > { %v4537_v34 = vadd.f32 %v4536_v54, %v8581_v17  ;;  %v4586_v18 = vadd.f32 %v4585_v40, %v8583_v26  ;;  %v4747_v62 = vadd.f32 %v4715_v33, %v8792_v19  ;;  %v4748_v4 = vadd.f32 %v4716_v24, %v8795_v55 }
 0xda9   : > { %v6568_v30 = vpop.eup %6567 }
 0xdaa   : > { %v6570_v48 = vpop.eup %6569  ;;  %v4841_v12 = vadd.f32 1.0, %v6568_v30  ;;  %v4654_v43 = vmul.f32 0.044715, %v4586_v18  ;;  %v4779_v42 = vmul.f32 0.7978846, %v4747_v62  ;;  %v4621_v62 = vmul.f32 0.5, %v4537_v34 }
 0xdab   : > { %5096 = vmatmul.bf16.vlgmr.msrb.gmra.mxu0 %v4892_v32  ;;  %v4842_v37 = vadd.f32 1.0, %v6570_v48  ;;  %v4653_v32 = vmul.f32 0.044715, %v4537_v34  ;;  %v4780_v6 = vmul.f32 0.7978846, %v4748_v4  ;;  %v4620_v4 = vmul.f32 0.5, %v8795_v55 }
 0xdac   : > { %v4873_v52 = vmul.f32 %v4841_v12, %v4617_v15  ;;  %v4686_v50 = vmul.f32 %v4654_v43, %v4586_v18  ;;  %6571 = vtanh.f32 %v4779_v42  ;;  %v4622_v42 = vmul.f32 0.5, %v4586_v18 }
 0xdad   : > { %v4874_v51 = vmul.f32 %v4842_v37, %v4618_v35  ;;  %v4685_v27 = vmul.f32 %v4653_v32, %v4537_v34  ;;  %6573 = vtanh.f32 %v4780_v6 }
 0xdae   : > { %v4897_v11 = vpack.c.bf16 %v4873_v52, %v4871_v58  ;;  %v4718_v61 = vmul.f32 %v4686_v50, %v4586_v18  ;;  %v4619_v52 = vmul.f32 0.5, %v8792_v19 }
 0xdaf   : > { %v4898_v0 = vpack.c.bf16 %v4874_v51, %v4872_v5  ;;  %v4717_v36 = vmul.f32 %v4685_v27, %v4537_v34  ;;  %v4539_v59 = vpop.f32.mrf.mxu0  ;;  %v4588_v45 = vpop.f32.mrf.mxu1 }
 0xdb0   : > { %5062 = vmatmul.bf16.gmra.mxu2 %v4897_v11  ;;  %v8811_v9 = vadd.f32 %v4539_v59, %v8581_v17  ;;  %v8814_v7 = vadd.f32 %v4588_v45, %v8583_v26  ;;  %v4750_v3 = vadd.f32 %v4718_v61, %v4586_v18 }
 0xdb1   : > { %5111 = vmatmul.bf16.gmra.mxu3 %v4898_v0  ;;  %v4749_v14 = vadd.f32 %v4717_v36, %v4537_v34 }
 0xdb2   : > { %v4655_v20 = vmul.f32 0.044715, %v8811_v9  ;;  %v4656_v21 = vmul.f32 0.044715, %v8814_v7  ;;  %v4782_v60 = vmul.f32 0.7978846, %v4750_v3  ;;  %v6572_v2 = vpop.eup %6571 }
 0xdb3   : > { %v4781_v22 = vmul.f32 0.7978846, %v4749_v14  ;;  %v6574_v46 = vpop.eup %6573  ;;  %v4843_v33 = vadd.f32 1.0, %v6572_v2 }
 0xdb4   : > { %v4687_v23 = vmul.f32 %v4655_v20, %v8811_v9  ;;  %v4688_v28 = vmul.f32 %v4656_v21, %v8814_v7  ;;  %v4844_v5 = vadd.f32 1.0, %v6574_v46 }
 0xdb5   : > { %6575 = vtanh.f32 %v4781_v22  ;;  %v4875_v50 = vmul.f32 %v4843_v33, %v4619_v52 }
 0xdb6   : > { %6577 = vtanh.f32 %v4782_v60  ;;  %v4719_v38 = vmul.f32 %v4687_v23, %v8811_v9  ;;  %v4720_v48 = vmul.f32 %v4688_v28, %v8814_v7  ;;  %v4876_v61 = vmul.f32 %v4844_v5, %v4620_v4 }
 0xdb7   : > { %v4541_v15 = vpop.f32.mrf.mxu0  ;;  %v4590_v12 = vpop.f32.mrf.mxu1  ;;  %v4623_v4 = vmul.f32 0.5, %v8811_v9 }
 0xdb8   : > { %v8825_v49 = vadd.f32 %v4541_v15, %v8581_v17  ;;  %v8828_v35 = vadd.f32 %v4590_v12, %v8583_v26  ;;  %v4751_v37 = vadd.f32 %v4719_v38, %v8811_v9  ;;  %v4752_v24 = vadd.f32 %v4720_v48, %v8814_v7 }
 0xdb9   : > { %v8820_v30 = vpop.f32.mrf.mxu2 }
 0xdba   : > { %v4657_v40 = vmul.f32 0.044715, %v8825_v49  ;;  %v4658_v58 = vmul.f32 0.044715, %v8828_v35  ;;  %v4783_v32 = vmul.f32 0.7978846, %v4751_v37 }
 0xdbb   : > { %v6576_v54 = vpop.eup %6575  ;;  %v4784_v36 = vmul.f32 0.7978846, %v4752_v24 }
 0xdbc   : > { %v6578_v51 = vpop.eup %6577  ;;  %v4845_v11 = vadd.f32 1.0, %v6576_v54  ;;  %v4689_v43 = vmul.f32 %v4657_v40, %v8825_v49  ;;  %v4690_v0 = vmul.f32 %v4658_v58, %v8828_v35  ;;  %6579 = vtanh.f32 %v4783_v32  ;;  %v8860_v54 = vld [vmem:[%s8984_s13] ss:$0 sm:$0xff] }
 0xdbd   : > { %v4846_v27 = vadd.f32 1.0, %v6578_v51  ;;  %6581 = vtanh.f32 %v4784_v36 }
 0xdbe   : > { %v4877_v6 = vmul.f32 %v4845_v11, %v4621_v62  ;;  %v4721_v19 = vmul.f32 %v4689_v43, %v8825_v49  ;;  %v4722_v34 = vmul.f32 %v4690_v0, %v8828_v35 }
 0xdbf   : > { %v4878_v59 = vmul.f32 %v4846_v27, %v4622_v42  ;;  %v4544_v14 = vpop.f32.mrf.mxu0  ;;  %v4593_v55 = vpop.f32.mrf.mxu1 }
 0xdc0   : > { %v4899_v3 = vpack.c.bf16 %v4877_v6, %v4875_v50  ;;  %v8843_v20 = vadd.f32 %v4544_v14, %v8581_v17  ;;  %v8846_v18 = vadd.f32 %v4593_v55, %v8583_v26  ;;  %v4753_v22 = vadd.f32 %v4721_v19, %v8825_v49 }
 0xdc1   : > { %v8838_v45 = vpop.f32.mrf.mxu2  ;;  %v4900_v21 = vpack.c.bf16 %v4878_v59, %v4876_v61  ;;  %v4754_v60 = vadd.f32 %v4722_v34, %v8828_v35  ;;  %v4624_v50 = vmul.f32 0.5, %v8814_v7  ;;  %v4625_v59 = vmul.f32 0.5, %v8825_v49 }
 0xdc2   : > { %5067 = vmatmul.bf16.gmra.mxu2 %v4899_v3  ;;  %v4659_v23 = vmul.f32 0.044715, %v8843_v20  ;;  %v4660_v28 = vmul.f32 0.044715, %v8846_v18  ;;  %v4785_v2 = vmul.f32 0.7978846, %v4753_v22  ;;  %v6580_v15 = vpop.eup %6579 }
 0xdc3   : > { %5116 = vmatmul.bf16.gmra.mxu3 %v4900_v21  ;;  %v4786_v38 = vmul.f32 0.7978846, %v4754_v60  ;;  %v6582_v24 = vpop.eup %6581  ;;  %v4847_v32 = vadd.f32 1.0, %v6580_v15  ;;  %v4626_v34 = vmul.f32 0.5, %v8828_v35 }
 0xdc4   : > { %v4691_v48 = vmul.f32 %v4659_v23, %v8843_v20  ;;  %v4692_v46 = vmul.f32 %v4660_v28, %v8846_v18  ;;  %6583 = vtanh.f32 %v4785_v2  ;;  %v4848_v6 = vadd.f32 1.0, %v6582_v24 }
 0xdc5   : > { %6585 = vtanh.f32 %v4786_v38  ;;  %v4879_v22 = vmul.f32 %v4847_v32, %v4623_v4 }
 0xdc6   : > { %v4723_v37 = vmul.f32 %v4691_v48, %v8843_v20  ;;  %v4724_v33 = vmul.f32 %v4692_v46, %v8846_v18  ;;  %v4880_v28 = vmul.f32 %v4848_v6, %v4624_v50  ;;  %v4627_v50 = vmul.f32 0.5, %v8843_v20 }
 0xdc7   : > { %v4546_v40 = vpop.f32.mrf.mxu0  ;;  %v4595_v58 = vpop.f32.mrf.mxu1 }
 0xdc8   : > { %v4547_v52 = vadd.f32 %v4546_v40, %v8581_v17  ;;  %v8864_v5 = vadd.f32 %v4595_v58, %v8583_v26  ;;  %v4755_v62 = vadd.f32 %v4723_v37, %v8843_v20  ;;  %v4756_v43 = vadd.f32 %v4724_v33, %v8846_v18 }
 0xdc9   : > { %v5102_v12 = vpop.f32.mrf.mxu3 }
 0xdca   : > { %v5053_v51 = vpop.f32.mrf.mxu2  ;;  %v6584_v0 = vpop.eup %6583  ;;  %v4661_v42 = vmul.f32 0.044715, %v4547_v52  ;;  %v4662_v27 = vmul.f32 0.044715, %v8864_v5  ;;  %v4787_v3 = vmul.f32 0.7978846, %v4755_v62 }
 0xdcb   : > { %v5054_v11 = vadd.f32 %v8860_v54, %v5053_v51  ;;  %v6586_v36 = vpop.eup %6585  ;;  %v4849_v19 = vadd.f32 1.0, %v6584_v0  ;;  %v4788_v23 = vmul.f32 0.7978846, %v4756_v43  ;;  %v4629_v6 = vmul.f32 0.5, %v4547_v52 }
 0xdcc   : > { %v4693_v14 = vmul.f32 %v4661_v42, %v4547_v52  ;;  %v4694_v9 = vmul.f32 %v4662_v27, %v8864_v5  ;;  %v4850_v55 = vadd.f32 1.0, %v6586_v36  ;;  %6587 = vtanh.f32 %v4787_v3 }
 0xdcd   : > { %v5103_v61 = vadd.f32 %v5102_v12, %v5054_v11  ;;  %v4881_v60 = vmul.f32 %v4849_v19, %v4625_v59  ;;  %6589 = vtanh.f32 %v4788_v23 }
 0xdce   : > { %v4882_v7 = vmul.f32 %v4850_v55, %v4626_v34  ;;  %v4725_v38 = vmul.f32 %v4693_v14, %v4547_v52  ;;  %v4726_v48 = vmul.f32 %v4694_v9, %v8864_v5 }
 0xdcf   : > { %v5139_v21 = vadd.f32 %v5103_v61, %v8213_v57  ;;  %v4901_v49 = vpack.c.bf16 %v4881_v60, %v4879_v22  ;;  %v4630_v61 = vmul.f32 0.5, %v8864_v5 }
 0xdd0   : > { %v4902_v35 = vpack.c.bf16 %v4882_v7, %v4880_v28  ;;  %v4757_v15 = vadd.f32 %v4725_v38, %v4547_v52  ;;  %v4758_v57 = vadd.f32 %v4726_v48, %v8864_v5 }
 0xdd1   : > { %v5104_v2 = vpop.f32.mrf.mxu3  ;;  %5155 = vst [vmem:[%s8879_s0 + $0x10] sm:$0xff] %v5139_v21 }
 0xdd2   : > { %v5055_v46 = vpop.f32.mrf.mxu2  ;;  %5072 = vmatmul.bf16.gmra.mxu2 %v4901_v49  ;;  %v4789_v37 = vmul.f32 0.7978846, %v4757_v15  ;;  %v4790_v33 = vmul.f32 0.7978846, %v4758_v57  ;;  %v6588_v58 = vpop.eup %6587 }
 0xdd3   : > { %v5056_v12 = vadd.f32 %v8860_v54, %v5055_v46  ;;  %5121 = vmatmul.bf16.gmra.mxu3 %v4902_v35  ;;  %v6590_v51 = vpop.eup %6589  ;;  %v4851_v32 = vadd.f32 1.0, %v6588_v58 }
 0xdd4   : > { %6591 = vtanh.f32 %v4789_v37  ;;  %v4852_v0 = vadd.f32 1.0, %v6590_v51 }
 0xdd5   : > { %v5105_v24 = vadd.f32 %v5104_v2, %v5056_v12  ;;  %6593 = vtanh.f32 %v4790_v33  ;;  %v4883_v34 = vmul.f32 %v4851_v32, %v4627_v50 }
 0xdd7   : > { %v5140_v40 = vadd.f32 %v5105_v24, %v8219_v31  ;;  %v4628_v31 = vmul.f32 0.5, %v8846_v18 }
 0xdd9   : > { %5156 = vst [vmem:[%s8879_s0 + $0x18] sm:$0xff] %v5140_v40  ;;  %v4884_v9 = vmul.f32 %v4852_v0, %v4628_v31 }
 0xdda   : > { %v5058_v62 = vpop.f32.mrf.mxu2  ;;  %v5107_v11 = vpop.f32.mrf.mxu3 }
 0xddb   : > { %v5059_v4 = vadd.f32 %v8860_v54, %v5058_v62  ;;  %v6592_v43 = vpop.eup %6591 }
 0xddc   : > { %v6594_v42 = vpop.eup %6593  ;;  %v4853_v36 = vadd.f32 1.0, %v6592_v43 }
 0xddd   : > { %v5108_v27 = vadd.f32 %v5107_v11, %v5059_v4  ;;  %v4854_v59 = vadd.f32 1.0, %v6594_v42  ;;  %v5049_v11 = vadd.f32 %v8860_v54, %v8820_v30  ;;  %v5051_v30 = vadd.f32 %v8860_v54, %v8838_v45 }
 0xdde   : > { %v4885_v14 = vmul.f32 %v4853_v36, %v4629_v6 }
 0xddf   : > { %v5141_v19 = vadd.f32 %v5108_v27, %v8225_v39  ;;  %v4886_v55 = vmul.f32 %v4854_v59, %v4630_v61 }
 0xde0   : > { %v4903_v3 = vpack.c.bf16 %v4885_v14, %v4883_v34 }
 0xde1   : > { %5157 = vst [vmem:[%s8879_s0 + $0x20] sm:$0xff] %v5141_v19  ;;  %v4904_v21 = vpack.c.bf16 %v4886_v55, %v4884_v9 }
 0xde2   : > { %v5060_v22 = vpop.f32.mrf.mxu2  ;;  %5077 = vmatmul.bf16.gmra.mxu2 %v4903_v3  ;;  %v5109_v52 = vpop.f32.mrf.mxu3 }
 0xde3   : > { %v5061_v20 = vadd.f32 %v8860_v54, %v5060_v22  ;;  %5126 = vmatmul.bf16.gmra.mxu3 %v4904_v21 }
 0xde5   : > { %v5110_v18 = vadd.f32 %v5109_v52, %v5061_v20 }
 0xde7   : > { %v5142_v5 = vadd.f32 %v5110_v18, %v8231_v41 }
 0xde9   : > { %5158 = vst [vmem:[%s8879_s0 + $0x28] sm:$0xff] %v5142_v5 }
 0xe18   : > { %v4549_v60 = vpop.f32.mrf.mxu0  ;;  %v4598_v23 = vpop.f32.mrf.mxu1 }
 0xe19   : > { %v4550_v39 = vadd.f32 %v4549_v60, %v8581_v17  ;;  %v4599_v28 = vadd.f32 %v4598_v23, %v8583_v26 }
 0xe1b   : > { %v4663_v7 = vmul.f32 0.044715, %v4550_v39  ;;  %v4664_v2 = vmul.f32 0.044715, %v4599_v28  ;;  %v4631_v21 = vmul.f32 0.5, %v4550_v39  ;;  %v4632_v52 = vmul.f32 0.5, %v4599_v28 }
 0xe1d   : > { %v4695_v38 = vmul.f32 %v4663_v7, %v4550_v39  ;;  %v4696_v48 = vmul.f32 %v4664_v2, %v4599_v28 }
 0xe1f   : > { %v4727_v49 = vmul.f32 %v4695_v38, %v4550_v39  ;;  %v4728_v35 = vmul.f32 %v4696_v48, %v4599_v28 }
 0xe20   : > { %v4551_v46 = vpop.f32.mrf.mxu0  ;;  %v4600_v15 = vpop.f32.mrf.mxu1 }
 0xe21   : > { %v4552_v57 = vadd.f32 %v4551_v46, %v8581_v17  ;;  %v4601_v12 = vadd.f32 %v4600_v15, %v8583_v26  ;;  %v4759_v41 = vadd.f32 %v4727_v49, %v4550_v39  ;;  %v4760_v37 = vadd.f32 %v4728_v35, %v4599_v28 }
 0xe23   : > { %v4665_v33 = vmul.f32 0.044715, %v4552_v57  ;;  %v4666_v24 = vmul.f32 0.044715, %v4601_v12  ;;  %v4791_v51 = vmul.f32 0.7978846, %v4759_v41 }
 0xe24   : > { %v4792_v62 = vmul.f32 0.7978846, %v4760_v37  ;;  %v4633_v22 = vmul.f32 0.5, %v4552_v57  ;;  %v4634_v45 = vmul.f32 0.5, %v4601_v12 }
 0xe25   : > { %v4697_v40 = vmul.f32 %v4665_v33, %v4552_v57  ;;  %v4698_v58 = vmul.f32 %v4666_v24, %v4601_v12  ;;  %6595 = vtanh.f32 %v4791_v51 }
 0xe26   : > { %6597 = vtanh.f32 %v4792_v62 }
 0xe27   : > { %v4729_v4 = vmul.f32 %v4697_v40, %v4552_v57  ;;  %v4730_v32 = vmul.f32 %v4698_v58, %v4601_v12 }
 0xe28   : > { %v5097_v43 = vpop.f32.mrf.mxu0 }
 0xe29   : > { %v5098_v0 = vadd.f32 %v5097_v43, %v5049_v11  ;;  %v4761_v42 = vadd.f32 %v4729_v4, %v4552_v57  ;;  %v4762_v17 = vadd.f32 %v4730_v32, %v4601_v12 }
 0xe2b   : > { %v5137_v26 = vadd.f32 %v5098_v0, %v8201_v8  ;;  %v4793_v27 = vmul.f32 0.7978846, %v4761_v42  ;;  %v4794_v50 = vmul.f32 0.7978846, %v4762_v17  ;;  %v6596_v6 = vpop.eup %6595 }
 0xe2c   : > { %v6598_v36 = vpop.eup %6597  ;;  %v4855_v59 = vadd.f32 1.0, %v6596_v6 }
 0xe2d   : > { %5153 = vst [vmem:[%s8879_s0] sm:$0xff] %v5137_v26  ;;  %6599 = vtanh.f32 %v4793_v27  ;;  %v4856_v9 = vadd.f32 1.0, %v6598_v36 }
 0xe2e   : > { %6601 = vtanh.f32 %v4794_v50  ;;  %v4887_v60 = vmul.f32 %v4855_v59, %v4631_v21 }
 0xe2f   : > { %v4888_v7 = vmul.f32 %v4856_v9, %v4632_v52 }
 0xe30   : > { %v5099_v31 = vpop.f32.mrf.mxu0 }
 0xe31   : > { %v5100_v61 = vadd.f32 %v5099_v31, %v5051_v30 }
 0xe33   : > { %v6600_v19 = vpop.eup %6599  ;;  %v5138_v34 = vadd.f32 %v5100_v61, %v8207_v29  ;;  %v5063_v14 = vpop.f32.mrf.mxu2 }
 0xe34   : > { %v6602_v8 = vpop.eup %6601  ;;  %v5064_v55 = vadd.f32 %v8860_v54, %v5063_v14  ;;  %v5112_v3 = vpop.f32.mrf.mxu3  ;;  %v4857_v20 = vadd.f32 1.0, %v6600_v19 }
 0xe35   : > { %5154 = vst [vmem:[%s8879_s0 + $0x8] sm:$0xff] %v5138_v34  ;;  %v4858_v18 = vadd.f32 1.0, %v6602_v8 }
 0xe36   : > { %v5113_v5 = vadd.f32 %v5112_v3, %v5064_v55  ;;  %v4889_v23 = vmul.f32 %v4857_v20, %v4633_v22 }
 0xe37   : > { %v4890_v29 = vmul.f32 %v4858_v18, %v4634_v45 }
 0xe38   : > { %v5143_v2 = vadd.f32 %v5113_v5, %v8237_v13  ;;  %v4905_v38 = vpack.c.bf16 %v4889_v23, %v4887_v60 }
 0xe39   : > { %v4906_v48 = vpack.c.bf16 %v4890_v29, %v4888_v7 }
 0xe3a   : > { %5159 = vst [vmem:[%s8879_s0 + $0x30] sm:$0xff] %v5143_v2  ;;  %5082 = vmatmul.bf16.gmra.mxu2 %v4905_v38 }
 0xe3b   : > { %5131 = vmatmul.bf16.gmra.mxu3 %v4906_v48  ;;  %v5065_v39 = vpop.f32.mrf.mxu2 }
 0xe3c   : > { %v5066_v49 = vadd.f32 %v8860_v54, %v5065_v39  ;;  %v5114_v28 = vpop.f32.mrf.mxu3 }
 0xe3e   : > { %v5115_v35 = vadd.f32 %v5114_v28, %v5066_v49 }
 0xe40   : > { %v5144_v46 = vadd.f32 %v5115_v35, %v8254_v53 }
 0xe42   : > { %5160 = vst [vmem:[%s8879_s0 + $0x38] sm:$0xff] %v5144_v46 }
 0xe45   : > { %v5068_v15 = vpop.f32.mrf.mxu2 }
 0xe46   : > { %v5069_v57 = vadd.f32 %v8860_v54, %v5068_v15  ;;  %v5117_v13 = vpop.f32.mrf.mxu3 }
 0xe48   : > { %v5118_v12 = vadd.f32 %v5117_v13, %v5069_v57 }
 0xe4a   : > { %v5145_v41 = vadd.f32 %v5118_v12, %v8268_v47 }
 0xe4c   : > { %5161 = vst [vmem:[%s8879_s0 + $0x40] sm:$0xff] %v5145_v41 }
 0xe4d   : > { %v5070_v37 = vpop.f32.mrf.mxu2 }
 0xe4e   : > { %v5071_v33 = vadd.f32 %v8860_v54, %v5070_v37  ;;  %v5119_v24 = vpop.f32.mrf.mxu3 }
 0xe50   : > { %v5120_v40 = vadd.f32 %v5119_v24, %v5071_v33 }
 0xe52   : > { %v5146_v58 = vadd.f32 %v5120_v40, %v8282_v44 }
 0xe54   : > { %5162 = vst [vmem:[%s8879_s0 + $0x48] sm:$0xff] %v5146_v58 }
 0xe55   : > { %v5073_v53 = vpop.f32.mrf.mxu2 }
 0xe56   : > { %v5074_v51 = vadd.f32 %v8860_v54, %v5073_v53  ;;  %v5122_v62 = vpop.f32.mrf.mxu3 }
 0xe58   : > { %v5123_v11 = vadd.f32 %v5122_v62, %v5074_v51 }
 0xe5a   : > { %v5147_v4 = vadd.f32 %v5123_v11, %v8294_v10 }
 0xe5c   : > { %5163 = vst [vmem:[%s8879_s0 + $0x50] sm:$0xff] %v5147_v4 }
 0xe5d   : > { %v5075_v47 = vpop.f32.mrf.mxu2 }
 0xe5e   : > { %v5076_v32 = vadd.f32 %v8860_v54, %v5075_v47  ;;  %v5124_v43 = vpop.f32.mrf.mxu3 }
 0xe60   : > { %v5125_v0 = vadd.f32 %v5124_v43, %v5076_v32 }
 0xe62   : > { %v5148_v42 = vadd.f32 %v5125_v0, %v8308_v25 }
 0xe64   : > { %5164 = vst [vmem:[%s8879_s0 + $0x58] sm:$0xff] %v5148_v42 }
 0xe65   : > { %v5078_v44 = vpop.f32.mrf.mxu2 }
 0xe66   : > { %v5079_v17 = vadd.f32 %v8860_v54, %v5078_v44  ;;  %v5127_v26 = vpop.f32.mrf.mxu3 }
 0xe68   : > { %v5128_v27 = vadd.f32 %v5127_v26, %v5079_v17 }
 0xe6a   : > { %v5149_v50 = vadd.f32 %v5128_v27, %v8322_v56 }
 0xe6c   : > { %5165 = vst [vmem:[%s8879_s0 + $0x60] sm:$0xff] %v5149_v50 }
 0xe6d   : > { %v5080_v10 = vpop.f32.mrf.mxu2 }
 0xe6e   : > { %v5081_v6 = vadd.f32 %v8860_v54, %v5080_v10  ;;  %v5129_v30 = vpop.f32.mrf.mxu3 }
 0xe70   : > { %v5130_v36 = vadd.f32 %v5129_v30, %v5081_v6 }
 0xe72   : > { %v5150_v31 = vadd.f32 %v5130_v36, %v8328_v1 }
 0xe74   : > { %5166 = vst [vmem:[%s8879_s0 + $0x68] sm:$0xff] %v5150_v31 }
 0xebd   : > { %v5083_v25 = vpop.f32.mrf.mxu2 }
 0xebe   : > { %v5084_v61 = vadd.f32 %v8860_v54, %v5083_v25  ;;  %v5132_v59 = vpop.f32.mrf.mxu3 }
 0xec0   : > { %v5133_v19 = vadd.f32 %v5132_v59, %v5084_v61 }
 0xec2   : > { %v5151_v56 = vadd.f32 %v5133_v19, %v8333_v16 }
 0xec4   : > { %5167 = vst [vmem:[%s8879_s0 + $0x70] sm:$0xff] %v5151_v56 }
 0xec5   : > { %v5085_v34 = vpop.f32.mrf.mxu2 }
 0xec6   : > { %v5086_v1 = vadd.f32 %v8860_v54, %v5085_v34  ;;  %v5134_v14 = vpop.f32.mrf.mxu3 }
 0xec8   : > { %v5135_v9 = vadd.f32 %v5134_v14, %v5086_v1 }
 0xeca   : > { %v5152_v8 = vadd.f32 %v5135_v9, %v8465_v63 }
 0xecc   : > { %5168 = vst [vmem:[%s8879_s0 + $0x78] sm:$0xff] %v5152_v8 }
 0xecd   : > { %6646 = shalt.err (!%p6643_p3)
}
 0xece   : > { %s6684_s25 = smov 128   ;;  %s6685_s0 = smov 8  }
 0xecf   : > { %6169 = dma.vmem_to_hbm [thread:$0]  (%p6799_p5), %s5183_s20, 2048, %s5185_s21, %s5170_s17, %s6684_s25, %s6684_s25, %s6685_s0  }
 0xed0 PF: > { %p6175_p4 = scmp.ge.s32.totalorder %s6681_s16, 2  ;;  %s5199_s28 = sand.u32 1, %s6669_s29  }
 0xed1   : > { %s5200_s22 = scalar_lea.sflag [#allocation3], %s5199_s28 }
 0xed2   : > { %p6172_p7 = pnand %p6175_p4, %p6803_p6 }
 0xed4   : > { %p6173_p8 = pneg %p6172_p7 }
 0xed6   : > { %6664 = dma.done.wait (%p6173_p8), %s5200_s22, 2048  }
 0xed7   : > { %6666 = vsyncadd (%p6173_p8), %s5200_s22, 4294965248  ;;  %s9022_s16 = sld [smem:[#allocation6_spill]]  ;;  %s9025_s29 = smov %s6673_s30 }
 0xed8   : > { %s9023_s26 = sld [smem:[#allocation5_spill]] }
 0xed9   : > { %s9024_s15 = sld [smem:[#allocation7_spill]] }
 0xedd   : > { %p24_p9 = scmp.ge.s32.totalorder %s9022_s16, 4  }
 0xede   : > { %s9026_s30 = smov %s9023_s26 }
 0xedf   :  { %26 = sbr.rel (!%p24_p9) target bundleno = 5 (0x5), region = 123 }
 0xee4   :  { %5206 = vsyncpa [#allocation3], 1 }
 0xee5   :  { %5208 = vsyncpa [#allocation3 + $0x1], 1 }

</bundles_post_ra>
